<compile_context>
chip_gen: v6e
topology: v6e:2x2x1
jax: 0.10.0
libtpu: 0.0.40
codegen_flags: <defaults>
</compile_context>

<pallas_src>
import functools

import jax
import jax.numpy as jnp
from jax import lax
from jax.experimental import pallas as pl
from jax.experimental.pallas import tpu as pltpu

BACKBONE_DIM = 2048   # resnet50 feature dim
OUTPUT_DIM = 512      # module default output_dim


# ----------------------------------------------------------------------------
# Fused Pallas kernel: conv-GEMM + ReLU + global-avg-pool + Linear + ReLU
# ----------------------------------------------------------------------------
def _fused_backbone_kernel(cols_ref, cw_ref, cb_ref, pw_ref, pb_ref,
                           o_ref, acc_ref, *, inv_s):
    """Grid = (batch [parallel], spatial tiles [arbitrary / reduction])."""
    s = pl.program_id(1)

    @pl.when(s == 0)
    def _init():
        acc_ref[...] = jnp.zeros_like(acc_ref)

    # K-major cols tile: (K, ts) bf16, spatial on the lane axis.
    x = cols_ref[0]
    # conv as GEMM, contracting K (dim 0 of both operands): -> (ts, 2048) f32
    feat = lax.dot_general(
        x, cw_ref[...],
        dimension_numbers=(((0,), (0,)), ((), ())),
        preferred_element_type=jnp.float32)
    feat = jnp.maximum(feat + cb_ref[...], 0.0)            # bias + ReLU (f32)

    # Global-average-pool accumulation: fold ts rows down to 8 sublane rows
    # with aligned VALU adds; defer the 8->1 XLU reduce to the finalize step.
    ts, n = feat.shape
    if ts % 8 == 0:
        acc_ref[...] += feat.reshape(ts // 8, 8, n).sum(axis=0)     # (8, 2048)
    else:
        acc_ref[0:1, :] += jnp.sum(feat, axis=0, keepdims=True)

    @pl.when(s == pl.num_programs(1) - 1)
    def _finalize():
        pooled = jnp.sum(acc_ref[...], axis=0, keepdims=True) * inv_s   # (1, 2048)
        # projection head: Dropout(0.2) is identity in eval; Linear + ReLU
        proj = jnp.dot(pooled.astype(jnp.bfloat16), pw_ref[...],
                       preferred_element_type=jnp.float32)              # (1, 512)
        proj = jnp.maximum(proj + pb_ref[...], 0.0)
        o_ref[...] = proj.reshape(o_ref.shape).astype(o_ref.dtype)


# ----------------------------------------------------------------------------
# JAX glue
# ----------------------------------------------------------------------------
def _pick_spatial_tile(s):
    """Largest lane-aligned tile (multiple of 128, <= 1024) dividing S, else S."""
    for t in (1024, 512, 256, 128):
        if t <= s and s % t == 0:
            return t
    return s


def _im2col_3x3_kmajor(x_nchw):
    """3x3 / stride 1 / pad 1 patches, K-major: (B, C, H, W) -> (B, 9*C, H*W).

    Tap-major / channel-minor along K, matching the conv weight (tap, cin, cout)
    layout.  Input is cast to bf16 BEFORE pad/stack to halve staging traffic.
    """
    B, C, H, W = x_nchw.shape
    x = x_nchw.astype(jnp.bfloat16)
    xp = jnp.pad(x, ((0, 0), (0, 0), (1, 1), (1, 1)))
    taps = [xp[:, :, dy:dy + H, dx:dx + W]
            for dy in range(3) for dx in range(3)]         # 9 x (B, C, H, W)
    cols = jnp.stack(taps, axis=1)                         # (B, 9, C, H, W)
    return cols.reshape(B, 9 * C, H * W)                   # (B, 9*C, S) bf16


def _prep_conv_weight(conv_w, c_in):
    """(9, 3, 2048) f32 -> (K, 2048) bf16; fold x.repeat(1,3,1,1) for c_in==1."""
    if c_in == 1:
        w2d = conv_w.sum(axis=1)                           # (9, 2048)
    else:
        assert c_in == conv_w.shape[1], "expected 1 or 3 input channels"
        w2d = conv_w.reshape(9 * conv_w.shape[1], BACKBONE_DIM)
    return w2d.astype(jnp.bfloat16)


def init_params(key):
    k1, k2, k3, k4 = jax.random.split(key, 4)
    # synthetic backbone conv: 3x3, 3 -> BACKBONE_DIM, stored (tap, cin, cout)
    conv_w = 0.05 * jax.random.normal(k1, (9, 3, BACKBONE_DIM), jnp.float32)
    conv_b = 0.01 * jax.random.normal(k2, (BACKBONE_DIM,), jnp.float32)
    # projection Linear(BACKBONE_DIM -> OUTPUT_DIM), stored (in, out)
    proj_w = (1.0 / jnp.sqrt(BACKBONE_DIM)) * jax.random.normal(
        k3, (BACKBONE_DIM, OUTPUT_DIM), jnp.float32)
    proj_b = 0.01 * jax.random.normal(k4, (OUTPUT_DIM,), jnp.float32)
    return {"conv_w": conv_w, "conv_b": conv_b,
            "proj_w": proj_w, "proj_b": proj_b}


@jax.jit
def image_encoder_forward(params, x_nchw):
    """x_nchw: (B, C, H, W) float32 -> (B, OUTPUT_DIM) float32."""
    B, C, H, W = x_nchw.shape
    S = H * W

    # `if x.shape[1] == 1: x = x.repeat(1, 3, 1, 1)` folded into the weight.
    w2d = _prep_conv_weight(params["conv_w"], C)           # (K, 2048) bf16
    K = w2d.shape[0]

    cols = _im2col_3x3_kmajor(x_nchw)                      # (B, K, S) bf16

    ts = _pick_spatial_tile(S)
    n_s = S // ts

    out = pl.pallas_call(
        functools.partial(_fused_backbone_kernel, inv_s=1.0 / S),
        out_shape=jax.ShapeDtypeStruct((B, 1, OUTPUT_DIM), jnp.float32),
        grid=(B, n_s),
        in_specs=[
            # K-major spatial tile of im2col columns: (1, K, ts)
            pl.BlockSpec((1, K, ts), lambda b, s: (b, 0, s)),
            # resident weights / biases (constant index_map -> fetched once)
            pl.BlockSpec((K, BACKBONE_DIM), lambda b, s: (0, 0)),
            pl.BlockSpec((1, BACKBONE_DIM), lambda b, s: (0, 0)),
            pl.BlockSpec((BACKBONE_DIM, OUTPUT_DIM), lambda b, s: (0, 0)),
            pl.BlockSpec((1, OUTPUT_DIM), lambda b, s: (0, 0)),
        ],
        out_specs=pl.BlockSpec((1, 1, OUTPUT_DIM), lambda b, s: (b, 0, 0)),
        scratch_shapes=[pltpu.VMEM((8, BACKBONE_DIM), jnp.float32)],
        compiler_params=pltpu.CompilerParams(
            dimension_semantics=("parallel", "arbitrary"),
            vmem_limit_bytes=48 * 1024 * 1024),
    )(cols,
      w2d,
      params["conv_b"].reshape(1, BACKBONE_DIM),
      params["proj_w"].astype(jnp.bfloat16),
      params["proj_b"].reshape(1, OUTPUT_DIM))

    return out.reshape(B, OUTPUT_DIM)


def _reference_forward(params, x_nchw):
    """Pure-JAX reference with the same bf16 staging (for correctness check)."""
    B, C, H, W = x_nchw.shape
    w2d = _prep_conv_weight(params["conv_w"], C)
    cols = _im2col_3x3_kmajor(x_nchw)                      # (B, K, S) bf16
    feat = jnp.einsum("bks,kn->bsn", cols, w2d,
                      preferred_element_type=jnp.float32) + params["conv_b"]
    feat = jnp.maximum(feat, 0.0)
    pooled = jnp.mean(feat, axis=1).astype(jnp.bfloat16)
    proj = jnp.dot(pooled, params["proj_w"].astype(jnp.bfloat16),
                   preferred_element_type=jnp.float32) + params["proj_b"]
    return jnp.maximum(proj, 0.0)


if __name__ == "__main__":
    params = init_params(jax.random.PRNGKey(42))

    # single-channel input -> exercises the folded channel-repeat path (K = 9)
    x1 = jax.random.normal(jax.random.PRNGKey(0), (2, 1, 16, 16), jnp.float32)
    y1 = image_encoder_forward(params, x1)
    jax.block_until_ready(y1)
    assert y1.shape == (2, OUTPUT_DIM), y1.shape
    assert bool(jnp.all(y1 >= 0.0))                        # final ReLU
    y1_ref = _reference_forward(params, x1)
    assert bool(jnp.allclose(y1, y1_ref, atol=2e-3, rtol=2e-3))

    # 3-channel input -> exercises the standard path (K = 27)
    x3 = jax.random.normal(jax.random.PRNGKey(1), (2, 3, 16, 16), jnp.float32)
    y3 = image_encoder_forward(params, x3)
    jax.block_until_ready(y3)
    assert y3.shape == (2, OUTPUT_DIM), y3.shape
    y3_ref = _reference_forward(params, x3)
    assert bool(jnp.allclose(y3, y3_ref, atol=2e-3, rtol=2e-3))

    print("KERNEL_OK")
</pallas_src>

<mosaic_0001>
module attributes {stable_mosaic.version = 11 : i64} {
  func.func @_fused_backbone_kernel(%arg0: i32, %arg1: i32, %arg2: memref<1x9x256xbf16, #tpu.memory_space<vmem>>, %arg3: memref<9x2048xbf16, #tpu.memory_space<vmem>>, %arg4: memref<1x2048xf32, #tpu.memory_space<vmem>>, %arg5: memref<2048x512xbf16, #tpu.memory_space<vmem>>, %arg6: memref<1x512xf32, #tpu.memory_space<vmem>>, %arg7: memref<1x1x512xf32, #tpu.memory_space<vmem>>, %arg8: memref<8x2048xf32, #tpu.memory_space<vmem>>) attributes {dimension_semantics = [#tpu.dimension_semantics<parallel>, #tpu.dimension_semantics<arbitrary>], iteration_bounds = array<i64: 2, 1>, scalar_prefetch = 0 : i64, scratch_operands = 1 : i64, tpu.core_type = #tpu.core_type<tc>, window_params = [{transform_indices = @transform_0, window_bounds = array<i64: 1, 9, 256>}, {pipeline_mode = #tpu.pipeline_mode<synchronous>, transform_indices = @transform_1, window_bounds = array<i64: 9, 2048>}, {pipeline_mode = #tpu.pipeline_mode<synchronous>, transform_indices = @transform_2, window_bounds = array<i64: 1, 2048>}, {pipeline_mode = #tpu.pipeline_mode<synchronous>, transform_indices = @transform_3, window_bounds = array<i64: 2048, 512>}, {pipeline_mode = #tpu.pipeline_mode<synchronous>, transform_indices = @transform_4, window_bounds = array<i64: 1, 512>}, {transform_indices = @transform_5, window_bounds = array<i64: 1, 1, 512>}]} {
    %c0_i32 = arith.constant 0 : i32
    %0 = arith.cmpi eq, %arg1, %c0_i32 : i32
    %1 = arith.extui %0 : i1 to i32
    %c0_i32_0 = arith.constant 0 : i32
    %2 = arith.cmpi ne, %1, %c0_i32_0 : i32
    scf.if %2 {
      %cst_15 = arith.constant 0.000000e+00 : f32
      %20 = vector.broadcast %cst_15 : f32 to vector<8x2048xf32>
      %c0_16 = arith.constant 0 : index
      %c0_17 = arith.constant 0 : index
      %21 = vector.load %arg8[%c0_16, %c0_17] : memref<8x2048xf32, #tpu.memory_space<vmem>>, vector<8x2048xf32>
      tpu.vector_store %arg8[%c0_16, %c0_17], %20 {strides = array<i32>} : memref<8x2048xf32, #tpu.memory_space<vmem>>, vector<8x2048xf32>,
    } else {
    }
    %c0 = arith.constant 0 : index
    %c0_1 = arith.constant 0 : index
    %c0_2 = arith.constant 0 : index
    %3 = vector.load %arg2[%c0, %c0_1, %c0_2] : memref<1x9x256xbf16, #tpu.memory_space<vmem>>, vector<1x9x256xbf16>
    %4 = vector.shape_cast %3 : vector<1x9x256xbf16> to vector<9x256xbf16>
    %c0_3 = arith.constant 0 : index
    %c0_4 = arith.constant 0 : index
    %5 = vector.load %arg3[%c0_3, %c0_4] : memref<9x2048xbf16, #tpu.memory_space<vmem>>, vector<9x2048xbf16>
    %cst = arith.constant dense<0.000000e+00> : vector<256x2048xf32>
    %6 = tpu.matmul %4, %5, %cst {dimension_numbers = #tpu.dot_dimension_numbers<[0], [0], [1], [1], [0, 1, 1, 1], [], []>} : vector<9x256xbf16>, vector<9x2048xbf16>, vector<256x2048xf32> -> vector<256x2048xf32>
    %c0_5 = arith.constant 0 : index
    %c0_6 = arith.constant 0 : index
    %7 = vector.load %arg4[%c0_5, %c0_6] : memref<1x2048xf32, #tpu.memory_space<vmem>>, vector<1x2048xf32>
    %8 = vector.broadcast %7 : vector<1x2048xf32> to vector<256x2048xf32>
    %9 = arith.addf %6, %8 : vector<256x2048xf32>
    %cst_7 = arith.constant 0.000000e+00 : f32
    %10 = vector.broadcast %cst_7 : f32 to vector<256x2048xf32>
    %11 = arith.maximumf %9, %10 : vector<256x2048xf32>
    %c0_8 = arith.constant 0 : index
    %c0_9 = arith.constant 0 : index
    %12 = vector.load %arg8[%c0_8, %c0_9] : memref<8x2048xf32, #tpu.memory_space<vmem>>, vector<8x2048xf32>
    %13 = vector.shape_cast %11 : vector<256x2048xf32> to vector<32x8x2048xf32>
    %cst_10 = arith.constant dense<0.000000e+00> : vector<8x2048xf32>
    %14 = vector.multi_reduction <add>, %13, %cst_10 [0] : vector<32x8x2048xf32> to vector<8x2048xf32>
    %15 = arith.addf %12, %14 : vector<8x2048xf32>
    %c0_11 = arith.constant 0 : index
    %c0_12 = arith.constant 0 : index
    %16 = vector.load %arg8[%c0_11, %c0_12] : memref<8x2048xf32, #tpu.memory_space<vmem>>, vector<8x2048xf32>
    tpu.vector_store %arg8[%c0_11, %c0_12], %15 {strides = array<i32>} : memref<8x2048xf32, #tpu.memory_space<vmem>>, vector<8x2048xf32>,
    %c0_i32_13 = arith.constant 0 : i32
    %17 = arith.cmpi eq, %arg1, %c0_i32_13 : i32
    %18 = arith.extui %17 : i1 to i32
    %c0_i32_14 = arith.constant 0 : i32
    %19 = arith.cmpi ne, %18, %c0_i32_14 : i32
    scf.if %19 {
      %c0_15 = arith.constant 0 : index
      %c0_16 = arith.constant 0 : index
      %20 = vector.load %arg8[%c0_15, %c0_16] : memref<8x2048xf32, #tpu.memory_space<vmem>>, vector<8x2048xf32>
      %cst_17 = arith.constant dense<0.000000e+00> : vector<2048xf32>
      %21 = vector.multi_reduction <add>, %20, %cst_17 [0] : vector<8x2048xf32> to vector<2048xf32>
      %22 = vector.shape_cast %21 : vector<2048xf32> to vector<1x2048xf32>
      %cst_18 = arith.constant 3.906250e-03 : f32
      %23 = vector.broadcast %cst_18 : f32 to vector<1x2048xf32>
      %24 = arith.mulf %22, %23 : vector<1x2048xf32>
      %25 = arith.truncf %24 : vector<1x2048xf32> to vector<1x2048xbf16>
      %c0_19 = arith.constant 0 : index
      %c0_20 = arith.constant 0 : index
      %26 = vector.load %arg5[%c0_19, %c0_20] : memref<2048x512xbf16, #tpu.memory_space<vmem>>, vector<2048x512xbf16>
      %cst_21 = arith.constant dense<0.000000e+00> : vector<1x512xf32>
      %27 = tpu.matmul %25, %26, %cst_21 {dimension_numbers = #tpu.dot_dimension_numbers<[1], [0], [0], [1], [0, 0, 1, 1], [], []>} : vector<1x2048xbf16>, vector<2048x512xbf16>, vector<1x512xf32> -> vector<1x512xf32>
      %c0_22 = arith.constant 0 : index
      %c0_23 = arith.constant 0 : index
      %28 = vector.load %arg6[%c0_22, %c0_23] : memref<1x512xf32, #tpu.memory_space<vmem>>, vector<1x512xf32>
      %29 = arith.addf %27, %28 : vector<1x512xf32>
      %cst_24 = arith.constant 0.000000e+00 : f32
      %30 = vector.broadcast %cst_24 : f32 to vector<1x512xf32>
      %31 = arith.maximumf %29, %30 : vector<1x512xf32>
      %32 = vector.shape_cast %31 : vector<1x512xf32> to vector<1x1x512xf32>
      %c0_25 = arith.constant 0 : index
      %c0_26 = arith.constant 0 : index
      %c0_27 = arith.constant 0 : index
      %33 = vector.load %arg7[%c0_25, %c0_26, %c0_27] : memref<1x1x512xf32, #tpu.memory_space<vmem>>, vector<1x1x512xf32>
      tpu.vector_store %arg7[%c0_25, %c0_26, %c0_27], %32 {strides = array<i32>} : memref<1x1x512xf32, #tpu.memory_space<vmem>>, vector<1x1x512xf32>,
    } else {
    }
    return
  }
  func.func @transform_0(%arg0: i32, %arg1: i32) -> (i32, i32, i32) {
    %c0_i32 = arith.constant 0 : i32
    %c0_i32_0 = arith.constant 0 : i32
    return %arg0, %c0_i32, %arg1 : i32, i32, i32
  }
  func.func @transform_1(%arg0: i32, %arg1: i32) -> (i32, i32) {
    %c0_i32 = arith.constant 0 : i32
    %c0_i32_0 = arith.constant 0 : i32
    %c0_i32_1 = arith.constant 0 : i32
    return %c0_i32, %c0_i32_0 : i32, i32
  }
  func.func @transform_2(%arg0: i32, %arg1: i32) -> (i32, i32) {
    %c0_i32 = arith.constant 0 : i32
    %c0_i32_0 = arith.constant 0 : i32
    %c0_i32_1 = arith.constant 0 : i32
    return %c0_i32, %c0_i32_0 : i32, i32
  }
  func.func @transform_3(%arg0: i32, %arg1: i32) -> (i32, i32) {
    %c0_i32 = arith.constant 0 : i32
    %c0_i32_0 = arith.constant 0 : i32
    %c0_i32_1 = arith.constant 0 : i32
    return %c0_i32, %c0_i32_0 : i32, i32
  }
  func.func @transform_4(%arg0: i32, %arg1: i32) -> (i32, i32) {
    %c0_i32 = arith.constant 0 : i32
    %c0_i32_0 = arith.constant 0 : i32
    %c0_i32_1 = arith.constant 0 : i32
    return %c0_i32, %c0_i32_0 : i32, i32
  }
  func.func @transform_5(%arg0: i32, %arg1: i32) -> (i32, i32, i32) {
    %c0_i32 = arith.constant 0 : i32
    %c0_i32_0 = arith.constant 0 : i32
    %c0_i32_1 = arith.constant 0 : i32
    return %arg0, %c0_i32, %c0_i32_0 : i32, i32, i32
  }
}

</mosaic_0001>

<bundles_post_ra>
// kernel: image_encoder_forward.1
= control target key start
LH: loop header
LB: loop body
LE: loop exit
PB: predicated region body
PF: predicated region fallthrough
CT: control target
= control target key end

     0   :  { %s8710_s18 = smov 0   ;;  %s8712_s19 = smov 0   ;;  %s12083_s0 = inlined_call_operand.vmem [shape: bf16[2,9,256], index: 0, kind: input, shape index: {}]   ;;  %s12084_s1 = inlined_call_operand.vmem [shape: bf16[9,2048], index: 1, kind: input, shape index: {}]   ;;  %s12085_s2 = inlined_call_operand.vmem [shape: f32[1,2048], index: 2, kind: input, shape index: {}]   ;;  %s12086_s3 = inlined_call_operand.vmem [shape: bf16[2048,512], index: 3, kind: input, shape index: {}]   ;;  %s12087_s4 = inlined_call_operand.vmem [shape: f32[1,512], index: 4, kind: input, shape index: {}]   ;;  %s12088_s5 = inlined_call_operand.vmem [shape: f32[2,1,512], index: 5, kind: output, shape index: {}]  }
   0x1   :  { %s8714_s20 = smov 0  }
   0x2 LB: > { %s27_s21 = sadd.s32 1, %s8671_s19  ;;  %p7187_p0 = scmp.ge.s32.totalorder %s8675_s20, 1  ;;  %s8675_s20 = sphi %s8714_s20, %s15_s20   ;;  %s8671_s19 = sphi %s8712_s19, %s12130_s19   ;;  %s8667_s18 = sphi %s8710_s18, %s12129_s18  }
   0x3   : > { %p29_p1 = scmp.ge.s32.totalorder %s27_s21, 2  ;;  %p206_p2 = scmp.lt.s32.totalorder %s8675_s20, 3 }
   0x5   : > { %s12132_s21 = smov (%p29_p1, %s27_s21), 0  ;;  %p207_p3 = pnand %p7187_p0, %p206_p2 }
   0x7   : > { %210 = sbr.rel (%p207_p3) target bundleno = 1311 (0x51f), region = 40 }
   0xc   : > { %p238_p4 = scmp.lt.s32.totalorder %s8667_s18, 1  ;;  %v274_v0 = vld [vmem:[%s12084_s1] sm:$0xff]  ;;  %vm529_vm0 = vcmask 1043456   ;;  %vm530_vm1 = vcmask 1044480   ;;  %v275_v4 = vld [vmem:[%s12084_s1 + $0x8] sm:$0xff]  ;;  %v276_v6 = vld [vmem:[%s12084_s1 + $0x10] sm:$0xff] }
   0xd   : > { %v282_v1 = vld [vmem:[%s12084_s1 + $0x40] sm:$0x11]  ;;  %v283_v5 = vld [vmem:[%s12084_s1 + $0x48] sm:$0x11]  ;;  %v8677_v7 = vmov 65535   ;;  %v8678_v11 = vmov 0  }
   0xe   : > { %v7194_v2 = vcombine.high %v274_v0, %v282_v1  ;;  %v7193_v3 = vcombine.low %v274_v0, %v282_v1  ;;  %s12134_s18 = smov (!%p238_p4, %s8667_s18), 1  ;;  %v531_v8 = vsel %vm529_vm0, 4294967295, %v8677_v7  ;;  %v7196_v9 = vcombine.high %v275_v4, %v283_v5  ;;  %613 = vmatprep.mubr.bf16.mxu0 %v8678_v11  ;;  %806 = vmatprep.mubr.bf16.mxu1 %v8678_v11  ;;  %v284_v12 = vld [vmem:[%s12084_s1 + $0x50] sm:$0x11]  ;;  %v277_v13 = vld [vmem:[%s12084_s1 + $0x18] sm:$0xff]  ;;  %v8772_v28 = vld [vmem:[%s12084_s1 + $0x20] sm:$0xff] }
   0xf   : > { %v7195_v10 = vcombine.low %v275_v4, %v283_v5  ;;  %v8754_v14 = vsel %vm530_vm1, %v531_v8, 0  ;;  %v7197_v15 = vcombine.low %v276_v6, %v284_v12  ;;  %v7198_v16 = vcombine.high %v276_v6, %v284_v12  ;;  %v285_v17 = vld [vmem:[%s12084_s1 + $0x58] sm:$0x11]  ;;  %s7851_s13 = sshll.u32 %s12134_s18, 4  ;;  %v8777_v29 = vld [vmem:[%s12084_s1 + $0x60] sm:$0x11] }
  0x10   : > { %v537_v18 = vand.u32 %v7194_v2, %v8754_v14  ;;  %v534_v19 = vand.u32 %v7193_v3, %v8754_v14  ;;  %v543_v20 = vand.u32 %v7196_v9, %v8754_v14  ;;  %s245_s16 = scalar_lea.vmem %s12083_s0, %s7851_s13  ;;  %v7199_v23 = vcombine.low %v277_v13, %v285_v17  ;;  %v8795_v36 = vld [vmem:[%s12084_s1 + $0x28] sm:$0xff]  ;;  %v8946_v58 = vld [vmem:[%s12084_s1 + $0x30] sm:$0xff]  ;;  %v8960_v62 = vld [vmem:[%s12084_s1 + $0x38] sm:$0xff]  ;;  %s7190_s23 = sshll.u32 %s12134_s18, 2 }
  0x11   : > { %v540_v21 = vand.u32 %v7195_v10, %v8754_v14  ;;  %v549_v22 = vand.u32 %v7198_v16, %v8754_v14  ;;  %v7200_v24 = vcombine.high %v277_v13, %v285_v17  ;;  %v7879_v25 = vld [vmem:[%s245_s16] ss:$8 sps:$4 sm:$0x1f]   ;;  %v7881_v27 = vld [vmem:[%s245_s16 + $0x4] ss:$8 sps:$4 sm:$0x1f]   ;;  %v7201_v30 = vcombine.low %v8772_v28, %v8777_v29  ;;  %s250_s26 = scalar_lea.vmem %s12088_s5, %s7190_s23 }
  0x12   : > { %595 = vmatprep.subr.bf16.mxu0 %v537_v18  ;;  %788 = vmatprep.subr.bf16.mxu1 %v543_v20  ;;  %v7202_v31 = vcombine.high %v8772_v28, %v8777_v29  ;;  %vm480_vm2 = vcmask 72704   ;;  %v546_v32 = vand.u32 %v7197_v15, %v8754_v14  ;;  %v552_v33 = vand.u32 %v7199_v23, %v8754_v14  ;;  %v8800_v37 = vld [vmem:[%s12084_s1 + $0x68] sm:$0x11]  ;;  %v8951_v59 = vld [vmem:[%s12084_s1 + $0x70] sm:$0x11]  ;;  %v290_v8 = vld [vmem:[%s12085_s2] sm:$0xff] }
  0x13   : > { %596 = vmatpush1.bf16.msra.mxu0 %v534_v19  ;;  %789 = vmatpush1.bf16.msra.mxu1 %v540_v21  ;;  %v555_v26 = vand.u32 %v7200_v24, %v8754_v14  ;;  %v7203_v38 = vcombine.low %v8795_v36, %v8800_v37  ;;  %v7204_v39 = vcombine.high %v8795_v36, %v8800_v37  ;;  %v8965_v63 = vld [vmem:[%s12084_s1 + $0x78] sm:$0x11]  ;;  %v12089_v4 = vlaneseq }
  0x14   : > { %384 = vxpose.xlu0.c.b16.start.end [1/1] (short) %v7879_v25, 128  ;;  %981 = vmatprep.subr.bf16.mxu0 %v549_v22  ;;  %v561_v35 = vand.u32 %v7202_v31, %v8754_v14  ;;  %v558_v56 = vand.u32 %v7201_v30, %v8754_v14  ;;  %v7205_v60 = vcombine.low %v8946_v58, %v8951_v59 }
  0x15   : > { %1174 = vmatprep.subr.bf16.mxu1 %v555_v26  ;;  %v567_v40 = vand.u32 %v7204_v39, %v8754_v14  ;;  %v564_v57 = vand.u32 %v7203_v38, %v8754_v14  ;;  %v7206_v61 = vcombine.high %v8946_v58, %v8951_v59  ;;  %v7207_v0 = vcombine.low %v8960_v62, %v8965_v63 }
  0x16   : > { %v7208_v1 = vcombine.high %v8960_v62, %v8965_v63  ;;  %v9010_v5 = vshrl.u32 %v12089_v4, 7 }
  0x17   : > { %v573_v2 = vand.u32 %v7206_v61, %v8754_v14 }
  0x18   : > { %v579_v3 = vand.u32 %v7208_v1, %v8754_v14  ;;  %12104 = vst [vmem:[#allocation3_spill] sm:$0xff] %v9010_v5  ;;  %v9019_v6 = vsub.s32 0, %v9010_v5  ;;  %v9022_v7 = vsub.s32 2, %v9010_v5  ;;  %v9028_v9 = vsub.s32 1, %v9010_v5 }
  0x19   : > { %v9031_v10 = vsub.s32 3, %v9010_v5 }
  0x1a   : > { %12105 = vst [vmem:[#allocation4_spill] sm:$0xff] %v9022_v7  ;;  %v9034_v12 = vrot.slane %v290_v8, %v9019_v6  ;;  %v9037_v13 = vrot.slane %v290_v8, %v9022_v7  ;;  %v9044_v17 = vrot.slane %v290_v8, %v9028_v9 }
  0x1b   : > { %12106 = vst [vmem:[#allocation5_spill] sm:$0xff] %v9031_v10  ;;  %v9047_v18 = vrot.slane %v290_v8, %v9031_v10 }
  0x31   : > { %400 = vxpose.xlu0.c.b16.start.end [1/1] (short) %v7881_v27, 128 }
  0x76   : > { %v8785_v34 = vpop.trf.xlu0 }
  0x77   : > { %7209 = vmatmul.mubr.msk.bf16.vlgmr.msra.gmra.mxu0 %vm480_vm2, %v8785_v34  ;;  %7225 = vmatmul.mubr.msk.bf16.vlgmr.msra.gmra.mxu1 %vm480_vm2, %v8785_v34 }
  0x78   : > { %982 = vmatpush1.bf16.msra.mxu0 %v546_v32  ;;  %1175 = vmatpush1.bf16.msra.mxu1 %v552_v33 }
  0x79   : > { %623 = vmatprep.mubr.bf16.mxu0 %v8678_v11  ;;  %816 = vmatprep.mubr.bf16.mxu1 %v8678_v11 }
  0x7a   : > { %1367 = vmatprep.subr.bf16.mxu0 %v561_v35  ;;  %v8809_v41 = vpop.trf.xlu0  ;;  %1560 = vmatprep.subr.bf16.mxu1 %v567_v40 }
  0x7e   : > { %v8817_v42 = vpop.trf.xlu0 }
  0x7f   : > { %7210 = vmatmul.mubr.msk.bf16.gmra.mxu0 %vm480_vm2, %v8809_v41  ;;  %7226 = vmatmul.mubr.msk.bf16.gmra.mxu1 %vm480_vm2, %v8809_v41 }
  0x80   : > { %633 = vmatprep.mubr.bf16.mxu0 %v8678_v11  ;;  %826 = vmatprep.mubr.bf16.mxu1 %v8678_v11 }
  0x82   : > { %v8825_v43 = vpop.trf.xlu0 }
  0x86   : > { %v8833_v44 = vpop.trf.xlu0 }
  0x87   : > { %7211 = vmatmul.mubr.msk.bf16.gmra.mxu0 %vm480_vm2, %v8817_v42  ;;  %7227 = vmatmul.mubr.msk.bf16.gmra.mxu1 %vm480_vm2, %v8817_v42 }
  0x88   : > { %643 = vmatprep.mubr.bf16.mxu0 %v8678_v11  ;;  %836 = vmatprep.mubr.bf16.mxu1 %v8678_v11 }
  0x8a   : > { %v8841_v45 = vpop.trf.xlu0 }
  0x8e   : > { %v8849_v46 = vpop.trf.xlu0 }
  0x8f   : > { %7212 = vmatmul.mubr.msk.bf16.gmra.mxu0 %vm480_vm2, %v8825_v43  ;;  %7228 = vmatmul.mubr.msk.bf16.gmra.mxu1 %vm480_vm2, %v8825_v43 }
  0x90   : > { %653 = vmatprep.mubr.bf16.mxu0 %v8678_v11  ;;  %846 = vmatprep.mubr.bf16.mxu1 %v8678_v11 }
  0x92   : > { %v8857_v47 = vpop.trf.xlu0 }
  0x96   : > { %v8865_v48 = vpop.trf.xlu0 }
  0x97   : > { %7213 = vmatmul.mubr.msk.bf16.gmra.mxu0 %vm480_vm2, %v8833_v44  ;;  %7229 = vmatmul.mubr.msk.bf16.gmra.mxu1 %vm480_vm2, %v8833_v44 }
  0x98   : > { %663 = vmatprep.mubr.bf16.mxu0 %v8678_v11  ;;  %856 = vmatprep.mubr.bf16.mxu1 %v8678_v11 }
  0x9a   : > { %v8873_v49 = vpop.trf.xlu0 }
  0x9e   : > { %v8881_v50 = vpop.trf.xlu0 }
  0x9f   : > { %7214 = vmatmul.mubr.msk.bf16.gmra.mxu0 %vm480_vm2, %v8841_v45  ;;  %7230 = vmatmul.mubr.msk.bf16.gmra.mxu1 %vm480_vm2, %v8841_v45 }
  0xa0   : > { %673 = vmatprep.mubr.bf16.mxu0 %v8678_v11  ;;  %866 = vmatprep.mubr.bf16.mxu1 %v8678_v11 }
  0xa2   : > { %v8889_v51 = vpop.trf.xlu0 }
  0xa6   : > { %v8897_v52 = vpop.trf.xlu0 }
  0xa7   : > { %7215 = vmatmul.mubr.msk.bf16.gmra.mxu0 %vm480_vm2, %v8849_v46  ;;  %7231 = vmatmul.mubr.msk.bf16.gmra.mxu1 %vm480_vm2, %v8849_v46 }
  0xa8   : > { %683 = vmatprep.mubr.bf16.mxu0 %v8678_v11  ;;  %876 = vmatprep.mubr.bf16.mxu1 %v8678_v11 }
  0xaa   : > { %v8905_v53 = vpop.trf.xlu0 }
  0xae   : > { %v8913_v54 = vpop.trf.xlu0 }
  0xaf   : > { %7216 = vmatmul.mubr.msk.bf16.gmra.mxu0 %vm480_vm2, %v8857_v47  ;;  %7232 = vmatmul.mubr.msk.bf16.gmra.mxu1 %vm480_vm2, %v8857_v47 }
  0xb0   : > { %693 = vmatprep.mubr.bf16.mxu0 %v8678_v11  ;;  %886 = vmatprep.mubr.bf16.mxu1 %v8678_v11 }
  0xb2   : > { %v8921_v55 = vpop.trf.xlu0 }
  0xb7   : > { %7217 = vmatmul.mubr.msk.bf16.gmra.mxu0 %vm480_vm2, %v8865_v48  ;;  %7233 = vmatmul.mubr.msk.bf16.gmra.mxu1 %vm480_vm2, %v8865_v48 }
  0xb8   : > { %703 = vmatprep.mubr.bf16.mxu0 %v8678_v11  ;;  %896 = vmatprep.mubr.bf16.mxu1 %v8678_v11 }
  0xbf   : > { %7218 = vmatmul.mubr.msk.bf16.gmra.mxu0 %vm480_vm2, %v8873_v49  ;;  %7234 = vmatmul.mubr.msk.bf16.gmra.mxu1 %vm480_vm2, %v8873_v49 }
  0xc0   : > { %713 = vmatprep.mubr.bf16.mxu0 %v8678_v11  ;;  %906 = vmatprep.mubr.bf16.mxu1 %v8678_v11 }
  0xc7   : > { %7219 = vmatmul.mubr.msk.bf16.gmra.mxu0 %vm480_vm2, %v8881_v50  ;;  %7235 = vmatmul.mubr.msk.bf16.gmra.mxu1 %vm480_vm2, %v8881_v50 }
  0xc8   : > { %723 = vmatprep.mubr.bf16.mxu0 %v8678_v11  ;;  %916 = vmatprep.mubr.bf16.mxu1 %v8678_v11 }
  0xcf   : > { %7220 = vmatmul.mubr.msk.bf16.gmra.mxu0 %vm480_vm2, %v8889_v51  ;;  %7236 = vmatmul.mubr.msk.bf16.gmra.mxu1 %vm480_vm2, %v8889_v51 }
  0xd0   : > { %733 = vmatprep.mubr.bf16.mxu0 %v8678_v11  ;;  %926 = vmatprep.mubr.bf16.mxu1 %v8678_v11 }
  0xd7   : > { %7221 = vmatmul.mubr.msk.bf16.gmra.mxu0 %vm480_vm2, %v8897_v52  ;;  %7237 = vmatmul.mubr.msk.bf16.gmra.mxu1 %vm480_vm2, %v8897_v52 }
  0xd8   : > { %743 = vmatprep.mubr.bf16.mxu0 %v8678_v11  ;;  %936 = vmatprep.mubr.bf16.mxu1 %v8678_v11 }
  0xdf   : > { %7222 = vmatmul.mubr.msk.bf16.gmra.mxu0 %vm480_vm2, %v8905_v53  ;;  %7238 = vmatmul.mubr.msk.bf16.gmra.mxu1 %vm480_vm2, %v8905_v53 }
  0xe0   : > { %753 = vmatprep.mubr.bf16.mxu0 %v8678_v11  ;;  %946 = vmatprep.mubr.bf16.mxu1 %v8678_v11 }
  0xe7   : > { %7223 = vmatmul.mubr.msk.bf16.gmra.mxu0 %vm480_vm2, %v8913_v54  ;;  %7239 = vmatmul.mubr.msk.bf16.gmra.mxu1 %vm480_vm2, %v8913_v54 }
  0xe8   : > { %763 = vmatprep.mubr.bf16.mxu0 %v8678_v11  ;;  %956 = vmatprep.mubr.bf16.mxu1 %v8678_v11 }
  0xef   : > { %7224 = vmatmul.mubr.msk.bf16.gmra.mxu0 %vm480_vm2, %v8921_v55  ;;  %7240 = vmatmul.mubr.msk.bf16.gmra.mxu1 %vm480_vm2, %v8921_v55 }
  0xf0   : > { %999 = vmatprep.mubr.bf16.mxu0 %v8678_v11  ;;  %1192 = vmatprep.mubr.bf16.mxu1 %v8678_v11 }
  0xf7   : > { %7241 = vmatmul.mubr.msk.bf16.vlgmr.msra.gmra.mxu0 %vm480_vm2, %v8785_v34  ;;  %7257 = vmatmul.mubr.msk.bf16.vlgmr.msra.gmra.mxu1 %vm480_vm2, %v8785_v34 }
  0xf8   : > { %1368 = vmatpush1.bf16.msra.mxu0 %v558_v56  ;;  %1561 = vmatpush1.bf16.msra.mxu1 %v564_v57 }
  0xf9   : > { %1009 = vmatprep.mubr.bf16.mxu0 %v8678_v11  ;;  %1202 = vmatprep.mubr.bf16.mxu1 %v8678_v11 }
  0xfa   : > { %1753 = vmatprep.subr.bf16.mxu0 %v573_v2  ;;  %1946 = vmatprep.subr.bf16.mxu1 %v579_v3 }
  0xff   : > { %7242 = vmatmul.mubr.msk.bf16.gmra.mxu0 %vm480_vm2, %v8809_v41  ;;  %7258 = vmatmul.mubr.msk.bf16.gmra.mxu1 %vm480_vm2, %v8809_v41 }
 0x100   : > { %1019 = vmatprep.mubr.bf16.mxu0 %v8678_v11  ;;  %1212 = vmatprep.mubr.bf16.mxu1 %v8678_v11 }
 0x107   : > { %7243 = vmatmul.mubr.msk.bf16.gmra.mxu0 %vm480_vm2, %v8817_v42  ;;  %7259 = vmatmul.mubr.msk.bf16.gmra.mxu1 %vm480_vm2, %v8817_v42 }
 0x108   : > { %1029 = vmatprep.mubr.bf16.mxu0 %v8678_v11  ;;  %1222 = vmatprep.mubr.bf16.mxu1 %v8678_v11 }
 0x10f   : > { %7244 = vmatmul.mubr.msk.bf16.gmra.mxu0 %vm480_vm2, %v8825_v43  ;;  %7260 = vmatmul.mubr.msk.bf16.gmra.mxu1 %vm480_vm2, %v8825_v43 }
 0x110   : > { %1039 = vmatprep.mubr.bf16.mxu0 %v8678_v11  ;;  %1232 = vmatprep.mubr.bf16.mxu1 %v8678_v11 }
 0x117   : > { %7245 = vmatmul.mubr.msk.bf16.gmra.mxu0 %vm480_vm2, %v8833_v44  ;;  %7261 = vmatmul.mubr.msk.bf16.gmra.mxu1 %vm480_vm2, %v8833_v44 }
 0x118   : > { %1049 = vmatprep.mubr.bf16.mxu0 %v8678_v11  ;;  %1242 = vmatprep.mubr.bf16.mxu1 %v8678_v11 }
 0x11f   : > { %7246 = vmatmul.mubr.msk.bf16.gmra.mxu0 %vm480_vm2, %v8841_v45  ;;  %7262 = vmatmul.mubr.msk.bf16.gmra.mxu1 %vm480_vm2, %v8841_v45 }
 0x120   : > { %1059 = vmatprep.mubr.bf16.mxu0 %v8678_v11  ;;  %1252 = vmatprep.mubr.bf16.mxu1 %v8678_v11 }
 0x127   : > { %7247 = vmatmul.mubr.msk.bf16.gmra.mxu0 %vm480_vm2, %v8849_v46  ;;  %7263 = vmatmul.mubr.msk.bf16.gmra.mxu1 %vm480_vm2, %v8849_v46 }
 0x128   : > { %1069 = vmatprep.mubr.bf16.mxu0 %v8678_v11  ;;  %1262 = vmatprep.mubr.bf16.mxu1 %v8678_v11 }
 0x12f   : > { %7248 = vmatmul.mubr.msk.bf16.gmra.mxu0 %vm480_vm2, %v8857_v47  ;;  %7264 = vmatmul.mubr.msk.bf16.gmra.mxu1 %vm480_vm2, %v8857_v47 }
 0x130   : > { %1079 = vmatprep.mubr.bf16.mxu0 %v8678_v11  ;;  %1272 = vmatprep.mubr.bf16.mxu1 %v8678_v11 }
 0x137   : > { %v615_v15 = vpop.f32.mrf.mxu0  ;;  %v808_v16 = vpop.f32.mrf.mxu1  ;;  %7249 = vmatmul.mubr.msk.bf16.gmra.mxu0 %vm480_vm2, %v8865_v48  ;;  %7265 = vmatmul.mubr.msk.bf16.gmra.mxu1 %vm480_vm2, %v8865_v48 }
 0x138   : > { %1089 = vmatprep.mubr.bf16.mxu0 %v8678_v11  ;;  %1282 = vmatprep.mubr.bf16.mxu1 %v8678_v11  ;;  %v616_v19 = vadd.f32 %v615_v15, %v9034_v12  ;;  %v809_v20 = vadd.f32 %v808_v16, %v9037_v13 }
 0x139   : > { %v617_v21 = vpop.f32.mrf.mxu0  ;;  %v810_v22 = vpop.f32.mrf.mxu1 }
 0x13a   : > { %v618_v23 = vadd.f32 %v617_v21, %v9044_v17  ;;  %v811_v24 = vadd.f32 %v810_v22, %v9047_v18  ;;  %v2125_v29 = vmax.f32 %v616_v19, 0.0  ;;  %v2127_v30 = vmax.f32 %v809_v20, 0.0 }
 0x13b   : > { %v619_v25 = vpop.f32.mrf.mxu0  ;;  %v812_v26 = vpop.f32.mrf.mxu1 }
 0x13c   : > { %v620_v27 = vadd.f32 %v619_v25, %v9034_v12  ;;  %v813_v28 = vadd.f32 %v812_v26, %v9037_v13  ;;  %v2126_v38 = vmax.f32 %v618_v23, 0.0  ;;  %v2128_v39 = vmax.f32 %v811_v24, 0.0 }
 0x13d   : > { %v621_v31 = vpop.f32.mrf.mxu0  ;;  %v814_v32 = vpop.f32.mrf.mxu1 }
 0x13e   : > { %v2141_v33 = vmax.f32 %v620_v27, 0.0  ;;  %v2143_v35 = vmax.f32 %v813_v28, 0.0  ;;  %v622_v36 = vadd.f32 %v621_v31, %v9044_v17  ;;  %v815_v37 = vadd.f32 %v814_v32, %v9047_v18 }
 0x13f   : > { %v625_v40 = vpop.f32.mrf.mxu0  ;;  %v818_v56 = vpop.f32.mrf.mxu1  ;;  %7250 = vmatmul.mubr.msk.bf16.gmra.mxu0 %vm480_vm2, %v8873_v49  ;;  %7266 = vmatmul.mubr.msk.bf16.gmra.mxu1 %vm480_vm2, %v8873_v49 }
 0x140   : > { %v2653_v57 = vadd.f32 %v2141_v33, %v2125_v29  ;;  %v2715_v61 = vadd.f32 %v2143_v35, %v2127_v30  ;;  %v2142_v1 = vmax.f32 %v622_v36, 0.0  ;;  %v2144_v2 = vmax.f32 %v815_v37, 0.0  ;;  %1099 = vmatprep.mubr.bf16.mxu0 %v8678_v11  ;;  %1292 = vmatprep.mubr.bf16.mxu1 %v8678_v11 }
 0x141   : > { %v626_v3 = vadd.f32 %v625_v40, %v9034_v12  ;;  %v819_v8 = vadd.f32 %v818_v56, %v9037_v13  ;;  %v627_v15 = vpop.f32.mrf.mxu0  ;;  %v820_v16 = vpop.f32.mrf.mxu1 }
 0x142   : > { %v2684_v19 = vadd.f32 %v2142_v1, %v2126_v38  ;;  %v2746_v20 = vadd.f32 %v2144_v2, %v2128_v39  ;;  %v628_v21 = vadd.f32 %v627_v15, %v9044_v17  ;;  %v821_v22 = vadd.f32 %v820_v16, %v9047_v18 }
 0x143   : > { %v2157_v23 = vmax.f32 %v626_v3, 0.0  ;;  %v2159_v24 = vmax.f32 %v819_v8, 0.0  ;;  %v629_v25 = vpop.f32.mrf.mxu0  ;;  %v822_v26 = vpop.f32.mrf.mxu1 }
 0x144   : > { %v2158_v27 = vmax.f32 %v628_v21, 0.0  ;;  %v2160_v28 = vmax.f32 %v821_v22, 0.0  ;;  %v630_v29 = vadd.f32 %v629_v25, %v9034_v12  ;;  %v823_v30 = vadd.f32 %v822_v26, %v9037_v13 }
 0x145   : > { %v2654_v31 = vadd.f32 %v2653_v57, %v2157_v23  ;;  %v2716_v32 = vadd.f32 %v2715_v61, %v2159_v24  ;;  %v631_v33 = vpop.f32.mrf.mxu0  ;;  %v824_v35 = vpop.f32.mrf.mxu1 }
 0x146   : > { %v2685_v36 = vadd.f32 %v2684_v19, %v2158_v27  ;;  %v2747_v37 = vadd.f32 %v2746_v20, %v2160_v28  ;;  %v2173_v38 = vmax.f32 %v630_v29, 0.0  ;;  %v2175_v39 = vmax.f32 %v823_v30, 0.0 }
 0x147   : > { %v632_v40 = vadd.f32 %v631_v33, %v9044_v17  ;;  %v825_v56 = vadd.f32 %v824_v35, %v9047_v18  ;;  %v635_v1 = vpop.f32.mrf.mxu0  ;;  %v828_v2 = vpop.f32.mrf.mxu1  ;;  %7251 = vmatmul.mubr.msk.bf16.gmra.mxu0 %vm480_vm2, %v8881_v50  ;;  %7267 = vmatmul.mubr.msk.bf16.gmra.mxu1 %vm480_vm2, %v8881_v50 }
 0x148   : > { %v2655_v57 = vadd.f32 %v2654_v31, %v2173_v38  ;;  %v2717_v61 = vadd.f32 %v2716_v32, %v2175_v39  ;;  %v636_v3 = vadd.f32 %v635_v1, %v9034_v12  ;;  %v829_v8 = vadd.f32 %v828_v2, %v9037_v13  ;;  %1109 = vmatprep.mubr.bf16.mxu0 %v8678_v11 }
 0x149   : > { %v2174_v15 = vmax.f32 %v632_v40, 0.0  ;;  %v2176_v16 = vmax.f32 %v825_v56, 0.0  ;;  %v637_v19 = vpop.f32.mrf.mxu0  ;;  %v830_v20 = vpop.f32.mrf.mxu1  ;;  %1302 = vmatprep.mubr.bf16.mxu1 %v8678_v11 }
 0x14a   : > { %v2189_v21 = vmax.f32 %v636_v3, 0.0  ;;  %v2191_v22 = vmax.f32 %v829_v8, 0.0  ;;  %v638_v23 = vadd.f32 %v637_v19, %v9044_v17  ;;  %v831_v24 = vadd.f32 %v830_v20, %v9047_v18 }
 0x14b   : > { %v2686_v25 = vadd.f32 %v2685_v36, %v2174_v15  ;;  %v2748_v26 = vadd.f32 %v2747_v37, %v2176_v16  ;;  %v639_v27 = vpop.f32.mrf.mxu0  ;;  %v832_v28 = vpop.f32.mrf.mxu1 }
 0x14c   : > { %v2656_v29 = vadd.f32 %v2655_v57, %v2189_v21  ;;  %v2718_v30 = vadd.f32 %v2717_v61, %v2191_v22  ;;  %v2190_v31 = vmax.f32 %v638_v23, 0.0  ;;  %v2192_v32 = vmax.f32 %v831_v24, 0.0 }
 0x14d   : > { %v640_v33 = vadd.f32 %v639_v27, %v9034_v12  ;;  %v833_v35 = vadd.f32 %v832_v28, %v9037_v13  ;;  %v641_v38 = vpop.f32.mrf.mxu0  ;;  %v834_v39 = vpop.f32.mrf.mxu1 }
 0x14e   : > { %v2687_v40 = vadd.f32 %v2686_v25, %v2190_v31  ;;  %v2749_v56 = vadd.f32 %v2748_v26, %v2192_v32  ;;  %v642_v1 = vadd.f32 %v641_v38, %v9044_v17  ;;  %v835_v2 = vadd.f32 %v834_v39, %v9047_v18 }
 0x14f   : > { %v2205_v36 = vmax.f32 %v640_v33, 0.0  ;;  %v2207_v37 = vmax.f32 %v833_v35, 0.0  ;;  %v645_v3 = vpop.f32.mrf.mxu0  ;;  %v838_v8 = vpop.f32.mrf.mxu1  ;;  %7252 = vmatmul.mubr.msk.bf16.gmra.mxu0 %vm480_vm2, %v8889_v51  ;;  %7268 = vmatmul.mubr.msk.bf16.gmra.mxu1 %vm480_vm2, %v8889_v51 }
 0x150   : > { %v2206_v57 = vmax.f32 %v642_v1, 0.0  ;;  %v2208_v61 = vmax.f32 %v835_v2, 0.0  ;;  %v646_v15 = vadd.f32 %v645_v3, %v9034_v12  ;;  %v839_v16 = vadd.f32 %v838_v8, %v9037_v13  ;;  %1119 = vmatprep.mubr.bf16.mxu0 %v8678_v11  ;;  %1312 = vmatprep.mubr.bf16.mxu1 %v8678_v11 }
 0x151   : > { %v2657_v19 = vadd.f32 %v2656_v29, %v2205_v36  ;;  %v2719_v20 = vadd.f32 %v2718_v30, %v2207_v37  ;;  %v647_v21 = vpop.f32.mrf.mxu0  ;;  %v840_v22 = vpop.f32.mrf.mxu1 }
 0x152   : > { %v2688_v23 = vadd.f32 %v2687_v40, %v2206_v57  ;;  %v2750_v24 = vadd.f32 %v2749_v56, %v2208_v61  ;;  %v2221_v25 = vmax.f32 %v646_v15, 0.0  ;;  %v2223_v26 = vmax.f32 %v839_v16, 0.0 }
 0x153   : > { %v648_v27 = vadd.f32 %v647_v21, %v9044_v17  ;;  %v841_v28 = vadd.f32 %v840_v22, %v9047_v18  ;;  %v649_v31 = vpop.f32.mrf.mxu0  ;;  %v842_v32 = vpop.f32.mrf.mxu1 }
 0x154   : > { %v2658_v33 = vadd.f32 %v2657_v19, %v2221_v25  ;;  %v2720_v35 = vadd.f32 %v2719_v20, %v2223_v26  ;;  %v650_v38 = vadd.f32 %v649_v31, %v9034_v12  ;;  %v843_v39 = vadd.f32 %v842_v32, %v9037_v13 }
 0x155   : > { %v2222_v29 = vmax.f32 %v648_v27, 0.0  ;;  %v2224_v30 = vmax.f32 %v841_v28, 0.0  ;;  %v651_v1 = vpop.f32.mrf.mxu0  ;;  %v844_v2 = vpop.f32.mrf.mxu1 }
 0x156   : > { %v2237_v40 = vmax.f32 %v650_v38, 0.0  ;;  %v2239_v56 = vmax.f32 %v843_v39, 0.0  ;;  %v652_v36 = vadd.f32 %v651_v1, %v9044_v17  ;;  %v845_v37 = vadd.f32 %v844_v2, %v9047_v18 }
 0x157   : > { %v2689_v3 = vadd.f32 %v2688_v23, %v2222_v29  ;;  %v2751_v8 = vadd.f32 %v2750_v24, %v2224_v30  ;;  %v655_v57 = vpop.f32.mrf.mxu0  ;;  %v848_v61 = vpop.f32.mrf.mxu1  ;;  %7253 = vmatmul.mubr.msk.bf16.gmra.mxu0 %vm480_vm2, %v8897_v52  ;;  %7269 = vmatmul.mubr.msk.bf16.gmra.mxu1 %vm480_vm2, %v8897_v52 }
 0x158   : > { %v2659_v15 = vadd.f32 %v2658_v33, %v2237_v40  ;;  %v2721_v16 = vadd.f32 %v2720_v35, %v2239_v56  ;;  %v2238_v19 = vmax.f32 %v652_v36, 0.0  ;;  %v2240_v20 = vmax.f32 %v845_v37, 0.0  ;;  %1129 = vmatprep.mubr.bf16.mxu0 %v8678_v11  ;;  %1322 = vmatprep.mubr.bf16.mxu1 %v8678_v11 }
 0x159   : > { %v656_v21 = vadd.f32 %v655_v57, %v9034_v12  ;;  %v849_v22 = vadd.f32 %v848_v61, %v9037_v13  ;;  %v657_v23 = vpop.f32.mrf.mxu0  ;;  %v850_v24 = vpop.f32.mrf.mxu1 }
 0x15a   : > { %v2690_v25 = vadd.f32 %v2689_v3, %v2238_v19  ;;  %v2752_v26 = vadd.f32 %v2751_v8, %v2240_v20  ;;  %v658_v27 = vadd.f32 %v657_v23, %v9044_v17  ;;  %v851_v28 = vadd.f32 %v850_v24, %v9047_v18 }
 0x15b   : > { %v2253_v31 = vmax.f32 %v656_v21, 0.0  ;;  %v2255_v32 = vmax.f32 %v849_v22, 0.0  ;;  %v659_v33 = vpop.f32.mrf.mxu0  ;;  %v852_v35 = vpop.f32.mrf.mxu1 }
 0x15c   : > { %v2254_v38 = vmax.f32 %v658_v27, 0.0  ;;  %v2256_v39 = vmax.f32 %v851_v28, 0.0  ;;  %v660_v29 = vadd.f32 %v659_v33, %v9034_v12  ;;  %v853_v30 = vadd.f32 %v852_v35, %v9037_v13 }
 0x15d   : > { %v2660_v1 = vadd.f32 %v2659_v15, %v2253_v31  ;;  %v2722_v2 = vadd.f32 %v2721_v16, %v2255_v32  ;;  %v661_v40 = vpop.f32.mrf.mxu0  ;;  %v854_v56 = vpop.f32.mrf.mxu1 }
 0x15e   : > { %v2691_v36 = vadd.f32 %v2690_v25, %v2254_v38  ;;  %v2753_v37 = vadd.f32 %v2752_v26, %v2256_v39  ;;  %v2269_v3 = vmax.f32 %v660_v29, 0.0  ;;  %v2271_v8 = vmax.f32 %v853_v30, 0.0 }
 0x15f   : > { %v662_v57 = vadd.f32 %v661_v40, %v9044_v17  ;;  %v855_v61 = vadd.f32 %v854_v56, %v9047_v18  ;;  %v665_v19 = vpop.f32.mrf.mxu0  ;;  %v858_v20 = vpop.f32.mrf.mxu1  ;;  %7254 = vmatmul.mubr.msk.bf16.gmra.mxu0 %vm480_vm2, %v8905_v53  ;;  %7270 = vmatmul.mubr.msk.bf16.gmra.mxu1 %vm480_vm2, %v8905_v53 }
 0x160   : > { %v2661_v15 = vadd.f32 %v2660_v1, %v2269_v3  ;;  %v2723_v16 = vadd.f32 %v2722_v2, %v2271_v8  ;;  %v666_v21 = vadd.f32 %v665_v19, %v9034_v12  ;;  %v859_v22 = vadd.f32 %v858_v20, %v9037_v13  ;;  %1139 = vmatprep.mubr.bf16.mxu0 %v8678_v11 }
 0x161   : > { %v2270_v23 = vmax.f32 %v662_v57, 0.0  ;;  %v2272_v24 = vmax.f32 %v855_v61, 0.0  ;;  %v667_v25 = vpop.f32.mrf.mxu0  ;;  %v860_v26 = vpop.f32.mrf.mxu1  ;;  %1332 = vmatprep.mubr.bf16.mxu1 %v8678_v11 }
 0x162   : > { %v2285_v27 = vmax.f32 %v666_v21, 0.0  ;;  %v2287_v28 = vmax.f32 %v859_v22, 0.0  ;;  %v668_v31 = vadd.f32 %v667_v25, %v9044_v17  ;;  %v861_v32 = vadd.f32 %v860_v26, %v9047_v18 }
 0x163   : > { %v2692_v33 = vadd.f32 %v2691_v36, %v2270_v23  ;;  %v2754_v35 = vadd.f32 %v2753_v37, %v2272_v24  ;;  %v669_v38 = vpop.f32.mrf.mxu0  ;;  %v862_v39 = vpop.f32.mrf.mxu1 }
 0x164   : > { %v2662_v29 = vadd.f32 %v2661_v15, %v2285_v27  ;;  %v2724_v30 = vadd.f32 %v2723_v16, %v2287_v28  ;;  %v2286_v1 = vmax.f32 %v668_v31, 0.0  ;;  %v2288_v2 = vmax.f32 %v861_v32, 0.0 }
 0x165   : > { %v670_v40 = vadd.f32 %v669_v38, %v9034_v12  ;;  %v863_v56 = vadd.f32 %v862_v39, %v9037_v13  ;;  %v671_v3 = vpop.f32.mrf.mxu0  ;;  %v864_v8 = vpop.f32.mrf.mxu1 }
 0x166   : > { %v2693_v57 = vadd.f32 %v2692_v33, %v2286_v1  ;;  %v2755_v61 = vadd.f32 %v2754_v35, %v2288_v2  ;;  %v672_v19 = vadd.f32 %v671_v3, %v9044_v17  ;;  %v865_v20 = vadd.f32 %v864_v8, %v9047_v18 }
 0x167   : > { %v2301_v36 = vmax.f32 %v670_v40, 0.0  ;;  %v2303_v37 = vmax.f32 %v863_v56, 0.0  ;;  %v675_v21 = vpop.f32.mrf.mxu0  ;;  %v868_v22 = vpop.f32.mrf.mxu1  ;;  %7255 = vmatmul.mubr.msk.bf16.gmra.mxu0 %vm480_vm2, %v8913_v54  ;;  %7271 = vmatmul.mubr.msk.bf16.gmra.mxu1 %vm480_vm2, %v8913_v54 }
 0x168   : > { %v2302_v15 = vmax.f32 %v672_v19, 0.0  ;;  %v2304_v16 = vmax.f32 %v865_v20, 0.0  ;;  %v676_v23 = vadd.f32 %v675_v21, %v9034_v12  ;;  %v869_v24 = vadd.f32 %v868_v22, %v9037_v13  ;;  %1149 = vmatprep.mubr.bf16.mxu0 %v8678_v11  ;;  %1342 = vmatprep.mubr.bf16.mxu1 %v8678_v11 }
 0x169   : > { %v2663_v25 = vadd.f32 %v2662_v29, %v2301_v36  ;;  %v2725_v26 = vadd.f32 %v2724_v30, %v2303_v37  ;;  %v677_v27 = vpop.f32.mrf.mxu0  ;;  %v870_v28 = vpop.f32.mrf.mxu1 }
 0x16a   : > { %v2694_v31 = vadd.f32 %v2693_v57, %v2302_v15  ;;  %v2756_v32 = vadd.f32 %v2755_v61, %v2304_v16  ;;  %v2317_v33 = vmax.f32 %v676_v23, 0.0  ;;  %v2319_v35 = vmax.f32 %v869_v24, 0.0 }
 0x16b   : > { %v678_v38 = vadd.f32 %v677_v27, %v9044_v17  ;;  %v871_v39 = vadd.f32 %v870_v28, %v9047_v18  ;;  %v679_v1 = vpop.f32.mrf.mxu0  ;;  %v872_v2 = vpop.f32.mrf.mxu1 }
 0x16c   : > { %v2664_v40 = vadd.f32 %v2663_v25, %v2317_v33  ;;  %v2726_v56 = vadd.f32 %v2725_v26, %v2319_v35  ;;  %v680_v3 = vadd.f32 %v679_v1, %v9034_v12  ;;  %v873_v8 = vadd.f32 %v872_v2, %v9037_v13 }
 0x16d   : > { %v2318_v29 = vmax.f32 %v678_v38, 0.0  ;;  %v2320_v30 = vmax.f32 %v871_v39, 0.0  ;;  %v681_v19 = vpop.f32.mrf.mxu0  ;;  %v874_v20 = vpop.f32.mrf.mxu1 }
 0x16e   : > { %v2333_v57 = vmax.f32 %v680_v3, 0.0  ;;  %v2335_v61 = vmax.f32 %v873_v8, 0.0  ;;  %v682_v36 = vadd.f32 %v681_v19, %v9044_v17  ;;  %v875_v37 = vadd.f32 %v874_v20, %v9047_v18 }
 0x16f   : > { %v2695_v21 = vadd.f32 %v2694_v31, %v2318_v29  ;;  %v2757_v22 = vadd.f32 %v2756_v32, %v2320_v30  ;;  %v685_v15 = vpop.f32.mrf.mxu0  ;;  %v878_v16 = vpop.f32.mrf.mxu1  ;;  %7256 = vmatmul.mubr.msk.bf16.gmra.mxu0 %vm480_vm2, %v8921_v55  ;;  %7272 = vmatmul.mubr.msk.bf16.gmra.mxu1 %vm480_vm2, %v8921_v55  ;;  %v570_v3 = vand.u32 %v7205_v60, %v8754_v14 }
 0x170   : > { %v2665_v23 = vadd.f32 %v2664_v40, %v2333_v57  ;;  %v2727_v24 = vadd.f32 %v2726_v56, %v2335_v61  ;;  %v2334_v25 = vmax.f32 %v682_v36, 0.0  ;;  %v2336_v26 = vmax.f32 %v875_v37, 0.0  ;;  %1385 = vmatprep.mubr.bf16.mxu0 %v8678_v11  ;;  %1578 = vmatprep.mubr.bf16.mxu1 %v8678_v11 }
 0x171   : > { %v686_v27 = vadd.f32 %v685_v15, %v9034_v12  ;;  %v879_v28 = vadd.f32 %v878_v16, %v9037_v13  ;;  %v687_v31 = vpop.f32.mrf.mxu0  ;;  %v880_v32 = vpop.f32.mrf.mxu1  ;;  %v576_v37 = vand.u32 %v7207_v0, %v8754_v14 }
 0x172   : > { %v2696_v33 = vadd.f32 %v2695_v21, %v2334_v25  ;;  %v2758_v35 = vadd.f32 %v2757_v22, %v2336_v26  ;;  %v688_v38 = vadd.f32 %v687_v31, %v9044_v17  ;;  %v881_v39 = vadd.f32 %v880_v32, %v9047_v18 }
 0x173   : > { %v2349_v1 = vmax.f32 %v686_v27, 0.0  ;;  %v2351_v2 = vmax.f32 %v879_v28, 0.0  ;;  %v689_v40 = vpop.f32.mrf.mxu0  ;;  %v882_v56 = vpop.f32.mrf.mxu1 }
 0x174   : > { %v2350_v8 = vmax.f32 %v688_v38, 0.0  ;;  %v2352_v29 = vmax.f32 %v881_v39, 0.0  ;;  %v690_v30 = vadd.f32 %v689_v40, %v9034_v12  ;;  %v883_v19 = vadd.f32 %v882_v56, %v9037_v13 }
 0x175   : > { %v2666_v20 = vadd.f32 %v2665_v23, %v2349_v1  ;;  %v2728_v57 = vadd.f32 %v2727_v24, %v2351_v2  ;;  %v691_v61 = vpop.f32.mrf.mxu0  ;;  %v884_v36 = vpop.f32.mrf.mxu1 }
 0x176   : > { %v2697_v21 = vadd.f32 %v2696_v33, %v2350_v8  ;;  %v2759_v22 = vadd.f32 %v2758_v35, %v2352_v29  ;;  %v2365_v15 = vmax.f32 %v690_v30, 0.0  ;;  %v2367_v58 = vmax.f32 %v883_v19, 0.0 }
 0x177   : > { %v692_v59 = vadd.f32 %v691_v61, %v9044_v17  ;;  %v885_v60 = vadd.f32 %v884_v36, %v9047_v18  ;;  %v695_v16 = vpop.f32.mrf.mxu0  ;;  %v888_v25 = vpop.f32.mrf.mxu1  ;;  %7273 = vmatmul.mubr.msk.bf16.vlgmr.msra.gmra.mxu0 %vm480_vm2, %v8785_v34  ;;  %7289 = vmatmul.mubr.msk.bf16.vlgmr.msra.gmra.mxu1 %vm480_vm2, %v8785_v34 }
 0x178   : > { %v2667_v23 = vadd.f32 %v2666_v20, %v2365_v15  ;;  %v2729_v24 = vadd.f32 %v2728_v57, %v2367_v58  ;;  %v696_v14 = vadd.f32 %v695_v16, %v9034_v12  ;;  %v889_v62 = vadd.f32 %v888_v25, %v9037_v13  ;;  %1754 = vmatpush1.bf16.msra.mxu0 %v570_v3 }
 0x179   : > { %v2366_v63 = vmax.f32 %v692_v59, 0.0  ;;  %v2368_v0 = vmax.f32 %v885_v60, 0.0  ;;  %v697_v26 = vpop.f32.mrf.mxu0  ;;  %v890_v27 = vpop.f32.mrf.mxu1  ;;  %1947 = vmatpush1.bf16.msra.mxu1 %v576_v37  ;;  %1395 = vmatprep.mubr.bf16.mxu0 %v8678_v11 }
 0x17a   : > { %v2381_v28 = vmax.f32 %v696_v14, 0.0  ;;  %v2383_v31 = vmax.f32 %v889_v62, 0.0  ;;  %v698_v32 = vadd.f32 %v697_v26, %v9044_v17  ;;  %v891_v33 = vadd.f32 %v890_v27, %v9047_v18  ;;  %1588 = vmatprep.mubr.bf16.mxu1 %v8678_v11 }
 0x17b   : > { %v2698_v35 = vadd.f32 %v2697_v21, %v2366_v63  ;;  %v2760_v38 = vadd.f32 %v2759_v22, %v2368_v0  ;;  %v699_v39 = vpop.f32.mrf.mxu0  ;;  %v892_v1 = vpop.f32.mrf.mxu1 }
 0x17c   : > { %v2668_v2 = vadd.f32 %v2667_v23, %v2381_v28  ;;  %v2730_v40 = vadd.f32 %v2729_v24, %v2383_v31  ;;  %v2382_v56 = vmax.f32 %v698_v32, 0.0  ;;  %v2384_v3 = vmax.f32 %v891_v33, 0.0 }
 0x17d   : > { %v700_v8 = vadd.f32 %v699_v39, %v9034_v12  ;;  %v893_v29 = vadd.f32 %v892_v1, %v9037_v13  ;;  %v701_v30 = vpop.f32.mrf.mxu0  ;;  %v894_v19 = vpop.f32.mrf.mxu1 }
 0x17e   : > { %v2699_v20 = vadd.f32 %v2698_v35, %v2382_v56  ;;  %v2761_v57 = vadd.f32 %v2760_v38, %v2384_v3  ;;  %v702_v61 = vadd.f32 %v701_v30, %v9044_v17  ;;  %v895_v36 = vadd.f32 %v894_v19, %v9047_v18 }
 0x17f   : > { %v2397_v37 = vmax.f32 %v700_v8, 0.0  ;;  %v2399_v21 = vmax.f32 %v893_v29, 0.0  ;;  %v705_v22 = vpop.f32.mrf.mxu0  ;;  %v898_v15 = vpop.f32.mrf.mxu1  ;;  %7274 = vmatmul.mubr.msk.bf16.gmra.mxu0 %vm480_vm2, %v8809_v41  ;;  %7290 = vmatmul.mubr.msk.bf16.gmra.mxu1 %vm480_vm2, %v8809_v41 }
 0x180   : > { %v2398_v58 = vmax.f32 %v702_v61, 0.0  ;;  %v2400_v59 = vmax.f32 %v895_v36, 0.0  ;;  %v706_v60 = vadd.f32 %v705_v22, %v9034_v12  ;;  %v899_v16 = vadd.f32 %v898_v15, %v9037_v13  ;;  %1405 = vmatprep.mubr.bf16.mxu0 %v8678_v11  ;;  %1598 = vmatprep.mubr.bf16.mxu1 %v8678_v11 }
 0x181   : > { %v2669_v25 = vadd.f32 %v2668_v2, %v2397_v37  ;;  %v2731_v23 = vadd.f32 %v2730_v40, %v2399_v21  ;;  %v707_v24 = vpop.f32.mrf.mxu0  ;;  %v900_v14 = vpop.f32.mrf.mxu1 }
 0x182   : > { %v2700_v62 = vadd.f32 %v2699_v20, %v2398_v58  ;;  %v2762_v63 = vadd.f32 %v2761_v57, %v2400_v59  ;;  %v2413_v0 = vmax.f32 %v706_v60, 0.0  ;;  %v2415_v26 = vmax.f32 %v899_v16, 0.0 }
 0x183   : > { %v708_v27 = vadd.f32 %v707_v24, %v9044_v17  ;;  %v901_v28 = vadd.f32 %v900_v14, %v9047_v18  ;;  %v709_v31 = vpop.f32.mrf.mxu0  ;;  %v902_v32 = vpop.f32.mrf.mxu1 }
 0x184   : > { %v2670_v33 = vadd.f32 %v2669_v25, %v2413_v0  ;;  %v2732_v35 = vadd.f32 %v2731_v23, %v2415_v26  ;;  %v710_v38 = vadd.f32 %v709_v31, %v9034_v12  ;;  %v903_v39 = vadd.f32 %v902_v32, %v9037_v13 }
 0x185   : > { %v2414_v1 = vmax.f32 %v708_v27, 0.0  ;;  %v2416_v2 = vmax.f32 %v901_v28, 0.0  ;;  %v711_v40 = vpop.f32.mrf.mxu0  ;;  %v904_v56 = vpop.f32.mrf.mxu1 }
 0x186   : > { %v2429_v3 = vmax.f32 %v710_v38, 0.0  ;;  %v2431_v8 = vmax.f32 %v903_v39, 0.0  ;;  %v712_v29 = vadd.f32 %v711_v40, %v9044_v17  ;;  %v905_v30 = vadd.f32 %v904_v56, %v9047_v18 }
 0x187   : > { %v2701_v19 = vadd.f32 %v2700_v62, %v2414_v1  ;;  %v2763_v20 = vadd.f32 %v2762_v63, %v2416_v2  ;;  %v715_v57 = vpop.f32.mrf.mxu0  ;;  %v908_v61 = vpop.f32.mrf.mxu1  ;;  %7275 = vmatmul.mubr.msk.bf16.gmra.mxu0 %vm480_vm2, %v8817_v42  ;;  %7291 = vmatmul.mubr.msk.bf16.gmra.mxu1 %vm480_vm2, %v8817_v42 }
 0x188   : > { %v2671_v36 = vadd.f32 %v2670_v33, %v2429_v3  ;;  %v2733_v37 = vadd.f32 %v2732_v35, %v2431_v8  ;;  %v2430_v21 = vmax.f32 %v712_v29, 0.0  ;;  %v2432_v22 = vmax.f32 %v905_v30, 0.0  ;;  %1415 = vmatprep.mubr.bf16.mxu0 %v8678_v11  ;;  %1608 = vmatprep.mubr.bf16.mxu1 %v8678_v11 }
 0x189   : > { %v716_v15 = vadd.f32 %v715_v57, %v9034_v12  ;;  %v909_v58 = vadd.f32 %v908_v61, %v9037_v13  ;;  %v717_v59 = vpop.f32.mrf.mxu0  ;;  %v910_v60 = vpop.f32.mrf.mxu1  ;;  %v7884_v61 = vld [vmem:[%s12086_s3 + $0xe4] ss:$16 sps:$4 sm:$0xff]  }
 0x18a   : > { %v2702_v16 = vadd.f32 %v2701_v19, %v2430_v21  ;;  %v2764_v25 = vadd.f32 %v2763_v20, %v2432_v22  ;;  %v718_v23 = vadd.f32 %v717_v59, %v9044_v17  ;;  %v911_v24 = vadd.f32 %v910_v60, %v9047_v18  ;;  %6422 = vmatprep.subr.bf16.mxu0 %v7884_v61 }
 0x18b   : > { %v2445_v14 = vmax.f32 %v716_v15, 0.0  ;;  %v2447_v62 = vmax.f32 %v909_v58, 0.0  ;;  %v719_v63 = vpop.f32.mrf.mxu0  ;;  %v912_v0 = vpop.f32.mrf.mxu1 }
 0x18c   : > { %v2446_v26 = vmax.f32 %v718_v23, 0.0  ;;  %v2448_v27 = vmax.f32 %v911_v24, 0.0  ;;  %v720_v28 = vadd.f32 %v719_v63, %v9034_v12  ;;  %v913_v31 = vadd.f32 %v912_v0, %v9037_v13 }
 0x18d   : > { %v2672_v32 = vadd.f32 %v2671_v36, %v2445_v14  ;;  %v2734_v33 = vadd.f32 %v2733_v37, %v2447_v62  ;;  %v721_v35 = vpop.f32.mrf.mxu0  ;;  %v914_v38 = vpop.f32.mrf.mxu1  ;;  %v7887_v14 = vld [vmem:[%s12086_s3 + $0x2e4] ss:$16 sps:$4 sm:$0xff]  }
 0x18e   : > { %v2703_v39 = vadd.f32 %v2702_v16, %v2446_v26  ;;  %v2765_v1 = vadd.f32 %v2764_v25, %v2448_v27  ;;  %v2461_v2 = vmax.f32 %v720_v28, 0.0  ;;  %v2463_v40 = vmax.f32 %v913_v31, 0.0  ;;  %6463 = vmatprep.subr.bf16.mxu1 %v7887_v14 }
 0x18f   : > { %v722_v56 = vadd.f32 %v721_v35, %v9044_v17  ;;  %v915_v3 = vadd.f32 %v914_v38, %v9047_v18  ;;  %v725_v8 = vpop.f32.mrf.mxu0  ;;  %v918_v29 = vpop.f32.mrf.mxu1  ;;  %7276 = vmatmul.mubr.msk.bf16.gmra.mxu0 %vm480_vm2, %v8825_v43  ;;  %7292 = vmatmul.mubr.msk.bf16.gmra.mxu1 %vm480_vm2, %v8825_v43 }
 0x190   : > { %v2673_v30 = vadd.f32 %v2672_v32, %v2461_v2  ;;  %v2735_v19 = vadd.f32 %v2734_v33, %v2463_v40  ;;  %v726_v20 = vadd.f32 %v725_v8, %v9034_v12  ;;  %v919_v57 = vadd.f32 %v918_v29, %v9037_v13  ;;  %1425 = vmatprep.mubr.bf16.mxu0 %v8678_v11 }
 0x191   : > { %v2462_v36 = vmax.f32 %v722_v56, 0.0  ;;  %v2464_v37 = vmax.f32 %v915_v3, 0.0  ;;  %v727_v21 = vpop.f32.mrf.mxu0  ;;  %v920_v22 = vpop.f32.mrf.mxu1  ;;  %1618 = vmatprep.mubr.bf16.mxu1 %v8678_v11 }
 0x192   : > { %v2477_v15 = vmax.f32 %v726_v20, 0.0  ;;  %v2479_v58 = vmax.f32 %v919_v57, 0.0  ;;  %v728_v59 = vadd.f32 %v727_v21, %v9044_v17  ;;  %v921_v60 = vadd.f32 %v920_v22, %v9047_v18 }
 0x193   : > { %v2704_v16 = vadd.f32 %v2703_v39, %v2462_v36  ;;  %v2766_v25 = vadd.f32 %v2765_v1, %v2464_v37  ;;  %v729_v23 = vpop.f32.mrf.mxu0  ;;  %v922_v24 = vpop.f32.mrf.mxu1 }
 0x194   : > { %v2674_v62 = vadd.f32 %v2673_v30, %v2477_v15  ;;  %v2736_v63 = vadd.f32 %v2735_v19, %v2479_v58  ;;  %v2478_v0 = vmax.f32 %v728_v59, 0.0  ;;  %v2480_v26 = vmax.f32 %v921_v60, 0.0 }
 0x195   : > { %v730_v27 = vadd.f32 %v729_v23, %v9034_v12  ;;  %v923_v28 = vadd.f32 %v922_v24, %v9037_v13  ;;  %v731_v31 = vpop.f32.mrf.mxu0  ;;  %v924_v32 = vpop.f32.mrf.mxu1 }
 0x196   : > { %v2705_v33 = vadd.f32 %v2704_v16, %v2478_v0  ;;  %v2767_v35 = vadd.f32 %v2766_v25, %v2480_v26  ;;  %v732_v38 = vadd.f32 %v731_v31, %v9044_v17  ;;  %v925_v39 = vadd.f32 %v924_v32, %v9047_v18 }
 0x197   : > { %v2493_v1 = vmax.f32 %v730_v27, 0.0  ;;  %v2495_v2 = vmax.f32 %v923_v28, 0.0  ;;  %v735_v40 = vpop.f32.mrf.mxu0  ;;  %v928_v56 = vpop.f32.mrf.mxu1  ;;  %7277 = vmatmul.mubr.msk.bf16.gmra.mxu0 %vm480_vm2, %v8833_v44  ;;  %7293 = vmatmul.mubr.msk.bf16.gmra.mxu1 %vm480_vm2, %v8833_v44 }
 0x198   : > { %v2494_v3 = vmax.f32 %v732_v38, 0.0  ;;  %v2496_v8 = vmax.f32 %v925_v39, 0.0  ;;  %v736_v29 = vadd.f32 %v735_v40, %v9034_v12  ;;  %v929_v30 = vadd.f32 %v928_v56, %v9037_v13  ;;  %1435 = vmatprep.mubr.bf16.mxu0 %v8678_v11  ;;  %1628 = vmatprep.mubr.bf16.mxu1 %v8678_v11 }
 0x199   : > { %v2675_v19 = vadd.f32 %v2674_v62, %v2493_v1  ;;  %v2737_v20 = vadd.f32 %v2736_v63, %v2495_v2  ;;  %v737_v57 = vpop.f32.mrf.mxu0  ;;  %v930_v61 = vpop.f32.mrf.mxu1 }
 0x19a   : > { %v2706_v36 = vadd.f32 %v2705_v33, %v2494_v3  ;;  %v2768_v37 = vadd.f32 %v2767_v35, %v2496_v8  ;;  %v2509_v21 = vmax.f32 %v736_v29, 0.0  ;;  %v2511_v22 = vmax.f32 %v929_v30, 0.0 }
 0x19b   : > { %v738_v15 = vadd.f32 %v737_v57, %v9044_v17  ;;  %v931_v58 = vadd.f32 %v930_v61, %v9047_v18  ;;  %v739_v59 = vpop.f32.mrf.mxu0  ;;  %v932_v60 = vpop.f32.mrf.mxu1 }
 0x19c   : > { %v2676_v16 = vadd.f32 %v2675_v19, %v2509_v21  ;;  %v2738_v25 = vadd.f32 %v2737_v20, %v2511_v22  ;;  %v740_v23 = vadd.f32 %v739_v59, %v9034_v12  ;;  %v933_v24 = vadd.f32 %v932_v60, %v9037_v13 }
 0x19d   : > { %v2510_v14 = vmax.f32 %v738_v15, 0.0  ;;  %v2512_v62 = vmax.f32 %v931_v58, 0.0  ;;  %v741_v63 = vpop.f32.mrf.mxu0  ;;  %v934_v0 = vpop.f32.mrf.mxu1 }
 0x19e   : > { %v2525_v26 = vmax.f32 %v740_v23, 0.0  ;;  %v2527_v27 = vmax.f32 %v933_v24, 0.0  ;;  %v742_v28 = vadd.f32 %v741_v63, %v9044_v17  ;;  %v935_v31 = vadd.f32 %v934_v0, %v9047_v18 }
 0x19f   : > { %v2707_v32 = vadd.f32 %v2706_v36, %v2510_v14  ;;  %v2769_v33 = vadd.f32 %v2768_v37, %v2512_v62  ;;  %v745_v35 = vpop.f32.mrf.mxu0  ;;  %v938_v38 = vpop.f32.mrf.mxu1  ;;  %7278 = vmatmul.mubr.msk.bf16.gmra.mxu0 %vm480_vm2, %v8841_v45  ;;  %7294 = vmatmul.mubr.msk.bf16.gmra.mxu1 %vm480_vm2, %v8841_v45 }
 0x1a0   : > { %v2677_v39 = vadd.f32 %v2676_v16, %v2525_v26  ;;  %v2739_v1 = vadd.f32 %v2738_v25, %v2527_v27  ;;  %v2526_v2 = vmax.f32 %v742_v28, 0.0  ;;  %v2528_v40 = vmax.f32 %v935_v31, 0.0  ;;  %1445 = vmatprep.mubr.bf16.mxu0 %v8678_v11  ;;  %1638 = vmatprep.mubr.bf16.mxu1 %v8678_v11 }
 0x1a1   : > { %v746_v56 = vadd.f32 %v745_v35, %v9034_v12  ;;  %v939_v3 = vadd.f32 %v938_v38, %v9037_v13  ;;  %v747_v8 = vpop.f32.mrf.mxu0  ;;  %v940_v29 = vpop.f32.mrf.mxu1 }
 0x1a2   : > { %v2708_v30 = vadd.f32 %v2707_v32, %v2526_v2  ;;  %v2770_v19 = vadd.f32 %v2769_v33, %v2528_v40  ;;  %v748_v20 = vadd.f32 %v747_v8, %v9044_v17  ;;  %v941_v57 = vadd.f32 %v940_v29, %v9047_v18 }
 0x1a3   : > { %v2541_v61 = vmax.f32 %v746_v56, 0.0  ;;  %v2543_v36 = vmax.f32 %v939_v3, 0.0  ;;  %v749_v37 = vpop.f32.mrf.mxu0  ;;  %v942_v21 = vpop.f32.mrf.mxu1 }
 0x1a4   : > { %v2542_v22 = vmax.f32 %v748_v20, 0.0  ;;  %v2544_v15 = vmax.f32 %v941_v57, 0.0  ;;  %v750_v58 = vadd.f32 %v749_v37, %v9034_v12  ;;  %v943_v59 = vadd.f32 %v942_v21, %v9037_v13 }
 0x1a5   : > { %v2678_v60 = vadd.f32 %v2677_v39, %v2541_v61  ;;  %v2740_v16 = vadd.f32 %v2739_v1, %v2543_v36  ;;  %v751_v25 = vpop.f32.mrf.mxu0  ;;  %v944_v23 = vpop.f32.mrf.mxu1 }
 0x1a6   : > { %v2709_v24 = vadd.f32 %v2708_v30, %v2542_v22  ;;  %v2771_v14 = vadd.f32 %v2770_v19, %v2544_v15  ;;  %v2557_v62 = vmax.f32 %v750_v58, 0.0  ;;  %v2559_v63 = vmax.f32 %v943_v59, 0.0 }
 0x1a7   : > { %v752_v0 = vadd.f32 %v751_v25, %v9044_v17  ;;  %v945_v26 = vadd.f32 %v944_v23, %v9047_v18  ;;  %v755_v27 = vpop.f32.mrf.mxu0  ;;  %v948_v28 = vpop.f32.mrf.mxu1  ;;  %7279 = vmatmul.mubr.msk.bf16.gmra.mxu0 %vm480_vm2, %v8849_v46  ;;  %7295 = vmatmul.mubr.msk.bf16.gmra.mxu1 %vm480_vm2, %v8849_v46 }
 0x1a8   : > { %v2679_v31 = vadd.f32 %v2678_v60, %v2557_v62  ;;  %v2741_v32 = vadd.f32 %v2740_v16, %v2559_v63  ;;  %v756_v33 = vadd.f32 %v755_v27, %v9034_v12  ;;  %v949_v35 = vadd.f32 %v948_v28, %v9037_v13  ;;  %1455 = vmatprep.mubr.bf16.mxu0 %v8678_v11 }
 0x1a9   : > { %v2558_v38 = vmax.f32 %v752_v0, 0.0  ;;  %v2560_v39 = vmax.f32 %v945_v26, 0.0  ;;  %v757_v1 = vpop.f32.mrf.mxu0  ;;  %v950_v2 = vpop.f32.mrf.mxu1  ;;  %1648 = vmatprep.mubr.bf16.mxu1 %v8678_v11  ;;  %v12093_v63 = vsub.s32 4, %v9010_v5 }
 0x1aa   : > { %v2573_v40 = vmax.f32 %v756_v33, 0.0  ;;  %v2575_v56 = vmax.f32 %v949_v35, 0.0  ;;  %v758_v3 = vadd.f32 %v757_v1, %v9044_v17  ;;  %v951_v8 = vadd.f32 %v950_v2, %v9047_v18 }
 0x1ab   : > { %v2710_v29 = vadd.f32 %v2709_v24, %v2558_v38  ;;  %v2772_v30 = vadd.f32 %v2771_v14, %v2560_v39  ;;  %v759_v19 = vpop.f32.mrf.mxu0  ;;  %v952_v20 = vpop.f32.mrf.mxu1  ;;  %v12092_v38 = vsub.s32 6, %v9010_v5  ;;  %v12091_v39 = vsub.s32 5, %v9010_v5 }
 0x1ac   : > { %v2680_v57 = vadd.f32 %v2679_v31, %v2573_v40  ;;  %v2742_v61 = vadd.f32 %v2741_v32, %v2575_v56  ;;  %v2574_v36 = vmax.f32 %v758_v3, 0.0  ;;  %v2576_v37 = vmax.f32 %v951_v8, 0.0 }
 0x1ad   : > { %v760_v21 = vadd.f32 %v759_v19, %v9034_v12  ;;  %v953_v22 = vadd.f32 %v952_v20, %v9037_v13  ;;  %v761_v15 = vpop.f32.mrf.mxu0  ;;  %v954_v58 = vpop.f32.mrf.mxu1  ;;  %v8650_v19 = vld [vmem:[%s12085_s2] sm:$0xff] }
 0x1ae   : > { %v2711_v59 = vadd.f32 %v2710_v29, %v2574_v36  ;;  %v2773_v60 = vadd.f32 %v2772_v30, %v2576_v37  ;;  %v762_v16 = vadd.f32 %v761_v15, %v9044_v17  ;;  %v955_v25 = vadd.f32 %v954_v58, %v9047_v18 }
 0x1af   : > { %v2589_v23 = vmax.f32 %v760_v21, 0.0  ;;  %v2591_v24 = vmax.f32 %v953_v22, 0.0  ;;  %v765_v14 = vpop.f32.mrf.mxu0  ;;  %v958_v62 = vpop.f32.mrf.mxu1  ;;  %7280 = vmatmul.mubr.msk.bf16.gmra.mxu0 %vm480_vm2, %v8857_v47  ;;  %7296 = vmatmul.mubr.msk.bf16.gmra.mxu1 %vm480_vm2, %v8857_v47  ;;  %v9287_v20 = vrot.slane %v8650_v19, %v12093_v63 }
 0x1b0   : > { %v2590_v0 = vmax.f32 %v762_v16, 0.0  ;;  %v2592_v26 = vmax.f32 %v955_v25, 0.0  ;;  %v766_v27 = vadd.f32 %v765_v14, %v9034_v12  ;;  %v959_v28 = vadd.f32 %v958_v62, %v9037_v13  ;;  %1465 = vmatprep.mubr.bf16.mxu0 %v8678_v11  ;;  %1658 = vmatprep.mubr.bf16.mxu1 %v8678_v11 }
 0x1b1   : > { %v2681_v31 = vadd.f32 %v2680_v57, %v2589_v23  ;;  %v2743_v32 = vadd.f32 %v2742_v61, %v2591_v24  ;;  %v767_v33 = vpop.f32.mrf.mxu0  ;;  %v960_v35 = vpop.f32.mrf.mxu1  ;;  %v12090_v57 = vsub.s32 7, %v9010_v5  ;;  %v9298_v16 = vrot.slane %v8650_v19, %v12091_v39 }
 0x1b2   : > { %v2712_v1 = vadd.f32 %v2711_v59, %v2590_v0  ;;  %v2774_v2 = vadd.f32 %v2773_v60, %v2592_v26  ;;  %v2605_v40 = vmax.f32 %v766_v27, 0.0  ;;  %v2607_v56 = vmax.f32 %v959_v28, 0.0 }
 0x1b3   : > { %v768_v3 = vadd.f32 %v767_v33, %v9044_v17  ;;  %v961_v8 = vadd.f32 %v960_v35, %v9047_v18  ;;  %v769_v29 = vpop.f32.mrf.mxu0  ;;  %v962_v30 = vpop.f32.mrf.mxu1  ;;  %v9294_v60 = vrot.slane %v8650_v19, %v12092_v38  ;;  %v9308_v26 = vrot.slane %v8650_v19, %v12090_v57 }
 0x1b4   : > { %v2682_v61 = vadd.f32 %v2681_v31, %v2605_v40  ;;  %v2744_v36 = vadd.f32 %v2743_v32, %v2607_v56  ;;  %v770_v37 = vadd.f32 %v769_v29, %v9034_v12  ;;  %v963_v21 = vadd.f32 %v962_v30, %v9037_v13 }
 0x1b5   : > { %v2606_v22 = vmax.f32 %v768_v3, 0.0  ;;  %v2608_v15 = vmax.f32 %v961_v8, 0.0  ;;  %v771_v58 = vpop.f32.mrf.mxu0  ;;  %v964_v59 = vpop.f32.mrf.mxu1 }
 0x1b6   : > { %v2621_v25 = vmax.f32 %v770_v37, 0.0  ;;  %v2623_v23 = vmax.f32 %v963_v21, 0.0  ;;  %v772_v24 = vadd.f32 %v771_v58, %v9044_v17  ;;  %v965_v12 = vadd.f32 %v964_v59, %v9047_v18 }
 0x1b7   : > { %v2713_v14 = vadd.f32 %v2712_v1, %v2606_v22  ;;  %v2775_v13 = vadd.f32 %v2774_v2, %v2608_v15  ;;  %v1001_v62 = vpop.f32.mrf.mxu0  ;;  %v1194_v0 = vpop.f32.mrf.mxu1  ;;  %7281 = vmatmul.mubr.msk.bf16.gmra.mxu0 %vm480_vm2, %v8865_v48  ;;  %7297 = vmatmul.mubr.msk.bf16.gmra.mxu1 %vm480_vm2, %v8865_v48 }
 0x1b8   : > { %v9310_v27 = vadd.f32 %v2682_v61, %v2621_v25  ;;  %v9312_v28 = vadd.f32 %v2744_v36, %v2623_v23  ;;  %v2622_v17 = vmax.f32 %v772_v24, 0.0  ;;  %v2624_v18 = vmax.f32 %v965_v12, 0.0  ;;  %1475 = vmatprep.mubr.bf16.mxu0 %v8678_v11  ;;  %1668 = vmatprep.mubr.bf16.mxu1 %v8678_v11 }
 0x1b9   : > { %v1003_v31 = vpop.f32.mrf.mxu0  ;;  %v1196_v32 = vpop.f32.mrf.mxu1  ;;  %v1002_v1 = vadd.f32 %v1001_v62, %v9287_v20  ;;  %v1195_v2 = vadd.f32 %v1194_v0, %v9294_v60 }
 0x1ba   : > { %v9316_v33 = vadd.f32 %v2713_v14, %v2622_v17  ;;  %v9318_v35 = vadd.f32 %v2775_v13, %v2624_v18  ;;  %v1004_v3 = vadd.f32 %v1003_v31, %v9298_v16  ;;  %v1197_v8 = vadd.f32 %v1196_v32, %v9308_v26 }
 0x1bb   : > { %v1005_v40 = vpop.f32.mrf.mxu0  ;;  %v1198_v56 = vpop.f32.mrf.mxu1  ;;  %v2129_v36 = vmax.f32 %v1002_v1, 0.0  ;;  %v2131_v37 = vmax.f32 %v1195_v2, 0.0 }
 0x1bc   : > { %v1006_v29 = vadd.f32 %v1005_v40, %v9287_v20  ;;  %v1199_v30 = vadd.f32 %v1198_v56, %v9294_v60  ;;  %v2130_v23 = vmax.f32 %v1004_v3, 0.0  ;;  %v2132_v24 = vmax.f32 %v1197_v8, 0.0 }
 0x1bd   : > { %v1007_v19 = vpop.f32.mrf.mxu0  ;;  %v1200_v61 = vpop.f32.mrf.mxu1 }
 0x1be   : > { %v2145_v21 = vmax.f32 %v1006_v29, 0.0  ;;  %v2147_v22 = vmax.f32 %v1199_v30, 0.0  ;;  %v1008_v15 = vadd.f32 %v1007_v19, %v9298_v16  ;;  %v1201_v58 = vadd.f32 %v1200_v61, %v9308_v26 }
 0x1bf   : > { %v1011_v59 = vpop.f32.mrf.mxu0  ;;  %v1204_v25 = vpop.f32.mrf.mxu1  ;;  %7282 = vmatmul.mubr.msk.bf16.gmra.mxu0 %vm480_vm2, %v8873_v49  ;;  %7298 = vmatmul.mubr.msk.bf16.gmra.mxu1 %vm480_vm2, %v8873_v49 }
 0x1c0   : > { %1485 = vmatprep.mubr.bf16.mxu0 %v8678_v11  ;;  %1678 = vmatprep.mubr.bf16.mxu1 %v8678_v11  ;;  %v2777_v12 = vadd.f32 %v2145_v21, %v2129_v36  ;;  %v2839_v14 = vadd.f32 %v2147_v22, %v2131_v37  ;;  %v2146_v13 = vmax.f32 %v1008_v15, 0.0  ;;  %v2148_v62 = vmax.f32 %v1201_v58, 0.0 }
 0x1c1   : > { %v1013_v0 = vpop.f32.mrf.mxu0  ;;  %v1206_v17 = vpop.f32.mrf.mxu1  ;;  %v1012_v18 = vadd.f32 %v1011_v59, %v9287_v20  ;;  %v1205_v31 = vadd.f32 %v1204_v25, %v9294_v60 }
 0x1c2   : > { %v2808_v32 = vadd.f32 %v2146_v13, %v2130_v23  ;;  %v2870_v1 = vadd.f32 %v2148_v62, %v2132_v24  ;;  %v1014_v2 = vadd.f32 %v1013_v0, %v9298_v16  ;;  %v1207_v40 = vadd.f32 %v1206_v17, %v9308_v26 }
 0x1c3   : > { %v1015_v56 = vpop.f32.mrf.mxu0  ;;  %v1208_v3 = vpop.f32.mrf.mxu1  ;;  %v2161_v8 = vmax.f32 %v1012_v18, 0.0  ;;  %v2163_v29 = vmax.f32 %v1205_v31, 0.0 }
 0x1c4   : > { %v2162_v30 = vmax.f32 %v1014_v2, 0.0  ;;  %v2164_v19 = vmax.f32 %v1207_v40, 0.0  ;;  %v1016_v61 = vadd.f32 %v1015_v56, %v9287_v20  ;;  %v1209_v36 = vadd.f32 %v1208_v3, %v9294_v60 }
 0x1c5   : > { %v1017_v37 = vpop.f32.mrf.mxu0  ;;  %v1210_v21 = vpop.f32.mrf.mxu1  ;;  %v2778_v22 = vadd.f32 %v2777_v12, %v2161_v8  ;;  %v2840_v15 = vadd.f32 %v2839_v14, %v2163_v29 }
 0x1c6   : > { %v2809_v58 = vadd.f32 %v2808_v32, %v2162_v30  ;;  %v2871_v59 = vadd.f32 %v2870_v1, %v2164_v19  ;;  %v2177_v25 = vmax.f32 %v1016_v61, 0.0  ;;  %v2179_v23 = vmax.f32 %v1209_v36, 0.0 }
 0x1c7   : > { %v1021_v24 = vpop.f32.mrf.mxu0  ;;  %v1214_v13 = vpop.f32.mrf.mxu1  ;;  %7283 = vmatmul.mubr.msk.bf16.gmra.mxu0 %vm480_vm2, %v8881_v50  ;;  %7299 = vmatmul.mubr.msk.bf16.gmra.mxu1 %vm480_vm2, %v8881_v50  ;;  %v1018_v62 = vadd.f32 %v1017_v37, %v9298_v16  ;;  %v1211_v0 = vadd.f32 %v1210_v21, %v9308_v26 }
 0x1c8   : > { %1495 = vmatprep.mubr.bf16.mxu0 %v8678_v11  ;;  %v2779_v12 = vadd.f32 %v2778_v22, %v2177_v25  ;;  %v2841_v14 = vadd.f32 %v2840_v15, %v2179_v23  ;;  %v1022_v17 = vadd.f32 %v1021_v24, %v9287_v20  ;;  %v1215_v18 = vadd.f32 %v1214_v13, %v9294_v60 }
 0x1c9   : > { %v1023_v31 = vpop.f32.mrf.mxu0  ;;  %v1216_v32 = vpop.f32.mrf.mxu1  ;;  %1688 = vmatprep.mubr.bf16.mxu1 %v8678_v11  ;;  %v2178_v1 = vmax.f32 %v1018_v62, 0.0  ;;  %v2180_v2 = vmax.f32 %v1211_v0, 0.0 }
 0x1ca   : > { %v1024_v40 = vadd.f32 %v1023_v31, %v9298_v16  ;;  %v1217_v56 = vadd.f32 %v1216_v32, %v9308_v26  ;;  %v2193_v3 = vmax.f32 %v1022_v17, 0.0  ;;  %v2195_v8 = vmax.f32 %v1215_v18, 0.0 }
 0x1cb   : > { %v1025_v29 = vpop.f32.mrf.mxu0  ;;  %v1218_v30 = vpop.f32.mrf.mxu1  ;;  %v2810_v19 = vadd.f32 %v2809_v58, %v2178_v1  ;;  %v2872_v61 = vadd.f32 %v2871_v59, %v2180_v2 }
 0x1cc   : > { %v2194_v36 = vmax.f32 %v1024_v40, 0.0  ;;  %v2196_v37 = vmax.f32 %v1217_v56, 0.0  ;;  %v2780_v21 = vadd.f32 %v2779_v12, %v2193_v3  ;;  %v2842_v22 = vadd.f32 %v2841_v14, %v2195_v8 }
 0x1cd   : > { %v1026_v15 = vadd.f32 %v1025_v29, %v9287_v20  ;;  %v1219_v25 = vadd.f32 %v1218_v30, %v9294_v60  ;;  %v1027_v23 = vpop.f32.mrf.mxu0  ;;  %v1220_v24 = vpop.f32.mrf.mxu1 }
 0x1ce   : > { %v2811_v13 = vadd.f32 %v2810_v19, %v2194_v36  ;;  %v2873_v62 = vadd.f32 %v2872_v61, %v2196_v37  ;;  %v1028_v0 = vadd.f32 %v1027_v23, %v9298_v16  ;;  %v1221_v17 = vadd.f32 %v1220_v24, %v9308_v26 }
 0x1cf   : > { %v2209_v18 = vmax.f32 %v1026_v15, 0.0  ;;  %v2211_v31 = vmax.f32 %v1219_v25, 0.0  ;;  %v1031_v58 = vpop.f32.mrf.mxu0  ;;  %v1224_v59 = vpop.f32.mrf.mxu1  ;;  %7284 = vmatmul.mubr.msk.bf16.gmra.mxu0 %vm480_vm2, %v8889_v51  ;;  %7300 = vmatmul.mubr.msk.bf16.gmra.mxu1 %vm480_vm2, %v8889_v51 }
 0x1d0   : > { %v2210_v12 = vmax.f32 %v1028_v0, 0.0  ;;  %v2212_v14 = vmax.f32 %v1221_v17, 0.0  ;;  %v1032_v32 = vadd.f32 %v1031_v58, %v9287_v20  ;;  %v1225_v1 = vadd.f32 %v1224_v59, %v9294_v60  ;;  %1505 = vmatprep.mubr.bf16.mxu0 %v8678_v11  ;;  %1698 = vmatprep.mubr.bf16.mxu1 %v8678_v11 }
 0x1d1   : > { %v2781_v2 = vadd.f32 %v2780_v21, %v2209_v18  ;;  %v2843_v40 = vadd.f32 %v2842_v22, %v2211_v31  ;;  %v1033_v56 = vpop.f32.mrf.mxu0  ;;  %v1226_v3 = vpop.f32.mrf.mxu1 }
 0x1d2   : > { %v2812_v8 = vadd.f32 %v2811_v13, %v2210_v12  ;;  %v2874_v29 = vadd.f32 %v2873_v62, %v2212_v14  ;;  %v2225_v30 = vmax.f32 %v1032_v32, 0.0  ;;  %v2227_v19 = vmax.f32 %v1225_v1, 0.0 }
 0x1d3   : > { %v1034_v61 = vadd.f32 %v1033_v56, %v9298_v16  ;;  %v1227_v36 = vadd.f32 %v1226_v3, %v9308_v26  ;;  %v1035_v37 = vpop.f32.mrf.mxu0  ;;  %v1228_v15 = vpop.f32.mrf.mxu1 }
 0x1d4   : > { %v2782_v25 = vadd.f32 %v2781_v2, %v2225_v30  ;;  %v2844_v23 = vadd.f32 %v2843_v40, %v2227_v19  ;;  %v1036_v24 = vadd.f32 %v1035_v37, %v9287_v20  ;;  %v1229_v0 = vadd.f32 %v1228_v15, %v9294_v60 }
 0x1d5   : > { %v2226_v21 = vmax.f32 %v1034_v61, 0.0  ;;  %v2228_v22 = vmax.f32 %v1227_v36, 0.0  ;;  %v1037_v17 = vpop.f32.mrf.mxu0  ;;  %v1230_v18 = vpop.f32.mrf.mxu1 }
 0x1d6   : > { %v2241_v13 = vmax.f32 %v1036_v24, 0.0  ;;  %v2243_v62 = vmax.f32 %v1229_v0, 0.0  ;;  %v1038_v31 = vadd.f32 %v1037_v17, %v9298_v16  ;;  %v1231_v58 = vadd.f32 %v1230_v18, %v9308_v26 }
 0x1d7   : > { %v2813_v59 = vadd.f32 %v2812_v8, %v2226_v21  ;;  %v2875_v12 = vadd.f32 %v2874_v29, %v2228_v22  ;;  %v1041_v14 = vpop.f32.mrf.mxu0  ;;  %v1234_v32 = vpop.f32.mrf.mxu1  ;;  %7285 = vmatmul.mubr.msk.bf16.gmra.mxu0 %vm480_vm2, %v8897_v52  ;;  %7301 = vmatmul.mubr.msk.bf16.gmra.mxu1 %vm480_vm2, %v8897_v52 }
 0x1d8   : > { %v2783_v1 = vadd.f32 %v2782_v25, %v2241_v13  ;;  %v2845_v2 = vadd.f32 %v2844_v23, %v2243_v62  ;;  %v2242_v40 = vmax.f32 %v1038_v31, 0.0  ;;  %v2244_v56 = vmax.f32 %v1231_v58, 0.0  ;;  %1515 = vmatprep.mubr.bf16.mxu0 %v8678_v11  ;;  %1708 = vmatprep.mubr.bf16.mxu1 %v8678_v11 }
 0x1d9   : > { %v1042_v3 = vadd.f32 %v1041_v14, %v9287_v20  ;;  %v1235_v8 = vadd.f32 %v1234_v32, %v9294_v60  ;;  %v1043_v29 = vpop.f32.mrf.mxu0  ;;  %v1236_v30 = vpop.f32.mrf.mxu1 }
 0x1da   : > { %v2814_v19 = vadd.f32 %v2813_v59, %v2242_v40  ;;  %v2876_v61 = vadd.f32 %v2875_v12, %v2244_v56  ;;  %v1044_v36 = vadd.f32 %v1043_v29, %v9298_v16  ;;  %v1237_v37 = vadd.f32 %v1236_v30, %v9308_v26 }
 0x1db   : > { %v2257_v15 = vmax.f32 %v1042_v3, 0.0  ;;  %v2259_v25 = vmax.f32 %v1235_v8, 0.0  ;;  %v1045_v23 = vpop.f32.mrf.mxu0  ;;  %v1238_v24 = vpop.f32.mrf.mxu1 }
 0x1dc   : > { %v2258_v0 = vmax.f32 %v1044_v36, 0.0  ;;  %v2260_v21 = vmax.f32 %v1237_v37, 0.0  ;;  %v1046_v22 = vadd.f32 %v1045_v23, %v9287_v20  ;;  %v1239_v17 = vadd.f32 %v1238_v24, %v9294_v60 }
 0x1dd   : > { %v2784_v18 = vadd.f32 %v2783_v1, %v2257_v15  ;;  %v2846_v13 = vadd.f32 %v2845_v2, %v2259_v25  ;;  %v1047_v62 = vpop.f32.mrf.mxu0  ;;  %v1240_v31 = vpop.f32.mrf.mxu1 }
 0x1de   : > { %v2815_v58 = vadd.f32 %v2814_v19, %v2258_v0  ;;  %v2877_v59 = vadd.f32 %v2876_v61, %v2260_v21  ;;  %v2273_v12 = vmax.f32 %v1046_v22, 0.0  ;;  %v2275_v14 = vmax.f32 %v1239_v17, 0.0 }
 0x1df   : > { %v1048_v32 = vadd.f32 %v1047_v62, %v9298_v16  ;;  %v1241_v40 = vadd.f32 %v1240_v31, %v9308_v26  ;;  %v1051_v56 = vpop.f32.mrf.mxu0  ;;  %v1244_v3 = vpop.f32.mrf.mxu1  ;;  %7286 = vmatmul.mubr.msk.bf16.gmra.mxu0 %vm480_vm2, %v8905_v53  ;;  %7302 = vmatmul.mubr.msk.bf16.gmra.mxu1 %vm480_vm2, %v8905_v53 }
 0x1e0   : > { %v2785_v1 = vadd.f32 %v2784_v18, %v2273_v12  ;;  %v2847_v2 = vadd.f32 %v2846_v13, %v2275_v14  ;;  %v1052_v8 = vadd.f32 %v1051_v56, %v9287_v20  ;;  %v1245_v29 = vadd.f32 %v1244_v3, %v9294_v60  ;;  %1525 = vmatprep.mubr.bf16.mxu0 %v8678_v11 }
 0x1e1   : > { %v2274_v30 = vmax.f32 %v1048_v32, 0.0  ;;  %v2276_v19 = vmax.f32 %v1241_v40, 0.0  ;;  %v1053_v61 = vpop.f32.mrf.mxu0  ;;  %v1246_v36 = vpop.f32.mrf.mxu1  ;;  %1718 = vmatprep.mubr.bf16.mxu1 %v8678_v11 }
 0x1e2   : > { %v2289_v37 = vmax.f32 %v1052_v8, 0.0  ;;  %v2291_v15 = vmax.f32 %v1245_v29, 0.0  ;;  %v1054_v25 = vadd.f32 %v1053_v61, %v9298_v16  ;;  %v1247_v23 = vadd.f32 %v1246_v36, %v9308_v26 }
 0x1e3   : > { %v2816_v24 = vadd.f32 %v2815_v58, %v2274_v30  ;;  %v2878_v0 = vadd.f32 %v2877_v59, %v2276_v19  ;;  %v1055_v21 = vpop.f32.mrf.mxu0  ;;  %v1248_v22 = vpop.f32.mrf.mxu1 }
 0x1e4   : > { %v2786_v17 = vadd.f32 %v2785_v1, %v2289_v37  ;;  %v2848_v18 = vadd.f32 %v2847_v2, %v2291_v15  ;;  %v2290_v13 = vmax.f32 %v1054_v25, 0.0  ;;  %v2292_v62 = vmax.f32 %v1247_v23, 0.0 }
 0x1e5   : > { %v1056_v31 = vadd.f32 %v1055_v21, %v9287_v20  ;;  %v1249_v12 = vadd.f32 %v1248_v22, %v9294_v60  ;;  %v1057_v14 = vpop.f32.mrf.mxu0  ;;  %v1250_v32 = vpop.f32.mrf.mxu1 }
 0x1e6   : > { %v2817_v40 = vadd.f32 %v2816_v24, %v2290_v13  ;;  %v2879_v56 = vadd.f32 %v2878_v0, %v2292_v62  ;;  %v1058_v3 = vadd.f32 %v1057_v14, %v9298_v16  ;;  %v1251_v8 = vadd.f32 %v1250_v32, %v9308_v26 }
 0x1e7   : > { %v2305_v58 = vmax.f32 %v1056_v31, 0.0  ;;  %v2307_v59 = vmax.f32 %v1249_v12, 0.0  ;;  %v1061_v29 = vpop.f32.mrf.mxu0  ;;  %v1254_v30 = vpop.f32.mrf.mxu1  ;;  %7287 = vmatmul.mubr.msk.bf16.gmra.mxu0 %vm480_vm2, %v8913_v54  ;;  %7303 = vmatmul.mubr.msk.bf16.gmra.mxu1 %vm480_vm2, %v8913_v54 }
 0x1e8   : > { %v2306_v1 = vmax.f32 %v1058_v3, 0.0  ;;  %v2308_v2 = vmax.f32 %v1251_v8, 0.0  ;;  %v1062_v19 = vadd.f32 %v1061_v29, %v9287_v20  ;;  %v1255_v61 = vadd.f32 %v1254_v30, %v9294_v60  ;;  %1535 = vmatprep.mubr.bf16.mxu0 %v8678_v11  ;;  %1728 = vmatprep.mubr.bf16.mxu1 %v8678_v11 }
 0x1e9   : > { %v2787_v36 = vadd.f32 %v2786_v17, %v2305_v58  ;;  %v2849_v37 = vadd.f32 %v2848_v18, %v2307_v59  ;;  %v1063_v15 = vpop.f32.mrf.mxu0  ;;  %v1256_v25 = vpop.f32.mrf.mxu1 }
 0x1ea   : > { %v2818_v23 = vadd.f32 %v2817_v40, %v2306_v1  ;;  %v2880_v24 = vadd.f32 %v2879_v56, %v2308_v2  ;;  %v2321_v0 = vmax.f32 %v1062_v19, 0.0  ;;  %v2323_v21 = vmax.f32 %v1255_v61, 0.0 }
 0x1eb   : > { %v1064_v22 = vadd.f32 %v1063_v15, %v9298_v16  ;;  %v1257_v13 = vadd.f32 %v1256_v25, %v9308_v26  ;;  %v1065_v62 = vpop.f32.mrf.mxu0  ;;  %v1258_v31 = vpop.f32.mrf.mxu1 }
 0x1ec   : > { %v2788_v12 = vadd.f32 %v2787_v36, %v2321_v0  ;;  %v2850_v14 = vadd.f32 %v2849_v37, %v2323_v21  ;;  %v1066_v32 = vadd.f32 %v1065_v62, %v9287_v20  ;;  %v1259_v3 = vadd.f32 %v1258_v31, %v9294_v60 }
 0x1ed   : > { %v2322_v17 = vmax.f32 %v1064_v22, 0.0  ;;  %v2324_v18 = vmax.f32 %v1257_v13, 0.0  ;;  %v1067_v8 = vpop.f32.mrf.mxu0  ;;  %v1260_v58 = vpop.f32.mrf.mxu1 }
 0x1ee   : > { %v2337_v40 = vmax.f32 %v1066_v32, 0.0  ;;  %v2339_v56 = vmax.f32 %v1259_v3, 0.0  ;;  %v1068_v59 = vadd.f32 %v1067_v8, %v9298_v16  ;;  %v1261_v29 = vadd.f32 %v1260_v58, %v9308_v26 }
 0x1ef   : > { %v2819_v30 = vadd.f32 %v2818_v23, %v2322_v17  ;;  %v2881_v1 = vadd.f32 %v2880_v24, %v2324_v18  ;;  %v1071_v2 = vpop.f32.mrf.mxu0  ;;  %v1264_v19 = vpop.f32.mrf.mxu1  ;;  %7288 = vmatmul.mubr.msk.bf16.gmra.mxu0 %vm480_vm2, %v8921_v55  ;;  %7304 = vmatmul.mubr.msk.bf16.gmra.mxu1 %vm480_vm2, %v8921_v55 }
 0x1f0   : > { %v2789_v61 = vadd.f32 %v2788_v12, %v2337_v40  ;;  %v2851_v36 = vadd.f32 %v2850_v14, %v2339_v56  ;;  %v2338_v37 = vmax.f32 %v1068_v59, 0.0  ;;  %v2340_v15 = vmax.f32 %v1261_v29, 0.0  ;;  %1771 = vmatprep.mubr.bf16.mxu0 %v8678_v11  ;;  %1964 = vmatprep.mubr.bf16.mxu1 %v8678_v11  ;;  %v7882_v29 = vld [vmem:[%s12086_s3 + $0xe0] ss:$16 sps:$4 sm:$0xff]  }
 0x1f1   : > { %v1072_v25 = vadd.f32 %v1071_v2, %v9287_v20  ;;  %v1265_v23 = vadd.f32 %v1264_v19, %v9294_v60  ;;  %v1073_v24 = vpop.f32.mrf.mxu0  ;;  %v1266_v0 = vpop.f32.mrf.mxu1 }
 0x1f2   : > { %v2820_v21 = vadd.f32 %v2819_v30, %v2338_v37  ;;  %v2882_v22 = vadd.f32 %v2881_v1, %v2340_v15  ;;  %v1074_v13 = vadd.f32 %v1073_v24, %v9298_v16  ;;  %v1267_v62 = vadd.f32 %v1266_v0, %v9308_v26  ;;  %v7885_v37 = vld [vmem:[%s12086_s3 + $0x2e0] ss:$16 sps:$4 sm:$0xff]   ;;  %v7890_v15 = vld [vmem:[%s12086_s3 + $0xc4] ss:$16 sps:$4 sm:$0xff]  }
 0x1f3   : > { %v2353_v31 = vmax.f32 %v1072_v25, 0.0  ;;  %v2355_v12 = vmax.f32 %v1265_v23, 0.0  ;;  %v1075_v14 = vpop.f32.mrf.mxu0  ;;  %v1268_v32 = vpop.f32.mrf.mxu1  ;;  %v7893_v24 = vld [vmem:[%s12086_s3 + $0x2c4] ss:$16 sps:$4 sm:$0xff]  }
 0x1f4   : > { %v2354_v3 = vmax.f32 %v1074_v13, 0.0  ;;  %v2356_v17 = vmax.f32 %v1267_v62, 0.0  ;;  %v1076_v18 = vadd.f32 %v1075_v14, %v9287_v20  ;;  %v1269_v8 = vadd.f32 %v1268_v32, %v9294_v60 }
 0x1f5   : > { %v2790_v58 = vadd.f32 %v2789_v61, %v2353_v31  ;;  %v2852_v40 = vadd.f32 %v2851_v36, %v2355_v12  ;;  %v1077_v56 = vpop.f32.mrf.mxu0  ;;  %v1270_v59 = vpop.f32.mrf.mxu1 }
 0x1f6   : > { %v2821_v30 = vadd.f32 %v2820_v21, %v2354_v3  ;;  %v2883_v1 = vadd.f32 %v2882_v22, %v2356_v17  ;;  %v2369_v2 = vmax.f32 %v1076_v18, 0.0  ;;  %v2371_v19 = vmax.f32 %v1269_v8, 0.0  ;;  %v7891_v8 = vld [vmem:[%s12086_s3 + $0x2c0] ss:$16 sps:$4 sm:$0xff]  }
 0x1f7   : > { %v1078_v61 = vadd.f32 %v1077_v56, %v9298_v16  ;;  %v1271_v36 = vadd.f32 %v1270_v59, %v9308_v26  ;;  %v1081_v25 = vpop.f32.mrf.mxu0  ;;  %v1274_v23 = vpop.f32.mrf.mxu1  ;;  %7305 = vmatmul.mubr.msk.bf16.vlgmr.msra.gmra.mxu0 %vm480_vm2, %v8785_v34  ;;  %7321 = vmatmul.mubr.msk.bf16.vlgmr.msra.gmra.mxu1 %vm480_vm2, %v8785_v34  ;;  %v7888_v34 = vld [vmem:[%s12086_s3 + $0xc0] ss:$16 sps:$4 sm:$0xff]  }
 0x1f8   : > { %v2791_v0 = vadd.f32 %v2790_v58, %v2369_v2  ;;  %v2853_v21 = vadd.f32 %v2852_v40, %v2371_v19  ;;  %v1082_v22 = vadd.f32 %v1081_v25, %v9287_v20  ;;  %v1275_v13 = vadd.f32 %v1274_v23, %v9294_v60  ;;  %1781 = vmatprep.mubr.bf16.mxu0 %v8678_v11 }
 0x1f9   : > { %v2370_v62 = vmax.f32 %v1078_v61, 0.0  ;;  %v2372_v31 = vmax.f32 %v1271_v36, 0.0  ;;  %v1083_v12 = vpop.f32.mrf.mxu0  ;;  %v1276_v14 = vpop.f32.mrf.mxu1  ;;  %1974 = vmatprep.mubr.bf16.mxu1 %v8678_v11  ;;  %6423 = vmatpush1.bf16.msra.mxu0 %v7882_v29 }
 0x1fa   : > { %v2385_v32 = vmax.f32 %v1082_v22, 0.0  ;;  %v2387_v3 = vmax.f32 %v1275_v13, 0.0  ;;  %v1084_v17 = vadd.f32 %v1083_v12, %v9298_v16  ;;  %v1277_v18 = vadd.f32 %v1276_v14, %v9308_v26  ;;  %6464 = vmatpush1.bf16.msra.mxu1 %v7885_v37  ;;  %6424 = vmatprep.subr.bf16.mxu0 %v7890_v15  ;;  %v7896_v15 = vld [vmem:[%s12086_s3 + $0xa4] ss:$16 sps:$4 sm:$0xff]   ;;  %v7894_v22 = vld [vmem:[%s12086_s3 + $0xa0] ss:$16 sps:$4 sm:$0xff]  }
 0x1fb   : > { %v2822_v58 = vadd.f32 %v2821_v30, %v2370_v62  ;;  %v2884_v40 = vadd.f32 %v2883_v1, %v2372_v31  ;;  %v1085_v56 = vpop.f32.mrf.mxu0  ;;  %v1278_v59 = vpop.f32.mrf.mxu1  ;;  %6465 = vmatprep.subr.bf16.mxu1 %v7893_v24  ;;  %v7899_v30 = vld [vmem:[%s12086_s3 + $0x2a4] ss:$16 sps:$4 sm:$0xff]   ;;  %v7897_v13 = vld [vmem:[%s12086_s3 + $0x2a0] ss:$16 sps:$4 sm:$0xff]  }
 0x1fc   : > { %v2792_v29 = vadd.f32 %v2791_v0, %v2385_v32  ;;  %v2854_v2 = vadd.f32 %v2853_v21, %v2387_v3  ;;  %v2386_v19 = vmax.f32 %v1084_v17, 0.0  ;;  %v2388_v61 = vmax.f32 %v1277_v18, 0.0  ;;  %v7905_v32 = vld [vmem:[%s12086_s3 + $0x284] ss:$16 sps:$4 sm:$0xff]  }
 0x1fd   : > { %v1086_v36 = vadd.f32 %v1085_v56, %v9287_v20  ;;  %v1279_v25 = vadd.f32 %v1278_v59, %v9294_v60  ;;  %v1087_v23 = vpop.f32.mrf.mxu0  ;;  %v1280_v37 = vpop.f32.mrf.mxu1  ;;  %6425 = vmatpush1.bf16.msra.mxu0 %v7888_v34  ;;  %v7902_v34 = vld [vmem:[%s12086_s3 + $0x84] ss:$16 sps:$4 sm:$0xff]  }
 0x1fe   : > { %v2823_v1 = vadd.f32 %v2822_v58, %v2386_v19  ;;  %v2885_v24 = vadd.f32 %v2884_v40, %v2388_v61  ;;  %v1088_v0 = vadd.f32 %v1087_v23, %v9298_v16  ;;  %v1281_v21 = vadd.f32 %v1280_v37, %v9308_v26  ;;  %6466 = vmatpush1.bf16.msra.mxu1 %v7891_v8  ;;  %v7903_v23 = vld [vmem:[%s12086_s3 + $0x280] ss:$16 sps:$4 sm:$0xff]  }
 0x1ff   : > { %v2401_v62 = vmax.f32 %v1086_v36, 0.0  ;;  %v2403_v31 = vmax.f32 %v1279_v25, 0.0  ;;  %v1091_v12 = vpop.f32.mrf.mxu0  ;;  %v1284_v14 = vpop.f32.mrf.mxu1  ;;  %7306 = vmatmul.mubr.msk.bf16.gmra.mxu0 %vm480_vm2, %v8809_v41  ;;  %7322 = vmatmul.mubr.msk.bf16.gmra.mxu1 %vm480_vm2, %v8809_v41  ;;  %v7900_v25 = vld [vmem:[%s12086_s3 + $0x80] ss:$16 sps:$4 sm:$0xff]  }
 0x200   : > { %v2402_v3 = vmax.f32 %v1088_v0, 0.0  ;;  %v2404_v17 = vmax.f32 %v1281_v21, 0.0  ;;  %v1092_v18 = vadd.f32 %v1091_v12, %v9287_v20  ;;  %v1285_v8 = vadd.f32 %v1284_v14, %v9294_v60  ;;  %1791 = vmatprep.mubr.bf16.mxu0 %v8678_v11  ;;  %1984 = vmatprep.mubr.bf16.mxu1 %v8678_v11  ;;  %v7911_v12 = vld [vmem:[%s12086_s3 + $0x264] ss:$16 sps:$4 sm:$0xff]  }
 0x201   : > { %v2793_v58 = vadd.f32 %v2792_v29, %v2401_v62  ;;  %v2855_v41 = vadd.f32 %v2854_v2, %v2403_v31  ;;  %v1093_v40 = vpop.f32.mrf.mxu0  ;;  %v1286_v56 = vpop.f32.mrf.mxu1  ;;  %6426 = vmatprep.subr.bf16.mxu0 %v7896_v15  ;;  %6467 = vmatprep.subr.bf16.mxu1 %v7899_v30  ;;  %v7908_v31 = vld [vmem:[%s12086_s3 + $0x64] ss:$16 sps:$4 sm:$0xff]  }
 0x202   : > { %v2824_v59 = vadd.f32 %v2823_v1, %v2402_v3  ;;  %v2886_v19 = vadd.f32 %v2885_v24, %v2404_v17  ;;  %v2417_v61 = vmax.f32 %v1092_v18, 0.0  ;;  %v2419_v36 = vmax.f32 %v1285_v8, 0.0  ;;  %6427 = vmatpush1.bf16.msra.mxu0 %v7894_v22  ;;  %6468 = vmatpush1.bf16.msra.mxu1 %v7897_v13  ;;  %v7906_v17 = vld [vmem:[%s12086_s3 + $0x60] ss:$16 sps:$4 sm:$0xff]  }
 0x203   : > { %v1094_v29 = vadd.f32 %v1093_v40, %v9298_v16  ;;  %v1287_v2 = vadd.f32 %v1286_v56, %v9308_v26  ;;  %v1095_v37 = vpop.f32.mrf.mxu0  ;;  %v1288_v15 = vpop.f32.mrf.mxu1  ;;  %6428 = vmatprep.subr.bf16.mxu0 %v7902_v34  ;;  %6469 = vmatprep.subr.bf16.mxu1 %v7905_v32  ;;  %v7909_v40 = vld [vmem:[%s12086_s3 + $0x260] ss:$16 sps:$4 sm:$0xff]   ;;  %v7914_v56 = vld [vmem:[%s12086_s3 + $0x44] ss:$16 sps:$4 sm:$0xff]  }
 0x204   : > { %v2794_v30 = vadd.f32 %v2793_v58, %v2417_v61  ;;  %v2856_v1 = vadd.f32 %v2855_v41, %v2419_v36  ;;  %v1096_v24 = vadd.f32 %v1095_v37, %v9287_v20  ;;  %v1289_v0 = vadd.f32 %v1288_v15, %v9294_v60 }
 0x205   : > { %v2418_v21 = vmax.f32 %v1094_v29, 0.0  ;;  %v2420_v22 = vmax.f32 %v1287_v2, 0.0  ;;  %v1097_v13 = vpop.f32.mrf.mxu0  ;;  %v1290_v62 = vpop.f32.mrf.mxu1 }
 0x206   : > { %v2433_v14 = vmax.f32 %v1096_v24, 0.0  ;;  %v2435_v34 = vmax.f32 %v1289_v0, 0.0  ;;  %v1098_v32 = vadd.f32 %v1097_v13, %v9298_v16  ;;  %v1291_v3 = vadd.f32 %v1290_v62, %v9308_v26  ;;  %6429 = vmatpush1.bf16.msra.mxu0 %v7900_v25  ;;  %6470 = vmatpush1.bf16.msra.mxu1 %v7903_v23  ;;  %v7912_v24 = vld [vmem:[%s12086_s3 + $0x40] ss:$16 sps:$4 sm:$0xff]  }
 0x207   : > { %v2825_v18 = vadd.f32 %v2824_v59, %v2418_v21  ;;  %v2887_v8 = vadd.f32 %v2886_v19, %v2420_v22  ;;  %v1101_v58 = vpop.f32.mrf.mxu0  ;;  %v1294_v41 = vpop.f32.mrf.mxu1  ;;  %7307 = vmatmul.mubr.msk.bf16.gmra.mxu0 %vm480_vm2, %v8817_v42  ;;  %7323 = vmatmul.mubr.msk.bf16.gmra.mxu1 %vm480_vm2, %v8817_v42  ;;  %v7917_v42 = vld [vmem:[%s12086_s3 + $0x244] ss:$16 sps:$4 sm:$0xff]  }
 0x208   : > { %v2795_v61 = vadd.f32 %v2794_v30, %v2433_v14  ;;  %v2857_v36 = vadd.f32 %v2856_v1, %v2435_v34  ;;  %v2434_v59 = vmax.f32 %v1098_v32, 0.0  ;;  %v2436_v19 = vmax.f32 %v1291_v3, 0.0  ;;  %1801 = vmatprep.mubr.bf16.mxu0 %v8678_v11  ;;  %1994 = vmatprep.mubr.bf16.mxu1 %v8678_v11 }
 0x209   : > { %v1102_v25 = vadd.f32 %v1101_v58, %v9287_v20  ;;  %v1295_v23 = vadd.f32 %v1294_v41, %v9294_v60  ;;  %v1103_v29 = vpop.f32.mrf.mxu0  ;;  %v1296_v2 = vpop.f32.mrf.mxu1  ;;  %6430 = vmatprep.subr.bf16.mxu0 %v7908_v31  ;;  %6471 = vmatprep.subr.bf16.mxu1 %v7911_v12 }
 0x20a   : > { %v2826_v37 = vadd.f32 %v2825_v18, %v2434_v59  ;;  %v2888_v15 = vadd.f32 %v2887_v8, %v2436_v19  ;;  %v1104_v30 = vadd.f32 %v1103_v29, %v9298_v16  ;;  %v1297_v1 = vadd.f32 %v1296_v2, %v9308_v26  ;;  %6431 = vmatpush1.bf16.msra.mxu0 %v7906_v17  ;;  %v7915_v18 = vld [vmem:[%s12086_s3 + $0x240] ss:$16 sps:$4 sm:$0xff]  }
 0x20b   : > { %v2449_v0 = vmax.f32 %v1102_v25, 0.0  ;;  %v2451_v21 = vmax.f32 %v1295_v23, 0.0  ;;  %v1105_v22 = vpop.f32.mrf.mxu0  ;;  %v1298_v13 = vpop.f32.mrf.mxu1  ;;  %6472 = vmatpush1.bf16.msra.mxu1 %v7909_v40  ;;  %6432 = vmatprep.subr.bf16.mxu0 %v7914_v56  ;;  %v7920_v56 = vld [vmem:[%s12086_s3 + $0x24] ss:$16 sps:$4 sm:$0xff]   ;;  %v7918_v25 = vld [vmem:[%s12086_s3 + $0x20] ss:$16 sps:$4 sm:$0xff]  }
 0x20c   : > { %v2450_v62 = vmax.f32 %v1104_v30, 0.0  ;;  %v2452_v31 = vmax.f32 %v1297_v1, 0.0  ;;  %v1106_v12 = vadd.f32 %v1105_v22, %v9287_v20  ;;  %v1299_v14 = vadd.f32 %v1298_v13, %v9294_v60  ;;  %6473 = vmatprep.subr.bf16.mxu1 %v7917_v42 }
 0x20d   : > { %v2796_v34 = vadd.f32 %v2795_v61, %v2449_v0  ;;  %v2858_v32 = vadd.f32 %v2857_v36, %v2451_v21  ;;  %v1107_v3 = vpop.f32.mrf.mxu0  ;;  %v1300_v17 = vpop.f32.mrf.mxu1  ;;  %v7923_v61 = vld [vmem:[%s12086_s3 + $0x224] ss:$16 sps:$4 sm:$0xff]   ;;  %v7921_v0 = vld [vmem:[%s12086_s3 + $0x220] ss:$16 sps:$4 sm:$0xff]  }
 0x20e   : > { %v2827_v8 = vadd.f32 %v2826_v37, %v2450_v62  ;;  %v2889_v58 = vadd.f32 %v2888_v15, %v2452_v31  ;;  %v2465_v41 = vmax.f32 %v1106_v12, 0.0  ;;  %v2467_v40 = vmax.f32 %v1299_v14, 0.0  ;;  %6433 = vmatpush1.bf16.msra.mxu0 %v7912_v24  ;;  %v7926_v15 = vld [vmem:[%s12086_s3 + $0x4] ss:$16 sps:$4 sm:$0xff]  }
 0x20f   : > { %v1108_v36 = vadd.f32 %v1107_v3, %v9298_v16  ;;  %v1301_v59 = vadd.f32 %v1300_v17, %v9308_v26  ;;  %v1111_v19 = vpop.f32.mrf.mxu0  ;;  %v1304_v42 = vpop.f32.mrf.mxu1  ;;  %7308 = vmatmul.mubr.msk.bf16.gmra.mxu0 %vm480_vm2, %v8825_v43  ;;  %7324 = vmatmul.mubr.msk.bf16.gmra.mxu1 %vm480_vm2, %v8825_v43  ;;  %v7929_v62 = vld [vmem:[%s12086_s3 + $0x204] ss:$16 sps:$4 sm:$0xff]  }
 0x210   : > { %v2797_v23 = vadd.f32 %v2796_v34, %v2465_v41  ;;  %v2859_v29 = vadd.f32 %v2858_v32, %v2467_v40  ;;  %v1112_v2 = vadd.f32 %v1111_v19, %v9287_v20  ;;  %v1305_v37 = vadd.f32 %v1304_v42, %v9294_v60  ;;  %1811 = vmatprep.mubr.bf16.mxu0 %v8678_v11 }
 0x211   : > { %v2466_v30 = vmax.f32 %v1108_v36, 0.0  ;;  %v2468_v1 = vmax.f32 %v1301_v59, 0.0  ;;  %v9553_v24 = vpop.f32.mrf.mxu0  ;;  %v1306_v43 = vpop.f32.mrf.mxu1  ;;  %2004 = vmatprep.mubr.bf16.mxu1 %v8678_v11  ;;  %6474 = vmatpush1.bf16.msra.mxu1 %v7915_v18  ;;  %v7932_v36 = vld [vmem:[%s12086_s3 + $0x1e4] ss:$16 sps:$4 sm:$0xff]  }
 0x212   : > { %v2481_v21 = vmax.f32 %v1112_v2, 0.0  ;;  %v2483_v22 = vmax.f32 %v1305_v37, 0.0  ;;  %v1307_v13 = vadd.f32 %v1306_v43, %v9308_v26  ;;  %6434 = vmatprep.subr.bf16.mxu0 %v7920_v56  ;;  %6475 = vmatprep.subr.bf16.mxu1 %v7923_v61  ;;  %v7935_v59 = vld [vmem:[%s12086_s3 + $0x3e4] ss:$16 sps:$4 sm:$0xff]   ;;  %v7933_v43 = vld [vmem:[%s12086_s3 + $0x3e0] ss:$16 sps:$4 sm:$0xff]  }
 0x213   : > { %v9563_v31 = vadd.f32 %v2827_v8, %v2466_v30  ;;  %v2890_v12 = vadd.f32 %v2889_v58, %v2468_v1  ;;  %v1115_v14 = vpop.f32.mrf.mxu0  ;;  %v1308_v34 = vpop.f32.mrf.mxu1  ;;  %6435 = vmatpush1.bf16.msra.mxu0 %v7918_v25  ;;  %v7924_v8 = vld [vmem:[%s12086_s3] ss:$16 sps:$4 sm:$0xff]  }
 0x214   : > { %v2798_v32 = vadd.f32 %v2797_v23, %v2481_v21  ;;  %v2860_v3 = vadd.f32 %v2859_v29, %v2483_v22  ;;  %v2484_v17 = vmax.f32 %v1307_v13, 0.0  ;;  %6436 = vmatprep.subr.bf16.mxu0 %v7926_v15  ;;  %v1116_v18 = vadd.f32 %v1115_v14, %v9287_v20  ;;  %v7927_v58 = vld [vmem:[%s12086_s3 + $0x200] ss:$16 sps:$4 sm:$0xff]   ;;  %v7938_v22 = vld [vmem:[%s12086_s3 + $0x1c4] ss:$16 sps:$4 sm:$0xff]  }
 0x215   : > { %v1309_v41 = vadd.f32 %v1308_v34, %v9294_v60  ;;  %v9567_v40 = vpop.f32.mrf.mxu0  ;;  %v9569_v56 = vpop.f32.mrf.mxu1  ;;  %6476 = vmatpush1.bf16.msra.mxu1 %v7921_v0  ;;  %v7941_v13 = vld [vmem:[%s12086_s3 + $0x3c4] ss:$16 sps:$4 sm:$0xff]  }
 0x216   : > { %v9577_v61 = vadd.f32 %v2890_v12, %v2484_v17  ;;  %6477 = vmatprep.subr.bf16.mxu1 %v7929_v62  ;;  %v2497_v19 = vmax.f32 %v1116_v18, 0.0 }
 0x217   : > { %v2499_v42 = vmax.f32 %v1309_v41, 0.0  ;;  %v1121_v25 = vpop.f32.mrf.mxu0  ;;  %v1314_v23 = vpop.f32.mrf.mxu1  ;;  %7309 = vmatmul.mubr.msk.bf16.gmra.mxu0 %vm480_vm2, %v8833_v44  ;;  %7325 = vmatmul.mubr.msk.bf16.gmra.mxu1 %vm480_vm2, %v8833_v44  ;;  %v7930_v44 = vld [vmem:[%s12086_s3 + $0x1e0] ss:$16 sps:$4 sm:$0xff]  }
 0x218   : > { %v1122_v29 = vadd.f32 %v1121_v25, %v9287_v20  ;;  %v1315_v2 = vadd.f32 %v1314_v23, %v9294_v60  ;;  %1821 = vmatprep.mubr.bf16.mxu0 %v8678_v11  ;;  %2014 = vmatprep.mubr.bf16.mxu1 %v8678_v11  ;;  %v2799_v37 = vadd.f32 %v2798_v32, %v2497_v19  ;;  %v7936_v41 = vld [vmem:[%s12086_s3 + $0x1c0] ss:$16 sps:$4 sm:$0xff]   ;;  %v7947_v25 = vld [vmem:[%s12086_s3 + $0x3a4] ss:$16 sps:$4 sm:$0xff]  }
 0x219   : > { %v2861_v15 = vadd.f32 %v2860_v3, %v2499_v42  ;;  %v9593_v30 = vpop.f32.mrf.mxu0  ;;  %v9595_v1 = vpop.f32.mrf.mxu1  ;;  %6437 = vmatpush1.bf16.msra.mxu0 %v7924_v8  ;;  %6478 = vmatpush1.bf16.msra.mxu1 %v7927_v58  ;;  %v7939_v8 = vld [vmem:[%s12086_s3 + $0x3c0] ss:$16 sps:$4 sm:$0xff]  }
 0x21a   : > { %v2513_v0 = vmax.f32 %v1122_v29, 0.0  ;;  %v2515_v21 = vmax.f32 %v1315_v2, 0.0  ;;  %6438 = vmatprep.subr.bf16.mxu0 %v7932_v36  ;;  %6479 = vmatprep.subr.bf16.mxu1 %v7935_v59  ;;  %v7944_v59 = vld [vmem:[%s12086_s3 + $0x1a4] ss:$16 sps:$4 sm:$0xff]  }
 0x21b   : > { %v1125_v62 = vpop.f32.mrf.mxu0  ;;  %v1318_v12 = vpop.f32.mrf.mxu1 }
 0x21c   : > { %v2800_v14 = vadd.f32 %v2799_v37, %v2513_v0  ;;  %v2862_v34 = vadd.f32 %v2861_v15, %v2515_v21  ;;  %v1126_v32 = vadd.f32 %v1125_v62, %v9287_v20  ;;  %v1319_v3 = vadd.f32 %v1318_v12, %v9294_v60  ;;  %v7950_v0 = vld [vmem:[%s12086_s3 + $0x184] ss:$16 sps:$4 sm:$0xff]  }
 0x21d   : > { %v9611_v17 = vpop.f32.mrf.mxu0  ;;  %v9613_v18 = vpop.f32.mrf.mxu1  ;;  %6439 = vmatpush2.bf16.msra.mxu0 %v7930_v44  ;;  %6480 = vmatpush2.bf16.msra.mxu1 %v7933_v43  ;;  %v7945_v43 = vld [vmem:[%s12086_s3 + $0x3a0] ss:$16 sps:$4 sm:$0xff]   ;;  %v7953_v21 = vld [vmem:[%s12086_s3 + $0x384] ss:$16 sps:$4 sm:$0xff]  }
 0x21e   : > { %v2529_v58 = vmax.f32 %v1126_v32, 0.0  ;;  %v2531_v36 = vmax.f32 %v1319_v3, 0.0  ;;  %6440 = vmatprep.subr.bf16.mxu0 %v7938_v22  ;;  %6481 = vmatprep.subr.bf16.mxu1 %v7941_v13 }
 0x21f   : > { %v1131_v19 = vpop.f32.mrf.mxu0  ;;  %v1324_v42 = vpop.f32.mrf.mxu1  ;;  %7310 = vmatmul.mubr.msk.bf16.gmra.mxu0 %vm480_vm2, %v8841_v45  ;;  %7326 = vmatmul.mubr.msk.bf16.gmra.mxu1 %vm480_vm2, %v8841_v45  ;;  %v7942_v45 = vld [vmem:[%s12086_s3 + $0x1a0] ss:$16 sps:$4 sm:$0xff]  }
 0x220   : > { %v2801_v23 = vadd.f32 %v2800_v14, %v2529_v58  ;;  %v2863_v29 = vadd.f32 %v2862_v34, %v2531_v36  ;;  %1831 = vmatprep.mubr.bf16.mxu0 %v8678_v11  ;;  %2024 = vmatprep.mubr.bf16.mxu1 %v8678_v11  ;;  %v1132_v2 = vadd.f32 %v1131_v19, %v9287_v20  ;;  %v7948_v58 = vld [vmem:[%s12086_s3 + $0x180] ss:$16 sps:$4 sm:$0xff]  }
 0x221   : > { %v1325_v37 = vadd.f32 %v1324_v42, %v9294_v60  ;;  %v9635_v15 = vpop.f32.mrf.mxu0  ;;  %v9637_v44 = vpop.f32.mrf.mxu1  ;;  %6441 = vmatpush2.bf16.msra.mxu0 %v7936_v41  ;;  %6482 = vmatpush2.bf16.msra.mxu1 %v7939_v8  ;;  %v7951_v19 = vld [vmem:[%s12086_s3 + $0x380] ss:$16 sps:$4 sm:$0xff]   ;;  %v7956_v42 = vld [vmem:[%s12086_s3 + $0x164] ss:$16 sps:$4 sm:$0xff]  }
 0x222   : > { %6442 = vmatprep.subr.bf16.mxu0 %v7944_v59  ;;  %v2545_v22 = vmax.f32 %v1132_v2, 0.0  ;;  %6483 = vmatprep.subr.bf16.mxu1 %v7947_v25 }
 0x223   : > { %v2547_v13 = vmax.f32 %v1325_v37, 0.0  ;;  %v1135_v62 = vpop.f32.mrf.mxu0  ;;  %v1328_v12 = vpop.f32.mrf.mxu1 }
 0x224   : > { %v1136_v14 = vadd.f32 %v1135_v62, %v9287_v20  ;;  %v1329_v34 = vadd.f32 %v1328_v12, %v9294_v60  ;;  %v2802_v32 = vadd.f32 %v2801_v23, %v2545_v22  ;;  %v7957_v62 = vld [vmem:[%s12086_s3 + $0x360] ss:$16 sps:$4 sm:$0xff]  }
 0x225   : > { %v2864_v3 = vadd.f32 %v2863_v29, %v2547_v13  ;;  %v9653_v41 = vpop.f32.mrf.mxu0  ;;  %v9655_v8 = vpop.f32.mrf.mxu1  ;;  %6443 = vmatpush2.bf16.msra.mxu0 %v7942_v45  ;;  %6484 = vmatpush2.bf16.msra.mxu1 %v7945_v43  ;;  %v7959_v29 = vld [vmem:[%s12086_s3 + $0x364] ss:$16 sps:$4 sm:$0xff]  }
 0x226   : > { %v2561_v36 = vmax.f32 %v1136_v14, 0.0  ;;  %v2563_v59 = vmax.f32 %v1329_v34, 0.0  ;;  %6444 = vmatprep.subr.bf16.mxu0 %v7950_v0  ;;  %6485 = vmatprep.subr.bf16.mxu1 %v7953_v21 }
 0x227   : > { %v1141_v25 = vpop.f32.mrf.mxu0  ;;  %v1334_v23 = vpop.f32.mrf.mxu1  ;;  %7311 = vmatmul.mubr.msk.bf16.gmra.mxu0 %vm480_vm2, %v8849_v46  ;;  %7327 = vmatmul.mubr.msk.bf16.gmra.mxu1 %vm480_vm2, %v8849_v46  ;;  %v7954_v46 = vld [vmem:[%s12086_s3 + $0x160] ss:$16 sps:$4 sm:$0xff]  }
 0x228   : > { %v2803_v2 = vadd.f32 %v2802_v32, %v2561_v36  ;;  %v2865_v37 = vadd.f32 %v2864_v3, %v2563_v59  ;;  %v1142_v45 = vadd.f32 %v1141_v25, %v9287_v20  ;;  %v1335_v43 = vadd.f32 %v1334_v23, %v9294_v60  ;;  %1841 = vmatprep.mubr.bf16.mxu0 %v8678_v11  ;;  %v7965_v25 = vld [vmem:[%s12086_s3 + $0x344] ss:$16 sps:$4 sm:$0xff]   ;;  %v7960_v23 = vld [vmem:[%s12086_s3 + $0x140] ss:$16 sps:$4 sm:$0xff]  }
 0x229   : > { %v9676_v0 = vpop.f32.mrf.mxu0  ;;  %v9678_v21 = vpop.f32.mrf.mxu1  ;;  %2034 = vmatprep.mubr.bf16.mxu1 %v8678_v11  ;;  %6445 = vmatpush2.bf16.msra.mxu0 %v7948_v58  ;;  %v1114_v3 = vadd.f32 %v9553_v24, %v9298_v16  ;;  %v9704_v24 = vld [vmem:[%s12085_s2 + $0x8] sm:$0xff] }
 0x22a   : > { %v2577_v22 = vmax.f32 %v1142_v45, 0.0  ;;  %v2579_v13 = vmax.f32 %v1335_v43, 0.0  ;;  %6486 = vmatpush2.bf16.msra.mxu1 %v7951_v19  ;;  %6446 = vmatprep.subr.bf16.mxu0 %v7956_v42  ;;  %v7962_v42 = vld [vmem:[%s12086_s3 + $0x144] ss:$16 sps:$4 sm:$0xff]  }
 0x22b   : > { %v1145_v12 = vpop.f32.mrf.mxu0  ;;  %v1338_v14 = vpop.f32.mrf.mxu1  ;;  %6487 = vmatprep.subr.bf16.mxu1 %v7959_v29  ;;  %v7963_v29 = vld [vmem:[%s12086_s3 + $0x340] ss:$16 sps:$4 sm:$0xff]  }
 0x22c   : > { %v2804_v34 = vadd.f32 %v2803_v2, %v2577_v22  ;;  %v2866_v32 = vadd.f32 %v2865_v37, %v2579_v13  ;;  %v1146_v58 = vadd.f32 %v1145_v12, %v9287_v20  ;;  %v1339_v36 = vadd.f32 %v1338_v14, %v9294_v60  ;;  %v7968_v13 = vld [vmem:[%s12086_s3 + $0x124] ss:$16 sps:$4 sm:$0xff]  }
 0x22d   : > { %v9691_v59 = vpop.f32.mrf.mxu0  ;;  %v9693_v19 = vpop.f32.mrf.mxu1  ;;  %6447 = vmatpush2.bf16.msra.mxu0 %v7954_v46  ;;  %v1118_v2 = vadd.f32 %v9567_v40, %v9298_v16  ;;  %v1311_v37 = vadd.f32 %v9569_v56, %v9308_v26  ;;  %v7971_v40 = vld [vmem:[%s12086_s3 + $0x324] ss:$16 sps:$4 sm:$0xff]   ;;  %v9728_v56 = vadd.f32 %v9593_v30, %v9298_v16  ;;  %v1317_v14 = vadd.f32 %v9595_v1, %v9308_v26  ;;  %v7966_v1 = vld [vmem:[%s12086_s3 + $0x120] ss:$16 sps:$4 sm:$0xff]  }
 0x22e   : > { %6488 = vmatpush2.bf16.msra.mxu1 %v7957_v62  ;;  %v2593_v45 = vmax.f32 %v1146_v58, 0.0  ;;  %v2595_v43 = vmax.f32 %v1339_v36, 0.0  ;;  %6448 = vmatprep.subr.bf16.mxu0 %v7962_v42 }
 0x22f   : > { %v1151_v46 = vpop.f32.mrf.mxu0  ;;  %v1344_v22 = vpop.f32.mrf.mxu1  ;;  %7312 = vmatmul.mubr.msk.bf16.gmra.mxu0 %vm480_vm2, %v8857_v47  ;;  %7328 = vmatmul.mubr.msk.bf16.gmra.mxu1 %vm480_vm2, %v8857_v47  ;;  %v2482_v47 = vmax.f32 %v1114_v3, 0.0  ;;  %v9746_v3 = vrot.slane %v9704_v24, %v9022_v7  ;;  %v2500_v42 = vmax.f32 %v1311_v37, 0.0  ;;  %v2516_v37 = vmax.f32 %v1317_v14, 0.0 }
 0x230   : > { %v1152_v62 = vadd.f32 %v1151_v46, %v9287_v20  ;;  %v1345_v12 = vadd.f32 %v1344_v22, %v9294_v60  ;;  %1851 = vmatprep.mubr.bf16.mxu0 %v8678_v11  ;;  %2044 = vmatprep.mubr.bf16.mxu1 %v8678_v11  ;;  %v2805_v58 = vadd.f32 %v2804_v34, %v2593_v45  ;;  %v7969_v34 = vld [vmem:[%s12086_s3 + $0x320] ss:$16 sps:$4 sm:$0xff]  }
 0x231   : > { %v2867_v36 = vadd.f32 %v2866_v32, %v2595_v43  ;;  %v9736_v4 = vpop.f32.mrf.mxu0  ;;  %v9738_v57 = vpop.f32.mrf.mxu1  ;;  %6489 = vmatprep.subr.bf16.mxu1 %v7965_v25  ;;  %v9742_v22 = vrot.slane %v9704_v24, %v9019_v6  ;;  %6449 = vmatpush2.bf16.msra.mxu0 %v7960_v23  ;;  %v2498_v32 = vmax.f32 %v1118_v2, 0.0  ;;  %v1128_v25 = vadd.f32 %v9611_v17, %v9298_v16 }
 0x232   : > { %v2609_v30 = vmax.f32 %v1152_v62, 0.0  ;;  %v2611_v46 = vmax.f32 %v1345_v12, 0.0  ;;  %6490 = vmatpush2.bf16.msra.mxu1 %v7963_v29  ;;  %v1321_v45 = vadd.f32 %v9613_v18, %v9308_v26  ;;  %6450 = vmatprep.subr.bf16.mxu0 %v7968_v13  ;;  %v2829_v38 = vadd.f32 %v9563_v31, %v2482_v47  ;;  %v7974_v13 = vld [vmem:[%s12086_s3 + $0x104] ss:$16 sps:$4 sm:$0xff]   ;;  %v7975_v47 = vld [vmem:[%s12086_s3 + $0x300] ss:$16 sps:$4 sm:$0xff]  }
 0x233   : > { %v1155_v43 = vpop.f32.mrf.mxu0  ;;  %v1348_v62 = vpop.f32.mrf.mxu1  ;;  %6491 = vmatprep.subr.bf16.mxu1 %v7971_v40  ;;  %v2514_v2 = vmax.f32 %v9728_v56, 0.0  ;;  %v1134_v17 = vadd.f32 %v9635_v15, %v9298_v16  ;;  %v9778_v15 = vrot.slane %v9704_v24, %v9028_v9  ;;  %v7972_v56 = vld [vmem:[%s12086_s3 + $0x100] ss:$16 sps:$4 sm:$0xff]  }
 0x234   : > { %v2806_v23 = vadd.f32 %v2805_v58, %v2609_v30  ;;  %v2868_v29 = vadd.f32 %v2867_v36, %v2611_v46  ;;  %v1156_v12 = vadd.f32 %v1155_v43, %v9287_v20  ;;  %v1349_v39 = vadd.f32 %v1348_v62, %v9294_v60  ;;  %v7977_v20 = vld [vmem:[%s12086_s3 + $0x304] ss:$16 sps:$4 sm:$0xff]  }
 0x235   : > { %v9764_v63 = vpop.f32.mrf.mxu0  ;;  %v9766_v18 = vpop.f32.mrf.mxu1  ;;  %v1327_v60 = vadd.f32 %v9637_v44, %v9308_v26  ;;  %6451 = vmatpush2.bf16.msra.mxu0 %v7966_v1  ;;  %v2830_v14 = vadd.f32 %v2829_v38, %v2498_v32  ;;  %v2892_v58 = vadd.f32 %v9577_v61, %v2500_v42  ;;  %v2530_v44 = vmax.f32 %v1128_v25, 0.0  ;;  %v7980_v46 = vld [vmem:[%s12086_s3 + $0x4e4] ss:$16 sps:$4 sm:$0xff]  }
 0x236   : > { %v2625_v31 = vmax.f32 %v1156_v12, 0.0  ;;  %v2627_v40 = vmax.f32 %v1349_v39, 0.0  ;;  %6492 = vmatpush2.bf16.msra.mxu1 %v7969_v34  ;;  %v2532_v36 = vmax.f32 %v1321_v45, 0.0  ;;  %v7983_v38 = vld [vmem:[%s12086_s3 + $0x6e4] ss:$16 sps:$4 sm:$0xff]   ;;  %v9803_v34 = vrot.slane %v9704_v24, %v9031_v10  ;;  %6452 = vmatprep.subr.bf16.mxu0 %v7974_v13 }
 0x237   : > { %v1387_v39 = vpop.f32.mrf.mxu0  ;;  %v1580_v30 = vpop.f32.mrf.mxu1  ;;  %7313 = vmatmul.mubr.msk.bf16.gmra.mxu0 %vm480_vm2, %v8865_v48  ;;  %7329 = vmatmul.mubr.msk.bf16.gmra.mxu1 %vm480_vm2, %v8865_v48  ;;  %v2831_v48 = vadd.f32 %v2830_v14, %v2514_v2  ;;  %v2893_v32 = vadd.f32 %v2892_v58, %v2516_v37  ;;  %v2546_v42 = vmax.f32 %v1134_v17, 0.0  ;;  %v2548_v43 = vmax.f32 %v1327_v60, 0.0 }
 0x238   : > { %v9797_v1 = vadd.f32 %v2806_v23, %v2625_v31  ;;  %v9799_v61 = vadd.f32 %v2868_v29, %v2627_v40  ;;  %1861 = vmatprep.mubr.bf16.mxu0 %v8678_v11  ;;  %2054 = vmatprep.mubr.bf16.mxu1 %v8678_v11  ;;  %v1388_v62 = vadd.f32 %v1387_v39, %v9742_v22 }
 0x239   : > { %v1389_v25 = vpop.f32.mrf.mxu0  ;;  %v1582_v45 = vpop.f32.mrf.mxu1  ;;  %6493 = vmatprep.subr.bf16.mxu1 %v7977_v20  ;;  %v1581_v23 = vadd.f32 %v1580_v30, %v9746_v3  ;;  %6453 = vmatpush2.bf16.msra.mxu0 %v7972_v56  ;;  %v2832_v24 = vadd.f32 %v2831_v48, %v2530_v44  ;;  %v2894_v29 = vadd.f32 %v2893_v32, %v2532_v36 }
 0x23a   : > { %6494 = vmatpush2.bf16.msra.mxu1 %v7975_v47  ;;  %6504 = vmatprep.subr.bf16.mxu0 %v7980_v46  ;;  %v1138_v2 = vadd.f32 %v9653_v41, %v9298_v16  ;;  %v1331_v37 = vadd.f32 %v9655_v8, %v9308_v26  ;;  %v1390_v17 = vadd.f32 %v1389_v25, %v9778_v15  ;;  %v2133_v44 = vmax.f32 %v1388_v62, 0.0 }
 0x23b   : > { %v1391_v12 = vpop.f32.mrf.mxu0  ;;  %v1584_v31 = vpop.f32.mrf.mxu1  ;;  %6545 = vmatprep.subr.bf16.mxu1 %v7983_v38  ;;  %v1583_v13 = vadd.f32 %v1582_v45, %v9803_v34  ;;  %v2833_v20 = vadd.f32 %v2832_v24, %v2546_v42  ;;  %v2895_v14 = vadd.f32 %v2894_v29, %v2548_v43  ;;  %v1144_v58 = vadd.f32 %v9676_v0, %v9298_v16 }
 0x23c   : > { %v1392_v60 = vadd.f32 %v1391_v12, %v9742_v22  ;;  %v1585_v40 = vadd.f32 %v1584_v31, %v9746_v3  ;;  %v2135_v41 = vmax.f32 %v1581_v23, 0.0  ;;  %v2562_v48 = vmax.f32 %v1138_v2, 0.0 }
 0x23d   : > { %v1393_v56 = vpop.f32.mrf.mxu0  ;;  %v1586_v47 = vpop.f32.mrf.mxu1  ;;  %v2564_v32 = vmax.f32 %v1331_v37, 0.0  ;;  %v2134_v42 = vmax.f32 %v1390_v17, 0.0  ;;  %v2136_v0 = vmax.f32 %v1583_v13, 0.0  ;;  %v2578_v29 = vmax.f32 %v1144_v58, 0.0 }
 0x23e   : > { %v2149_v36 = vmax.f32 %v1392_v60, 0.0  ;;  %v2151_v39 = vmax.f32 %v1585_v40, 0.0  ;;  %v1394_v8 = vadd.f32 %v1393_v56, %v9778_v15  ;;  %v1587_v30 = vadd.f32 %v1586_v47, %v9803_v34 }
 0x23f   : > { %v1397_v46 = vpop.f32.mrf.mxu0  ;;  %v1590_v38 = vpop.f32.mrf.mxu1  ;;  %7314 = vmatmul.mubr.msk.bf16.gmra.mxu0 %vm480_vm2, %v8873_v49  ;;  %7330 = vmatmul.mubr.msk.bf16.gmra.mxu1 %vm480_vm2, %v8873_v49  ;;  %v9829_v12 = vadd.f32 %v9678_v21, %v9308_v26  ;;  %v2834_v56 = vadd.f32 %v2833_v20, %v2562_v48  ;;  %v9835_v47 = vadd.f32 %v2895_v14, %v2564_v32 }
 0x240   : > { %1871 = vmatprep.mubr.bf16.mxu0 %v8678_v11  ;;  %2064 = vmatprep.mubr.bf16.mxu1 %v8678_v11  ;;  %v2901_v25 = vadd.f32 %v2149_v36, %v2133_v44  ;;  %v2963_v45 = vadd.f32 %v2151_v39, %v2135_v41  ;;  %v2150_v43 = vmax.f32 %v1394_v8, 0.0  ;;  %v2152_v62 = vmax.f32 %v1587_v30, 0.0 }
 0x241   : > { %v1399_v23 = vpop.f32.mrf.mxu0  ;;  %v1592_v24 = vpop.f32.mrf.mxu1  ;;  %v1398_v49 = vadd.f32 %v1397_v46, %v9742_v22  ;;  %v1591_v31 = vadd.f32 %v1590_v38, %v9746_v3  ;;  %v9839_v46 = vadd.f32 %v2834_v56, %v2578_v29  ;;  %v2580_v38 = vmax.f32 %v9829_v12, 0.0 }
 0x242   : > { %v2932_v2 = vadd.f32 %v2150_v43, %v2134_v42  ;;  %v2994_v37 = vadd.f32 %v2152_v62, %v2136_v0  ;;  %v1400_v17 = vadd.f32 %v1399_v23, %v9778_v15  ;;  %v1593_v13 = vadd.f32 %v1592_v24, %v9803_v34 }
 0x243   : > { %v1401_v60 = vpop.f32.mrf.mxu0  ;;  %v1594_v40 = vpop.f32.mrf.mxu1  ;;  %v2165_v58 = vmax.f32 %v1398_v49, 0.0  ;;  %v2167_v44 = vmax.f32 %v1591_v31, 0.0  ;;  %v1148_v23 = vadd.f32 %v9691_v59, %v9298_v16  ;;  %v1341_v24 = vadd.f32 %v9693_v19, %v9308_v26 }
 0x244   : > { %v2166_v41 = vmax.f32 %v1400_v17, 0.0  ;;  %v2168_v21 = vmax.f32 %v1593_v13, 0.0  ;;  %v1402_v36 = vadd.f32 %v1401_v60, %v9742_v22  ;;  %v1595_v39 = vadd.f32 %v1594_v40, %v9746_v3 }
 0x245   : > { %v1403_v8 = vpop.f32.mrf.mxu0  ;;  %v1596_v30 = vpop.f32.mrf.mxu1  ;;  %v2902_v42 = vadd.f32 %v2901_v25, %v2165_v58  ;;  %v2964_v0 = vadd.f32 %v2963_v45, %v2167_v44  ;;  %v1154_v13 = vadd.f32 %v9736_v4, %v9298_v16  ;;  %v1347_v60 = vadd.f32 %v9738_v57, %v9308_v26 }
 0x246   : > { %v2933_v43 = vadd.f32 %v2932_v2, %v2166_v41  ;;  %v2995_v20 = vadd.f32 %v2994_v37, %v2168_v21  ;;  %v2181_v14 = vmax.f32 %v1402_v36, 0.0  ;;  %v2183_v48 = vmax.f32 %v1595_v39, 0.0 }
 0x247   : > { %v1407_v32 = vpop.f32.mrf.mxu0  ;;  %v1600_v62 = vpop.f32.mrf.mxu1  ;;  %7315 = vmatmul.mubr.msk.bf16.gmra.mxu0 %vm480_vm2, %v8881_v50  ;;  %7331 = vmatmul.mubr.msk.bf16.gmra.mxu1 %vm480_vm2, %v8881_v50  ;;  %v1404_v25 = vadd.f32 %v1403_v8, %v9778_v15  ;;  %v1597_v45 = vadd.f32 %v1596_v30, %v9803_v34  ;;  %v2596_v57 = vmax.f32 %v1341_v24, 0.0 }
 0x248   : > { %1881 = vmatprep.mubr.bf16.mxu0 %v8678_v11  ;;  %v2903_v29 = vadd.f32 %v2902_v42, %v2181_v14  ;;  %v2965_v12 = vadd.f32 %v2964_v0, %v2183_v48  ;;  %v1408_v49 = vadd.f32 %v1407_v32, %v9742_v22  ;;  %v1601_v31 = vadd.f32 %v1600_v62, %v9746_v3 }
 0x249   : > { %v1409_v2 = vpop.f32.mrf.mxu0  ;;  %v1602_v50 = vpop.f32.mrf.mxu1  ;;  %2074 = vmatprep.mubr.bf16.mxu1 %v8678_v11  ;;  %v2182_v59 = vmax.f32 %v1404_v25, 0.0  ;;  %v2184_v37 = vmax.f32 %v1597_v45, 0.0  ;;  %v2594_v48 = vmax.f32 %v1148_v23, 0.0  ;;  %v2897_v23 = vadd.f32 %v9835_v47, %v2580_v38 }
 0x24a   : > { %v1410_v19 = vadd.f32 %v1409_v2, %v9778_v15  ;;  %v1603_v17 = vadd.f32 %v1602_v50, %v9803_v34  ;;  %v2197_v40 = vmax.f32 %v1408_v49, 0.0  ;;  %v2199_v56 = vmax.f32 %v1601_v31, 0.0 }
 0x24b   : > { %v1411_v58 = vpop.f32.mrf.mxu0  ;;  %v1604_v44 = vpop.f32.mrf.mxu1  ;;  %v2934_v41 = vadd.f32 %v2933_v43, %v2182_v59  ;;  %v2996_v21 = vadd.f32 %v2995_v20, %v2184_v37  ;;  %v1158_v43 = vadd.f32 %v9764_v63, %v9298_v16  ;;  %v1351_v20 = vadd.f32 %v9766_v18, %v9308_v26 }
 0x24c   : > { %v2198_v36 = vmax.f32 %v1410_v19, 0.0  ;;  %v2200_v39 = vmax.f32 %v1603_v17, 0.0  ;;  %v2904_v8 = vadd.f32 %v2903_v29, %v2197_v40  ;;  %v2966_v30 = vadd.f32 %v2965_v12, %v2199_v56 }
 0x24d   : > { %v1412_v42 = vadd.f32 %v1411_v58, %v9742_v22  ;;  %v1605_v0 = vadd.f32 %v1604_v44, %v9746_v3  ;;  %v9864_v14 = vpop.f32.mrf.mxu0  ;;  %v9866_v4 = vpop.f32.mrf.mxu1  ;;  %v2610_v63 = vmax.f32 %v1154_v13, 0.0  ;;  %v2612_v16 = vmax.f32 %v1347_v60, 0.0 }
 0x24e   : > { %v9868_v32 = vadd.f32 %v2934_v41, %v2198_v36  ;;  %v9870_v62 = vadd.f32 %v2996_v21, %v2200_v39  ;;  %v3218_v47 = vrot.slane %v9318_v35, 4  ;;  %v2836_v59 = vadd.f32 %v9839_v46, %v2594_v48 }
 0x24f   : > { %v2213_v25 = vmax.f32 %v1412_v42, 0.0  ;;  %v2215_v45 = vmax.f32 %v1605_v0, 0.0  ;;  %v1417_v29 = vpop.f32.mrf.mxu0  ;;  %v1610_v12 = vpop.f32.mrf.mxu1  ;;  %7316 = vmatmul.mubr.msk.bf16.gmra.mxu0 %vm480_vm2, %v8889_v51  ;;  %7332 = vmatmul.mubr.msk.bf16.gmra.mxu1 %vm480_vm2, %v8889_v51  ;;  %v3206_v51 = vrot.slane %v9316_v33, 4  ;;  %v2898_v37 = vadd.f32 %v2897_v23, %v2596_v57 }
 0x250   : > { %v1418_v24 = vadd.f32 %v1417_v29, %v9742_v22  ;;  %v1611_v49 = vadd.f32 %v1610_v12, %v9746_v3  ;;  %1891 = vmatprep.mubr.bf16.mxu0 %v8678_v11  ;;  %2084 = vmatprep.mubr.bf16.mxu1 %v8678_v11  ;;  %v2626_v19 = vmax.f32 %v1158_v43, 0.0  ;;  %v2628_v17 = vmax.f32 %v1351_v20, 0.0 }
 0x251   : > { %v2905_v26 = vadd.f32 %v2904_v8, %v2213_v25  ;;  %v2967_v18 = vadd.f32 %v2966_v30, %v2215_v45  ;;  %v9885_v31 = vpop.f32.mrf.mxu0  ;;  %v9887_v2 = vpop.f32.mrf.mxu1  ;;  %v3200_v41 = vrot.slane %v9310_v27, 4  ;;  %v3212_v21 = vrot.slane %v9312_v28, 4 }
 0x252   : > { %v2229_v38 = vmax.f32 %v1418_v24, 0.0  ;;  %v2231_v50 = vmax.f32 %v1611_v49, 0.0  ;;  %v2837_v36 = vadd.f32 %v2836_v59, %v2610_v63  ;;  %v2899_v39 = vadd.f32 %v2898_v37, %v2612_v16 }
 0x253   : > { %v1421_v40 = vpop.f32.mrf.mxu0  ;;  %v1614_v13 = vpop.f32.mrf.mxu1  ;;  %v3207_v30 = vadd.f32 %v3206_v51, %v9316_v33  ;;  %v3219_v42 = vadd.f32 %v3218_v47, %v9318_v35  ;;  %v3201_v33 = vadd.f32 %v3200_v41, %v9310_v27  ;;  %v3213_v35 = vadd.f32 %v3212_v21, %v9312_v28 }
 0x254   : > { %v2906_v60 = vadd.f32 %v2905_v26, %v2229_v38  ;;  %v2968_v56 = vadd.f32 %v2967_v18, %v2231_v50  ;;  %v1422_v58 = vadd.f32 %v1421_v40, %v9742_v22  ;;  %v1615_v44 = vadd.f32 %v1614_v13, %v9746_v3 }
 0x255   : > { %v9896_v8 = vpop.f32.mrf.mxu0  ;;  %v9898_v46 = vpop.f32.mrf.mxu1  ;;  %v2838_v57 = vadd.f32 %v2837_v36, %v2626_v19  ;;  %v2900_v43 = vadd.f32 %v2899_v39, %v2628_v17  ;;  %v3208_v63 = vrot.slane %v3207_v30, 2  ;;  %v3202_v50 = vrot.slane %v3201_v33, 2 }
 0x256   : > { %v2245_v0 = vmax.f32 %v1422_v58, 0.0  ;;  %v2247_v48 = vmax.f32 %v1615_v44, 0.0  ;;  %v3214_v59 = vrot.slane %v3213_v35, 2 }
 0x257   : > { %v1427_v20 = vpop.f32.mrf.mxu0  ;;  %v1620_v25 = vpop.f32.mrf.mxu1  ;;  %7317 = vmatmul.mubr.msk.bf16.gmra.mxu0 %vm480_vm2, %v8897_v52  ;;  %7333 = vmatmul.mubr.msk.bf16.gmra.mxu1 %vm480_vm2, %v8897_v52  ;;  %v3220_v52 = vrot.slane %v3219_v42, 2  ;;  %v3230_v16 = vrot.slane %v2838_v57, 4  ;;  %v3242_v26 = vrot.slane %v2900_v43, 4 }
 0x258   : > { %v2907_v45 = vadd.f32 %v2906_v60, %v2245_v0  ;;  %v2969_v29 = vadd.f32 %v2968_v56, %v2247_v48  ;;  %1901 = vmatprep.mubr.bf16.mxu0 %v8678_v11  ;;  %2094 = vmatprep.mubr.bf16.mxu1 %v8678_v11  ;;  %v1428_v12 = vadd.f32 %v1427_v20, %v9742_v22 }
 0x259   : > { %v1621_v23 = vadd.f32 %v1620_v25, %v9746_v3  ;;  %v9912_v24 = vpop.f32.mrf.mxu0  ;;  %v9914_v49 = vpop.f32.mrf.mxu1  ;;  %v3209_v56 = vadd.f32 %v3208_v63, %v3207_v30  ;;  %v3221_v58 = vadd.f32 %v3220_v52, %v3219_v42  ;;  %v3231_v44 = vadd.f32 %v3230_v16, %v2838_v57 }
 0x25a   : > { %v2261_v18 = vmax.f32 %v1428_v12, 0.0  ;;  %v3243_v41 = vadd.f32 %v3242_v26, %v2900_v43  ;;  %v3203_v30 = vadd.f32 %v3202_v50, %v3201_v33  ;;  %v3215_v42 = vadd.f32 %v3214_v59, %v3213_v35 }
 0x25b   : > { %v2263_v51 = vmax.f32 %v1621_v23, 0.0  ;;  %v1431_v47 = vpop.f32.mrf.mxu0  ;;  %v1624_v38 = vpop.f32.mrf.mxu1  ;;  %v3232_v12 = vrot.slane %v3231_v44, 2 }
 0x25c   : > { %v1432_v27 = vadd.f32 %v1431_v47, %v9742_v22  ;;  %v1625_v28 = vadd.f32 %v1624_v38, %v9746_v3  ;;  %v2908_v37 = vadd.f32 %v2907_v45, %v2261_v18  ;;  %v3244_v23 = vrot.slane %v3243_v41, 2 }
 0x25d   : > { %v2970_v19 = vadd.f32 %v2969_v29, %v2263_v51  ;;  %v9918_v17 = vpop.f32.mrf.mxu0  ;;  %v9920_v40 = vpop.f32.mrf.mxu1  ;;  %v3210_v29 = vrot.slane %v3209_v56, 1  ;;  %v3204_v47 = vrot.slane %v3203_v30, 1  ;;  %v3216_v38 = vrot.slane %v3215_v42, 1 }
 0x25e   : > { %v2277_v13 = vmax.f32 %v1432_v27, 0.0  ;;  %v2279_v60 = vmax.f32 %v1625_v28, 0.0 }
 0x25f   : > { %v1437_v21 = vpop.f32.mrf.mxu0  ;;  %v1630_v36 = vpop.f32.mrf.mxu1  ;;  %7318 = vmatmul.mubr.msk.bf16.gmra.mxu0 %vm480_vm2, %v8905_v53  ;;  %7334 = vmatmul.mubr.msk.bf16.gmra.mxu1 %vm480_vm2, %v8905_v53  ;;  %v3222_v53 = vrot.slane %v3221_v58, 1  ;;  %v3211_v27 = vadd.f32 %v3210_v29, %v3209_v56 }
 0x260   : > { %v2909_v39 = vadd.f32 %v2908_v37, %v2277_v13  ;;  %v2971_v0 = vadd.f32 %v2970_v19, %v2279_v60  ;;  %v1438_v48 = vadd.f32 %v1437_v21, %v9742_v22  ;;  %v1631_v20 = vadd.f32 %v1630_v36, %v9746_v3  ;;  %1911 = vmatprep.mubr.bf16.mxu0 %v8678_v11 }
 0x261   : > { %v9929_v57 = vpop.f32.mrf.mxu0  ;;  %v9931_v43 = vpop.f32.mrf.mxu1  ;;  %2104 = vmatprep.mubr.bf16.mxu1 %v8678_v11  ;;  %v3223_v28 = vadd.f32 %v3222_v53, %v3221_v58  ;;  %v3233_v13 = vadd.f32 %v3232_v12, %v3231_v44  ;;  %v3245_v60 = vadd.f32 %v3244_v23, %v3243_v41  ;;  %v3205_v44 = vadd.f32 %v3204_v47, %v3203_v30 }
 0x262   : > { %v2293_v25 = vmax.f32 %v1438_v48, 0.0  ;;  %v2295_v45 = vmax.f32 %v1631_v20, 0.0  ;;  %v3217_v41 = vadd.f32 %v3216_v38, %v3215_v42 }
 0x263   : > { %v1441_v63 = vpop.f32.mrf.mxu0  ;;  %v1634_v52 = vpop.f32.mrf.mxu1  ;;  %v3234_v53 = vrot.slane %v3233_v13, 1  ;;  %v3246_v12 = vrot.slane %v3245_v60, 1 }
 0x264   : > { %v2910_v16 = vadd.f32 %v2909_v39, %v2293_v25  ;;  %v2972_v26 = vadd.f32 %v2971_v0, %v2295_v45  ;;  %v1442_v18 = vadd.f32 %v1441_v63, %v9742_v22  ;;  %v1635_v33 = vadd.f32 %v1634_v52, %v9746_v3 }
 0x265   : > { %v9936_v35 = vpop.f32.mrf.mxu0  ;;  %v9938_v51 = vpop.f32.mrf.mxu1  ;;  %v3297_v25 = vmul.f32 0.00390625, %v3211_v27  ;;  %v3235_v38 = vadd.f32 %v3234_v53, %v3233_v13  ;;  %v1607_v13 = vadd.f32 %v9866_v4, %v9803_v34  ;;  %v1420_v4 = vadd.f32 %v9885_v31, %v9778_v15 }
 0x266   : > { %v2309_v50 = vmax.f32 %v1442_v18, 0.0  ;;  %v2311_v59 = vmax.f32 %v1635_v33, 0.0 }
 0x267   : > { %v1447_v37 = vpop.f32.mrf.mxu0  ;;  %v1640_v19 = vpop.f32.mrf.mxu1  ;;  %7319 = vmatmul.mubr.msk.bf16.gmra.mxu0 %vm480_vm2, %v8913_v54  ;;  %7335 = vmatmul.mubr.msk.bf16.gmra.mxu1 %vm480_vm2, %v8913_v54  ;;  %v3299_v54 = vmul.f32 0.00390625, %v3223_v28  ;;  %v9958_v27 = vpack.c.bf16 %v3297_v25, %v3297_v25  ;;  %v3247_v28 = vadd.f32 %v3246_v12, %v3245_v60  ;;  %v1613_v12 = vadd.f32 %v9887_v2, %v9803_v34 }
 0x268   : > { %v1448_v21 = vadd.f32 %v1447_v37, %v9742_v22  ;;  %v1641_v36 = vadd.f32 %v1640_v19, %v9746_v3  ;;  %1921 = vmatprep.mubr.bf16.mxu0 %v8678_v11  ;;  %2114 = vmatprep.mubr.bf16.mxu1 %v8678_v11  ;;  %v2911_v56 = vadd.f32 %v2910_v16, %v2309_v50  ;;  %v3296_v50 = vmul.f32 0.00390625, %v3205_v44 }
 0x269   : > { %v2973_v58 = vadd.f32 %v2972_v26, %v2311_v59  ;;  %v9948_v39 = vpop.f32.mrf.mxu0  ;;  %v9950_v0 = vpop.f32.mrf.mxu1  ;;  %v9960_v30 = vpack.c.bf16 %v3299_v54, %v3299_v54  ;;  %v3298_v59 = vmul.f32 0.00390625, %v3217_v41  ;;  %v3301_v54 = vmul.f32 0.00390625, %v3235_v38 }
 0x26a   : > { %v2325_v48 = vmax.f32 %v1448_v21, 0.0  ;;  %v2327_v20 = vmax.f32 %v1641_v36, 0.0  ;;  %v3303_v44 = vmul.f32 0.00390625, %v3247_v28  ;;  %v9978_v41 = vpack.c.bf16 %v3296_v50, %v3296_v50 }
 0x26b   : > { %v1451_v45 = vpop.f32.mrf.mxu0  ;;  %v1644_v29 = vpop.f32.mrf.mxu1  ;;  %v2216_v38 = vmax.f32 %v1607_v13, 0.0  ;;  %v10003_v50 = vpack.c.bf16 %v3301_v54, %v3301_v54  ;;  %v7984_v13 = vld [vmem:[%s12086_s3 + $0x4c0] ss:$16 sps:$4 sm:$0xff]  }
 0x26c   : > { %v2912_v23 = vadd.f32 %v2911_v56, %v2325_v48  ;;  %v2974_v63 = vadd.f32 %v2973_v58, %v2327_v20  ;;  %v1452_v11 = vadd.f32 %v1451_v45, %v9742_v22  ;;  %v1645_v52 = vadd.f32 %v1644_v29, %v9746_v3  ;;  %v7987_v54 = vld [vmem:[%s12086_s3 + $0x6c0] ss:$16 sps:$4 sm:$0xff]  }
 0x26d   : > { %v9954_v16 = vpop.f32.mrf.mxu0  ;;  %v9956_v26 = vpop.f32.mrf.mxu1  ;;  %v9980_v45 = vpack.c.bf16 %v3298_v59, %v3298_v59  ;;  %12108 = vst [vmem:[#allocation7_spill] sm:$0xff] %v10003_v50  ;;  %v10005_v59 = vpack.c.bf16 %v3303_v44, %v3303_v44  ;;  %v7992_v44 = vld [vmem:[%s12086_s3 + $0x4a4] ss:$16 sps:$4 sm:$0xff]  }
 0x26e   : > { %v2341_v18 = vmax.f32 %v1452_v11, 0.0  ;;  %v2343_v33 = vmax.f32 %v1645_v52, 0.0 }
 0x26f   : > { %v1457_v42 = vpop.f32.mrf.mxu0  ;;  %v1650_v47 = vpop.f32.mrf.mxu1  ;;  %7320 = vmatmul.mubr.msk.bf16.gmra.mxu0 %vm480_vm2, %v8921_v55  ;;  %7336 = vmatmul.mubr.msk.bf16.gmra.mxu1 %vm480_vm2, %v8921_v55  ;;  %v1414_v55 = vadd.f32 %v9864_v14, %v9778_v15  ;;  %12107 = vst [vmem:[#allocation6_spill] sm:$0xff] %v9980_v45  ;;  %v7978_v14 = vld [vmem:[%s12086_s3 + $0x4e0] ss:$16 sps:$4 sm:$0xff]   ;;  %12109 = vst [vmem:[#allocation8_spill] sm:$0xff] %v10005_v59 }
 0x270   : > { %v2913_v37 = vadd.f32 %v2912_v23, %v2341_v18  ;;  %v2975_v19 = vadd.f32 %v2974_v63, %v2343_v33  ;;  %6454 = vmatprep.mubr.bf16.mxu0 %v9958_v27  ;;  %6495 = vmatprep.mubr.bf16.mxu1 %v9960_v30  ;;  %v1458_v21 = vadd.f32 %v1457_v42, %v9742_v22  ;;  %v7981_v18 = vld [vmem:[%s12086_s3 + $0x6e0] ss:$16 sps:$4 sm:$0xff]  }
 0x271   : > { %v1651_v36 = vadd.f32 %v1650_v47, %v9746_v3  ;;  %v9970_v56 = vpop.f32.mrf.mxu0  ;;  %v9972_v58 = vpop.f32.mrf.mxu1  ;;  %v7986_v47 = vld [vmem:[%s12086_s3 + $0x4c4] ss:$16 sps:$4 sm:$0xff]   ;;  %v2214_v31 = vmax.f32 %v1414_v55, 0.0 }
 0x272   : > { %v2357_v60 = vmax.f32 %v1458_v21, 0.0 }
 0x273   : > { %v2359_v48 = vmax.f32 %v1651_v36, 0.0  ;;  %v1461_v20 = vpop.f32.mrf.mxu0  ;;  %v1654_v25 = vpop.f32.mrf.mxu1 }
 0x274   : > { %v1462_v29 = vadd.f32 %v1461_v20, %v9742_v22  ;;  %v1655_v53 = vadd.f32 %v1654_v25, %v9746_v3  ;;  %v2914_v23 = vadd.f32 %v2913_v37, %v2357_v60  ;;  %v7989_v37 = vld [vmem:[%s12086_s3 + $0x6c4] ss:$16 sps:$4 sm:$0xff]   ;;  %v2230_v60 = vmax.f32 %v1420_v4, 0.0 }
 0x275   : > { %v2976_v63 = vadd.f32 %v2975_v19, %v2359_v48  ;;  %v9991_v11 = vpop.f32.mrf.mxu0  ;;  %v9993_v52 = vpop.f32.mrf.mxu1  ;;  %v2232_v48 = vmax.f32 %v1613_v12, 0.0  ;;  %v7995_v12 = vld [vmem:[%s12086_s3 + $0x6a4] ss:$16 sps:$4 sm:$0xff]  }
 0x276   : > { %v2373_v33 = vmax.f32 %v1462_v29, 0.0  ;;  %v2375_v42 = vmax.f32 %v1655_v53, 0.0  ;;  %v10028_v29 = vadd.f32 %v9896_v8, %v9778_v15  ;;  %v10032_v53 = vadd.f32 %v9898_v46, %v9803_v34 }
 0x277   : > { %v1467_v28 = vpop.f32.mrf.mxu0  ;;  %v1660_v2 = vpop.f32.mrf.mxu1  ;;  %6455 = vmatmul.mubr.bf16.vlgmr.msra.gmra.mxu0 %v9978_v41  ;;  %6496 = vmatmul.mubr.bf16.vlgmr.msra.gmra.mxu1 %v9980_v45  ;;  %v1430_v46 = vadd.f32 %v9912_v24, %v9778_v15 }
 0x278   : > { %v2915_v19 = vadd.f32 %v2914_v23, %v2373_v33  ;;  %v2977_v21 = vadd.f32 %v2976_v63, %v2375_v42  ;;  %v1468_v36 = vadd.f32 %v1467_v28, %v9742_v22  ;;  %v1661_v55 = vadd.f32 %v1660_v2, %v9746_v3  ;;  %6505 = vmatpush1.bf16.msra.mxu0 %v7978_v14 }
 0x279   : > { %6546 = vmatpush1.bf16.msra.mxu1 %v7981_v18  ;;  %6536 = vmatprep.mubr.bf16.mxu0 %v10003_v50  ;;  %v10016_v20 = vpop.f32.mrf.mxu0  ;;  %v10018_v25 = vpop.f32.mrf.mxu1  ;;  %v3224_v23 = vrot.slane %v9797_v1, 4  ;;  %v2936_v63 = vadd.f32 %v9868_v32, %v2214_v31  ;;  %v2998_v33 = vadd.f32 %v9870_v62, %v2216_v38  ;;  %v3236_v2 = vrot.slane %v9799_v61, 4  ;;  %v7993_v38 = vld [vmem:[%s12086_s3 + $0x6a0] ss:$16 sps:$4 sm:$0xff]  }
 0x27a   : > { %v2389_v14 = vmax.f32 %v1468_v36, 0.0  ;;  %v2391_v4 = vmax.f32 %v1661_v55, 0.0  ;;  %6577 = vmatprep.mubr.bf16.mxu1 %v10005_v59  ;;  %6506 = vmatprep.subr.bf16.mxu0 %v7986_v47  ;;  %v7990_v47 = vld [vmem:[%s12086_s3 + $0x4a0] ss:$16 sps:$4 sm:$0xff]   ;;  %v1623_v32 = vadd.f32 %v9914_v49, %v9803_v34  ;;  %v2246_v36 = vmax.f32 %v10028_v29, 0.0 }
 0x27b   : > { %6547 = vmatprep.subr.bf16.mxu1 %v7989_v37  ;;  %v1471_v8 = vpop.f32.mrf.mxu0  ;;  %v1664_v18 = vpop.f32.mrf.mxu1  ;;  %v2999_v49 = vadd.f32 %v2998_v33, %v2232_v48  ;;  %v2248_v55 = vmax.f32 %v10032_v53, 0.0  ;;  %v2262_v48 = vmax.f32 %v1430_v46, 0.0  ;;  %v10072_v29 = vadd.f32 %v9929_v57, %v9778_v15 }
 0x27c   : > { %v2916_v42 = vadd.f32 %v2915_v19, %v2389_v14  ;;  %v2978_v28 = vadd.f32 %v2977_v21, %v2391_v4  ;;  %6507 = vmatpush1.bf16.msra.mxu0 %v7984_v13  ;;  %v1472_v31 = vadd.f32 %v1471_v8, %v9742_v22  ;;  %v1665_v37 = vadd.f32 %v1664_v18, %v9746_v3  ;;  %v7998_v19 = vld [vmem:[%s12086_s3 + $0x484] ss:$16 sps:$4 sm:$0xff]  }
 0x27d   : > { %6548 = vmatpush1.bf16.msra.mxu1 %v7987_v54  ;;  %v10051_v62 = vpop.f32.mrf.mxu0  ;;  %v10053_v24 = vpop.f32.mrf.mxu1  ;;  %6508 = vmatprep.subr.bf16.mxu0 %v7992_v44  ;;  %v2937_v21 = vadd.f32 %v2936_v63, %v2230_v60  ;;  %v8001_v13 = vld [vmem:[%s12086_s3 + $0x684] ss:$16 sps:$4 sm:$0xff]   ;;  %v1434_v54 = vadd.f32 %v9918_v17, %v9778_v15  ;;  %v1627_v44 = vadd.f32 %v9920_v40, %v9803_v34  ;;  %v7996_v17 = vld [vmem:[%s12086_s3 + $0x480] ss:$16 sps:$4 sm:$0xff]   ;;  %v2264_v63 = vmax.f32 %v1623_v32, 0.0 }
 0x27e   : > { %6549 = vmatprep.subr.bf16.mxu1 %v7995_v12  ;;  %v2405_v14 = vmax.f32 %v1472_v31, 0.0  ;;  %v2407_v4 = vmax.f32 %v1665_v37, 0.0  ;;  %v10081_v40 = vadd.f32 %v9931_v43, %v9803_v34  ;;  %v8004_v32 = vld [vmem:[%s12086_s3 + $0x464] ss:$16 sps:$4 sm:$0xff]   ;;  %v10094_v31 = vadd.f32 %v3224_v23, %v9797_v1  ;;  %v8002_v23 = vld [vmem:[%s12086_s3 + $0x460] ss:$16 sps:$4 sm:$0xff]  }
 0x27f   : > { %v1477_v8 = vpop.f32.mrf.mxu0  ;;  %v1670_v60 = vpop.f32.mrf.mxu1  ;;  %v10097_v43 = vadd.f32 %v3236_v2, %v9799_v61  ;;  %v8007_v37 = vld [vmem:[%s12086_s3 + $0x664] ss:$16 sps:$4 sm:$0xff]  }
 0x280   : > { %v1478_v53 = vadd.f32 %v1477_v8, %v9742_v22  ;;  %v1671_v12 = vadd.f32 %v1670_v60, %v9746_v3  ;;  %6509 = vmatpush1.bf16.msra.mxu0 %v7990_v47  ;;  %v2917_v18 = vadd.f32 %v2916_v42, %v2405_v14  ;;  %v2979_v33 = vadd.f32 %v2978_v28, %v2407_v4  ;;  %v7999_v47 = vld [vmem:[%s12086_s3 + $0x680] ss:$16 sps:$4 sm:$0xff]  }
 0x281   : > { %6550 = vmatpush1.bf16.msra.mxu1 %v7993_v38  ;;  %v10083_v46 = vpop.f32.mrf.mxu0  ;;  %v10085_v57 = vpop.f32.mrf.mxu1  ;;  %6510 = vmatprep.subr.bf16.mxu0 %v7998_v19  ;;  %v2938_v38 = vadd.f32 %v2937_v21, %v2246_v36  ;;  %v3000_v19 = vadd.f32 %v2999_v49, %v2248_v55  ;;  %v2278_v14 = vmax.f32 %v1434_v54, 0.0  ;;  %v2280_v4 = vmax.f32 %v1627_v44, 0.0  ;;  %v8005_v54 = vld [vmem:[%s12086_s3 + $0x660] ss:$16 sps:$4 sm:$0xff]   ;;  %v8010_v44 = vld [vmem:[%s12086_s3 + $0x444] ss:$16 sps:$4 sm:$0xff]  }
 0x282   : > { %v2421_v42 = vmax.f32 %v1478_v53, 0.0  ;;  %v2423_v28 = vmax.f32 %v1671_v12, 0.0  ;;  %6551 = vmatprep.subr.bf16.mxu1 %v8001_v13  ;;  %v2294_v21 = vmax.f32 %v10072_v29, 0.0  ;;  %v2296_v49 = vmax.f32 %v10081_v40, 0.0 }
 0x283   : > { %v1481_v8 = vpop.f32.mrf.mxu0  ;;  %v1674_v60 = vpop.f32.mrf.mxu1  ;;  %v2939_v2 = vadd.f32 %v2938_v38, %v2262_v48  ;;  %v3001_v13 = vadd.f32 %v3000_v19, %v2264_v63  ;;  %v1444_v48 = vadd.f32 %v9936_v35, %v9778_v15  ;;  %v1637_v29 = vadd.f32 %v9938_v51, %v9803_v34  ;;  %v8008_v51 = vld [vmem:[%s12086_s3 + $0x440] ss:$16 sps:$4 sm:$0xff]  }
 0x284   : > { %v2918_v10 = vadd.f32 %v2917_v18, %v2421_v42  ;;  %v2980_v7 = vadd.f32 %v2979_v33, %v2423_v28  ;;  %v1482_v1 = vadd.f32 %v1481_v8, %v9742_v22  ;;  %v1675_v61 = vadd.f32 %v1674_v60, %v9746_v3  ;;  %6511 = vmatpush1.bf16.msra.mxu0 %v7996_v17  ;;  %v8013_v17 = vld [vmem:[%s12086_s3 + $0x644] ss:$16 sps:$4 sm:$0xff]  }
 0x285   : > { %6552 = vmatpush1.bf16.msra.mxu1 %v7999_v47  ;;  %v10109_v36 = vpop.f32.mrf.mxu0  ;;  %v10111_v55 = vpop.f32.mrf.mxu1  ;;  %6512 = vmatprep.subr.bf16.mxu0 %v8004_v32  ;;  %v3226_v63 = vrot.slane %v10094_v31, 2  ;;  %v2940_v40 = vadd.f32 %v2939_v2, %v2278_v14  ;;  %v3002_v47 = vadd.f32 %v3001_v13, %v2280_v4  ;;  %v1450_v32 = vadd.f32 %v9948_v39, %v9778_v15 }
 0x286   : > { %v2437_v53 = vmax.f32 %v1482_v1, 0.0  ;;  %v2439_v12 = vmax.f32 %v1675_v61, 0.0  ;;  %6553 = vmatprep.subr.bf16.mxu1 %v8007_v37  ;;  %v3238_v28 = vrot.slane %v10097_v43, 2  ;;  %v1643_v37 = vadd.f32 %v9950_v0, %v9803_v34  ;;  %v8019_v1 = vld [vmem:[%s12086_s3 + $0x624] ss:$16 sps:$4 sm:$0xff]  }
 0x287   : > { %v1487_v18 = vpop.f32.mrf.mxu0  ;;  %v1680_v33 = vpop.f32.mrf.mxu1  ;;  %v2941_v4 = vadd.f32 %v2940_v40, %v2294_v21  ;;  %v3003_v0 = vadd.f32 %v3002_v47, %v2296_v49  ;;  %v2310_v8 = vmax.f32 %v1444_v48, 0.0  ;;  %v2312_v60 = vmax.f32 %v1637_v29, 0.0 }
 0x288   : > { %v2919_v35 = vadd.f32 %v2918_v10, %v2437_v53  ;;  %v2981_v42 = vadd.f32 %v2980_v7, %v2439_v12  ;;  %6513 = vmatpush1.bf16.msra.mxu0 %v8002_v23  ;;  %v1488_v38 = vadd.f32 %v1487_v18, %v9742_v22  ;;  %v1681_v19 = vadd.f32 %v1680_v33, %v9746_v3  ;;  %v8011_v7 = vld [vmem:[%s12086_s3 + $0x640] ss:$16 sps:$4 sm:$0xff]   ;;  %v8016_v10 = vld [vmem:[%s12086_s3 + $0x424] ss:$16 sps:$4 sm:$0xff]  }
 0x289   : > { %6554 = vmatpush1.bf16.msra.mxu1 %v8005_v54  ;;  %v10137_v14 = vpop.f32.mrf.mxu0  ;;  %v10139_v39 = vpop.f32.mrf.mxu1  ;;  %6514 = vmatprep.subr.bf16.mxu0 %v8010_v44  ;;  %v1454_v61 = vadd.f32 %v9954_v16, %v9778_v15  ;;  %v1647_v23 = vadd.f32 %v9956_v26, %v9803_v34  ;;  %v2326_v53 = vmax.f32 %v1450_v32, 0.0  ;;  %v1460_v21 = vadd.f32 %v9970_v56, %v9778_v15  ;;  %v8014_v16 = vld [vmem:[%s12086_s3 + $0x420] ss:$16 sps:$4 sm:$0xff]   ;;  %v8022_v33 = vld [vmem:[%s12086_s3 + $0x404] ss:$16 sps:$4 sm:$0xff]  }
 0x28a   : > { %6555 = vmatprep.subr.bf16.mxu1 %v8013_v17  ;;  %v2453_v2 = vmax.f32 %v1488_v38, 0.0  ;;  %v2455_v13 = vmax.f32 %v1681_v19, 0.0  ;;  %v2328_v29 = vmax.f32 %v1643_v37, 0.0  ;;  %v1653_v26 = vadd.f32 %v9972_v58, %v9803_v34  ;;  %v8017_v56 = vld [vmem:[%s12086_s3 + $0x620] ss:$16 sps:$4 sm:$0xff]  }
 0x28b   : > { %v1491_v54 = vpop.f32.mrf.mxu0  ;;  %v1684_v44 = vpop.f32.mrf.mxu1  ;;  %v2942_v47 = vadd.f32 %v2941_v4, %v2310_v8  ;;  %v3004_v32 = vadd.f32 %v3003_v0, %v2312_v60  ;;  %v2344_v37 = vmax.f32 %v1647_v23, 0.0  ;;  %v1464_v38 = vadd.f32 %v9991_v11, %v9778_v15 }
 0x28c   : > { %v1492_v49 = vadd.f32 %v1491_v54, %v9742_v22  ;;  %v1685_v48 = vadd.f32 %v1684_v44, %v9746_v3  ;;  %6515 = vmatpush1.bf16.msra.mxu0 %v8008_v51  ;;  %v2920_v12 = vadd.f32 %v2919_v35, %v2453_v2  ;;  %v2982_v17 = vadd.f32 %v2981_v42, %v2455_v13  ;;  %v8025_v35 = vld [vmem:[%s12086_s3 + $0x604] ss:$16 sps:$4 sm:$0xff]   ;;  %v8023_v54 = vld [vmem:[%s12086_s3 + $0x600] ss:$16 sps:$4 sm:$0xff]  }
 0x28d   : > { %6556 = vmatpush1.bf16.msra.mxu1 %v8011_v7  ;;  %v10163_v40 = vpop.f32.mrf.mxu0  ;;  %v10165_v18 = vpop.f32.mrf.mxu1  ;;  %6516 = vmatprep.subr.bf16.mxu0 %v8016_v10  ;;  %v2342_v42 = vmax.f32 %v1454_v61, 0.0  ;;  %v1657_v19 = vadd.f32 %v9993_v52, %v9803_v34  ;;  %v2943_v4 = vadd.f32 %v2942_v47, %v2326_v53  ;;  %v3005_v61 = vadd.f32 %v3004_v32, %v2328_v29  ;;  %v8028_v44 = vld [vmem:[%s12086_s3 + $0x5e4] ss:$16 sps:$4 sm:$0xff]  }
 0x28e   : > { %v2469_v51 = vmax.f32 %v1492_v49, 0.0  ;;  %v2471_v58 = vmax.f32 %v1685_v48, 0.0  ;;  %6557 = vmatprep.subr.bf16.mxu1 %v8019_v1  ;;  %v8020_v1 = vld [vmem:[%s12086_s3 + $0x400] ss:$16 sps:$4 sm:$0xff]   ;;  %v2358_v23 = vmax.f32 %v1460_v21, 0.0  ;;  %v2360_v11 = vmax.f32 %v1653_v26, 0.0 }
 0x28f   : > { %v10180_v7 = vpop.f32.mrf.mxu0  ;;  %v1690_v10 = vpop.f32.mrf.mxu1  ;;  %v1470_v52 = vadd.f32 %v10016_v20, %v9778_v15  ;;  %v3227_v53 = vadd.f32 %v3226_v63, %v10094_v31  ;;  %v3239_v20 = vadd.f32 %v3238_v28, %v10097_v43  ;;  %v1663_v21 = vadd.f32 %v10018_v25, %v9803_v34  ;;  %v8031_v48 = vld [vmem:[%s12086_s3 + $0x7e4] ss:$16 sps:$4 sm:$0xff]   ;;  %v8026_v28 = vld [vmem:[%s12086_s3 + $0x5e0] ss:$16 sps:$4 sm:$0xff]  }
 0x290   : > { %v10182_v0 = vadd.f32 %v2920_v12, %v2469_v51  ;;  %v2983_v8 = vadd.f32 %v2982_v17, %v2471_v58  ;;  %v1691_v60 = vadd.f32 %v1690_v10, %v9746_v3  ;;  %6517 = vmatpush1.bf16.msra.mxu0 %v8014_v16  ;;  %v2944_v16 = vadd.f32 %v2943_v4, %v2342_v42 }
 0x291   : > { %6558 = vmatpush1.bf16.msra.mxu1 %v8017_v56  ;;  %v10190_v2 = vpop.f32.mrf.mxu0  ;;  %v10192_v13 = vpop.f32.mrf.mxu1  ;;  %6518 = vmatprep.subr.bf16.mxu0 %v8022_v33  ;;  %v3006_v29 = vadd.f32 %v3005_v61, %v2344_v37  ;;  %v2374_v26 = vmax.f32 %v1464_v38, 0.0  ;;  %v2376_v12 = vmax.f32 %v1657_v19, 0.0  ;;  %v1474_v43 = vadd.f32 %v10051_v62, %v9778_v15  ;;  %v8029_v62 = vld [vmem:[%s12086_s3 + $0x7e0] ss:$16 sps:$4 sm:$0xff]   ;;  %v8037_v37 = vld [vmem:[%s12086_s3 + $0x7c4] ss:$16 sps:$4 sm:$0xff]  }
 0x292   : > { %v2487_v49 = vmax.f32 %v1691_v60, 0.0  ;;  %6559 = vmatprep.subr.bf16.mxu1 %v8025_v35  ;;  %v1667_v25 = vadd.f32 %v10053_v24, %v9803_v34  ;;  %v2945_v56 = vadd.f32 %v2944_v16, %v2358_v23  ;;  %v2390_v47 = vmax.f32 %v1470_v52, 0.0  ;;  %v8034_v24 = vld [vmem:[%s12086_s3 + $0x5c4] ss:$16 sps:$4 sm:$0xff]   ;;  %v8032_v23 = vld [vmem:[%s12086_s3 + $0x5c0] ss:$16 sps:$4 sm:$0xff]  }
 0x293   : > { %v10211_v17 = vpop.f32.mrf.mxu0  ;;  %v10213_v31 = vpop.f32.mrf.mxu1  ;;  %v3007_v33 = vadd.f32 %v3006_v29, %v2360_v11  ;;  %v2392_v58 = vmax.f32 %v1663_v21, 0.0  ;;  %v1480_v35 = vadd.f32 %v10083_v46, %v9778_v15  ;;  %v1673_v42 = vadd.f32 %v10085_v57, %v9803_v34  ;;  %v8043_v16 = vld [vmem:[%s12086_s3 + $0x7a4] ss:$16 sps:$4 sm:$0xff]  }
 0x294   : > { %v10219_v63 = vadd.f32 %v2983_v8, %v2487_v49  ;;  %6519 = vmatpush1.bf16.msra.mxu0 %v8020_v1  ;;  %v3228_v38 = vrot.slane %v3227_v53, 1  ;;  %v3240_v19 = vrot.slane %v3239_v20, 1  ;;  %v2946_v10 = vadd.f32 %v2945_v56, %v2374_v26 }
 0x295   : > { %6560 = vmatpush1.bf16.msra.mxu1 %v8023_v54  ;;  %v10224_v32 = vpop.f32.mrf.mxu0  ;;  %v10226_v51 = vpop.f32.mrf.mxu1  ;;  %6520 = vmatprep.subr.bf16.mxu0 %v8028_v44  ;;  %v3008_v4 = vadd.f32 %v3007_v33, %v2376_v12  ;;  %v2406_v1 = vmax.f32 %v1474_v43, 0.0  ;;  %v2408_v61 = vmax.f32 %v1667_v25, 0.0  ;;  %v1484_v46 = vadd.f32 %v10109_v36, %v9778_v15  ;;  %v8035_v44 = vld [vmem:[%s12086_s3 + $0x7c0] ss:$16 sps:$4 sm:$0xff]   ;;  %v8040_v36 = vld [vmem:[%s12086_s3 + $0x5a4] ss:$16 sps:$4 sm:$0xff]  }
 0x296   : > { %6561 = vmatprep.subr.bf16.mxu1 %v8031_v48  ;;  %v1677_v57 = vadd.f32 %v10111_v55, %v9803_v34  ;;  %v2947_v11 = vadd.f32 %v2946_v10, %v2390_v47  ;;  %v2422_v21 = vmax.f32 %v1480_v35, 0.0  ;;  %v2424_v49 = vmax.f32 %v1673_v42, 0.0 }
 0x297   : > { %v10241_v8 = vpop.f32.mrf.mxu0  ;;  %v10243_v60 = vpop.f32.mrf.mxu1  ;;  %v3009_v55 = vadd.f32 %v3008_v4, %v2392_v58  ;;  %v1490_v48 = vadd.f32 %v10137_v14, %v9778_v15  ;;  %v3229_v29 = vadd.f32 %v3228_v38, %v3227_v53  ;;  %v3241_v26 = vadd.f32 %v3240_v19, %v3239_v20  ;;  %v8038_v14 = vld [vmem:[%s12086_s3 + $0x5a0] ss:$16 sps:$4 sm:$0xff]   ;;  %v8046_v58 = vld [vmem:[%s12086_s3 + $0x584] ss:$16 sps:$4 sm:$0xff]  }
 0x298   : > { %6521 = vmatpush2.bf16.msra.mxu0 %v8026_v28  ;;  %v1683_v12 = vadd.f32 %v10139_v39, %v9803_v34  ;;  %v2948_v28 = vadd.f32 %v2947_v11, %v2406_v1  ;;  %v2438_v33 = vmax.f32 %v1484_v46, 0.0  ;;  %v2440_v47 = vmax.f32 %v1677_v57, 0.0 }
 0x299   : > { %6562 = vmatpush2.bf16.msra.mxu1 %v8029_v62  ;;  %v10252_v52 = vpop.f32.mrf.mxu0  ;;  %v10254_v54 = vpop.f32.mrf.mxu1  ;;  %6522 = vmatprep.subr.bf16.mxu0 %v8034_v24  ;;  %v3010_v56 = vadd.f32 %v3009_v55, %v2408_v61  ;;  %v1494_v53 = vadd.f32 %v10163_v40, %v9778_v15  ;;  %v1687_v20 = vadd.f32 %v10165_v18, %v9803_v34  ;;  %v8041_v24 = vld [vmem:[%s12086_s3 + $0x7a0] ss:$16 sps:$4 sm:$0xff]   ;;  %v8049_v18 = vld [vmem:[%s12086_s3 + $0x784] ss:$16 sps:$4 sm:$0xff]   ;;  %v3300_v61 = vmul.f32 0.00390625, %v3229_v29 }
 0x29a   : > { %6563 = vmatprep.subr.bf16.mxu1 %v8037_v37  ;;  %v2949_v35 = vadd.f32 %v2948_v28, %v2422_v21  ;;  %v2454_v37 = vmax.f32 %v1490_v48, 0.0  ;;  %v1498_v40 = vadd.f32 %v10180_v7, %v9742_v22  ;;  %v2456_v38 = vmax.f32 %v1683_v12, 0.0  ;;  %v8047_v21 = vld [vmem:[%s12086_s3 + $0x780] ss:$16 sps:$4 sm:$0xff]  }
 0x29b   : > { %v10269_v43 = vpop.f32.mrf.mxu0  ;;  %v10271_v25 = vpop.f32.mrf.mxu1  ;;  %v3011_v42 = vadd.f32 %v3010_v56, %v2424_v49  ;;  %v1500_v19 = vadd.f32 %v10190_v2, %v9778_v15  ;;  %v1693_v10 = vadd.f32 %v10192_v13, %v9803_v34  ;;  %v3302_v46 = vmul.f32 0.00390625, %v3241_v26  ;;  %v8052_v49 = vld [vmem:[%s12086_s3 + $0x564] ss:$16 sps:$4 sm:$0xff]  }
 0x29c   : > { %6523 = vmatpush2.bf16.msra.mxu0 %v8032_v23  ;;  %v2950_v57 = vadd.f32 %v2949_v35, %v2438_v33  ;;  %v8044_v23 = vld [vmem:[%s12086_s3 + $0x580] ss:$16 sps:$4 sm:$0xff]   ;;  %v2470_v11 = vmax.f32 %v1494_v53, 0.0  ;;  %v1504_v2 = vadd.f32 %v10224_v32, %v9778_v15  ;;  %v1697_v13 = vadd.f32 %v10226_v51, %v9803_v34  ;;  %v8055_v32 = vld [vmem:[%s12086_s3 + $0x764] ss:$16 sps:$4 sm:$0xff]  }
 0x29d   : > { %6564 = vmatpush2.bf16.msra.mxu1 %v8035_v44  ;;  %v1513_v39 = vpop.f32.mrf.mxu0  ;;  %v1706_v62 = vpop.f32.mrf.mxu1  ;;  %6524 = vmatprep.subr.bf16.mxu0 %v8040_v36  ;;  %v3012_v7 = vadd.f32 %v3011_v42, %v2440_v47  ;;  %v2472_v44 = vmax.f32 %v1687_v20, 0.0  ;;  %v2486_v29 = vmax.f32 %v1500_v19, 0.0  ;;  %v2488_v26 = vmax.f32 %v1693_v10, 0.0  ;;  %v8050_v20 = vld [vmem:[%s12086_s3 + $0x560] ss:$16 sps:$4 sm:$0xff]  }
 0x29e   : > { %6565 = vmatprep.subr.bf16.mxu1 %v8043_v16  ;;  %v2951_v48 = vadd.f32 %v2950_v57, %v2454_v37  ;;  %v2485_v16 = vmax.f32 %v1498_v40, 0.0  ;;  %v1502_v12 = vadd.f32 %v10211_v17, %v9742_v22  ;;  %v10321_v33 = vpack.c.bf16 %v3300_v61, %v3300_v61  ;;  %v8061_v10 = vld [vmem:[%s12086_s3 + $0x744] ss:$16 sps:$4 sm:$0xff]  }
 0x29f   : > { %v10295_v4 = vpop.f32.mrf.mxu0  ;;  %v10297_v1 = vpop.f32.mrf.mxu1  ;;  %v3013_v51 = vadd.f32 %v3012_v7, %v2456_v38  ;;  %v10323_v47 = vpack.c.bf16 %v3302_v46, %v3302_v46  ;;  %v1703_v53 = vadd.f32 %v10254_v54, %v9803_v34  ;;  %v2504_v35 = vmax.f32 %v1697_v13, 0.0  ;;  %v8058_v54 = vld [vmem:[%s12086_s3 + $0x544] ss:$16 sps:$4 sm:$0xff]  }
 0x2a0   : > { %6525 = vmatpush2.bf16.msra.mxu0 %v8038_v14  ;;  %12110 = vst [vmem:[#allocation9_spill] sm:$0xff] %v10321_v33  ;;  %v1510_v14 = vadd.f32 %v10252_v52, %v9778_v15  ;;  %v2952_v17 = vadd.f32 %v2951_v48, %v2470_v11  ;;  %v8053_v52 = vld [vmem:[%s12086_s3 + $0x760] ss:$16 sps:$4 sm:$0xff]   ;;  %v2922_v40 = vadd.f32 %v10182_v0, %v2485_v16  ;;  %v2501_v57 = vmax.f32 %v1502_v12, 0.0 }
 0x2a1   : > { %6566 = vmatpush2.bf16.msra.mxu1 %v8041_v24  ;;  %v1519_v36 = vpop.f32.mrf.mxu0  ;;  %v1712_v55 = vpop.f32.mrf.mxu1  ;;  %6526 = vmatprep.subr.bf16.mxu0 %v8046_v58  ;;  %12111 = vst [vmem:[#allocation10_spill] sm:$0xff] %v10323_v47  ;;  %v3014_v24 = vadd.f32 %v3013_v51, %v2472_v44  ;;  %v2502_v58 = vmax.f32 %v1504_v2, 0.0  ;;  %v1514_v38 = vadd.f32 %v1513_v39, %v9778_v15  ;;  %v2520_v39 = vmax.f32 %v1703_v53, 0.0  ;;  %v8056_v44 = vld [vmem:[%s12086_s3 + $0x540] ss:$16 sps:$4 sm:$0xff]  }
 0x2a2   : > { %6567 = vmatprep.subr.bf16.mxu1 %v8049_v18  ;;  %v1695_v18 = vadd.f32 %v10213_v31, %v9746_v3  ;;  %v1707_v19 = vadd.f32 %v1706_v62, %v9803_v34  ;;  %v2953_v61 = vadd.f32 %v2952_v17, %v2486_v29  ;;  %v10348_v7 = vadd.f32 %v10241_v8, %v9742_v22 }
 0x2a3   : > { %v10317_v28 = vpop.f32.mrf.mxu0  ;;  %v10319_v56 = vpop.f32.mrf.mxu1  ;;  %v3015_v46 = vadd.f32 %v3014_v24, %v2488_v26  ;;  %v2518_v31 = vmax.f32 %v1510_v14, 0.0  ;;  %v1520_v62 = vadd.f32 %v1519_v36, %v9778_v15  ;;  %v1713_v11 = vadd.f32 %v1712_v55, %v9803_v34  ;;  %v8059_v36 = vld [vmem:[%s12086_s3 + $0x740] ss:$16 sps:$4 sm:$0xff]   ;;  %v8064_v55 = vld [vmem:[%s12086_s3 + $0x524] ss:$16 sps:$4 sm:$0xff]  }
 0x2a4   : > { %6527 = vmatpush2.bf16.msra.mxu0 %v8044_v23  ;;  %v2954_v2 = vadd.f32 %v2953_v61, %v2502_v58  ;;  %v1701_v8 = vadd.f32 %v10243_v60, %v9746_v3  ;;  %v2534_v48 = vmax.f32 %v1514_v38, 0.0  ;;  %v2536_v16 = vmax.f32 %v1707_v19, 0.0  ;;  %v8067_v60 = vld [vmem:[%s12086_s3 + $0x724] ss:$16 sps:$4 sm:$0xff]   ;;  %v8065_v38 = vld [vmem:[%s12086_s3 + $0x720] ss:$16 sps:$4 sm:$0xff]  }
 0x2a5   : > { %6568 = vmatpush2.bf16.msra.mxu1 %v8047_v21  ;;  %v1523_v42 = vpop.f32.mrf.mxu0  ;;  %v1716_v37 = vpop.f32.mrf.mxu1  ;;  %6528 = vmatprep.subr.bf16.mxu0 %v8052_v49  ;;  %v3016_v13 = vadd.f32 %v3015_v46, %v2504_v35  ;;  %v2923_v29 = vadd.f32 %v2922_v40, %v2501_v57  ;;  %v2503_v26 = vmax.f32 %v1695_v18, 0.0  ;;  %v2517_v12 = vmax.f32 %v10348_v7, 0.0  ;;  %v8070_v19 = vld [vmem:[%s12086_s3 + $0x504] ss:$16 sps:$4 sm:$0xff]  }
 0x2a6   : > { %6569 = vmatprep.subr.bf16.mxu1 %v8055_v32  ;;  %v1524_v32 = vadd.f32 %v1523_v42, %v9778_v15  ;;  %v1717_v51 = vadd.f32 %v1716_v37, %v9803_v34  ;;  %v1512_v14 = vadd.f32 %v10269_v43, %v9742_v22  ;;  %v2955_v17 = vadd.f32 %v2954_v2, %v2518_v31  ;;  %v8062_v42 = vld [vmem:[%s12086_s3 + $0x520] ss:$16 sps:$4 sm:$0xff]   ;;  %v8073_v57 = vld [vmem:[%s12086_s3 + $0x704] ss:$16 sps:$4 sm:$0xff]  }
 0x2a7   : > { %v10350_v0 = vpop.f32.mrf.mxu0  ;;  %v10352_v23 = vpop.f32.mrf.mxu1  ;;  %v3017_v24 = vadd.f32 %v3016_v13, %v2520_v39  ;;  %v2550_v58 = vmax.f32 %v1520_v62, 0.0  ;;  %v2552_v35 = vmax.f32 %v1713_v11, 0.0  ;;  %v2519_v37 = vmax.f32 %v1701_v8, 0.0 }
 0x2a8   : > { %6529 = vmatpush2.bf16.msra.mxu0 %v8050_v20  ;;  %v2568_v46 = vmax.f32 %v1717_v51, 0.0  ;;  %v2985_v7 = vadd.f32 %v10219_v63, %v2503_v26  ;;  %v2533_v31 = vmax.f32 %v1512_v14, 0.0  ;;  %v10406_v2 = vadd.f32 %v10295_v4, %v9742_v22  ;;  %v8068_v63 = vld [vmem:[%s12086_s3 + $0x500] ss:$16 sps:$4 sm:$0xff]  }
 0x2a9   : > { %6570 = vmatpush2.bf16.msra.mxu1 %v8053_v52  ;;  %v1529_v21 = vpop.f32.mrf.mxu0  ;;  %v1722_v49 = vpop.f32.mrf.mxu1  ;;  %6530 = vmatprep.subr.bf16.mxu0 %v8058_v54  ;;  %v10384_v52 = vadd.f32 %v10271_v25, %v9746_v3  ;;  %v3018_v61 = vadd.f32 %v3017_v24, %v2536_v16  ;;  %v2566_v25 = vmax.f32 %v1524_v32, 0.0  ;;  %v10410_v13 = vadd.f32 %v10297_v1, %v9746_v3  ;;  %v8071_v4 = vld [vmem:[%s12086_s3 + $0x700] ss:$16 sps:$4 sm:$0xff]   ;;  %v8076_v1 = vld [vmem:[%s12086_s3 + $0x8e4] ss:$16 sps:$4 sm:$0xff]  }
 0x2aa   : > { %6571 = vmatprep.subr.bf16.mxu1 %v8061_v10  ;;  %v1530_v43 = vadd.f32 %v1529_v21, %v9778_v15  ;;  %v1723_v54 = vadd.f32 %v1722_v49, %v9803_v34  ;;  %v2956_v10 = vadd.f32 %v2955_v17, %v2534_v48  ;;  %v2924_v49 = vadd.f32 %v2923_v29, %v2517_v12  ;;  %v8079_v12 = vld [vmem:[%s12086_s3 + $0xae4] ss:$16 sps:$4 sm:$0xff]  }
 0x2ab   : > { %v10375_v53 = vpop.f32.mrf.mxu0  ;;  %v10377_v20 = vpop.f32.mrf.mxu1  ;;  %v3019_v21 = vadd.f32 %v3018_v61, %v2552_v35  ;;  %v2535_v51 = vmax.f32 %v10384_v52, 0.0  ;;  %v2551_v52 = vmax.f32 %v10410_v13, 0.0 }
 0x2ac   : > { %6531 = vmatpush2.bf16.msra.mxu0 %v8056_v44  ;;  %v2957_v8 = vadd.f32 %v2956_v10, %v2550_v58  ;;  %v2584_v48 = vmax.f32 %v1723_v54, 0.0  ;;  %v8074_v54 = vld [vmem:[%s12086_s3 + $0x8e0] ss:$16 sps:$4 sm:$0xff]  }
 0x2ad   : > { %6572 = vmatpush2.bf16.msra.mxu1 %v8059_v36  ;;  %v1533_v40 = vpop.f32.mrf.mxu0  ;;  %v1726_v18 = vpop.f32.mrf.mxu1  ;;  %6532 = vmatprep.subr.bf16.mxu0 %v8064_v55  ;;  %v2986_v36 = vadd.f32 %v2985_v7, %v2519_v37  ;;  %v2582_v55 = vmax.f32 %v1530_v43, 0.0  ;;  %v3020_v26 = vadd.f32 %v3019_v21, %v2568_v46  ;;  %v2925_v37 = vadd.f32 %v2924_v49, %v2533_v31  ;;  %v8080_v49 = vld [vmem:[%s12086_s3 + $0x8c0] ss:$16 sps:$4 sm:$0xff]  }
 0x2ae   : > { %6573 = vmatprep.subr.bf16.mxu1 %v8067_v60  ;;  %v1534_v39 = vadd.f32 %v1533_v40, %v9778_v15  ;;  %v1727_v62 = vadd.f32 %v1726_v18, %v9803_v34  ;;  %v10424_v60 = vadd.f32 %v10317_v28, %v9742_v22  ;;  %v2958_v29 = vadd.f32 %v2957_v8, %v2566_v25  ;;  %v8077_v25 = vld [vmem:[%s12086_s3 + $0xae0] ss:$16 sps:$4 sm:$0xff]  }
 0x2af   : > { %v10400_v11 = vpop.f32.mrf.mxu0  ;;  %v10402_v44 = vpop.f32.mrf.mxu1  ;;  %v2549_v28 = vmax.f32 %v10406_v2, 0.0  ;;  %v1715_v43 = vadd.f32 %v10319_v56, %v9746_v3  ;;  %v3021_v18 = vadd.f32 %v3020_v26, %v2584_v48  ;;  %v8082_v56 = vld [vmem:[%s12086_s3 + $0x8c4] ss:$16 sps:$4 sm:$0xff]   ;;  %v1528_v46 = vadd.f32 %v10350_v0, %v9742_v22 }
 0x2b0   : > { %6533 = vmatpush2.bf16.msra.mxu0 %v8062_v42  ;;  %v2598_v14 = vmax.f32 %v1534_v39, 0.0  ;;  %v2600_v17 = vmax.f32 %v1727_v62, 0.0  ;;  %v2959_v40 = vadd.f32 %v2958_v29, %v2582_v55  ;;  %v8085_v39 = vld [vmem:[%s12086_s3 + $0xac4] ss:$16 sps:$4 sm:$0xff]   ;;  %v2987_v62 = vadd.f32 %v2986_v36, %v2535_v51 }
 0x2b1   : > { %6574 = vmatpush2.bf16.msra.mxu1 %v8065_v38  ;;  %v1539_v16 = vpop.f32.mrf.mxu0  ;;  %v1732_v32 = vpop.f32.mrf.mxu1  ;;  %6534 = vmatprep.subr.bf16.mxu0 %v8070_v19  ;;  %v2565_v2 = vmax.f32 %v10424_v60, 0.0  ;;  %v1725_v36 = vadd.f32 %v10377_v20, %v9746_v3  ;;  %v2581_v60 = vmax.f32 %v1528_v46, 0.0  ;;  %v8091_v29 = vld [vmem:[%s12086_s3 + $0xaa4] ss:$16 sps:$4 sm:$0xff]   ;;  %v1538_v26 = vadd.f32 %v10400_v11, %v9742_v22 }
 0x2b2   : > { %6575 = vmatprep.subr.bf16.mxu1 %v8073_v57  ;;  %v1540_v24 = vadd.f32 %v1539_v16, %v9778_v15  ;;  %v1733_v58 = vadd.f32 %v1732_v32, %v9803_v34  ;;  %v1721_v57 = vadd.f32 %v10352_v23, %v9746_v3  ;;  %v2960_v13 = vadd.f32 %v2959_v40, %v2598_v14 }
 0x2b3   : > { %v10431_v35 = vpop.f32.mrf.mxu0  ;;  %v10433_v42 = vpop.f32.mrf.mxu1  ;;  %v3022_v8 = vadd.f32 %v3021_v18, %v2600_v17  ;;  %v2567_v23 = vmax.f32 %v1715_v43, 0.0  ;;  %v2988_v51 = vadd.f32 %v2987_v62, %v2551_v52  ;;  %v8086_v52 = vld [vmem:[%s12086_s3 + $0x8a0] ss:$16 sps:$4 sm:$0xff]  }
 0x2b4   : > { %6535 = vmatpush2.bf16.msra.mxu0 %v8068_v63  ;;  %v2614_v38 = vmax.f32 %v1540_v24, 0.0  ;;  %v2616_v19 = vmax.f32 %v1733_v58, 0.0  ;;  %v2583_v20 = vmax.f32 %v1721_v57, 0.0  ;;  %v1542_v11 = vadd.f32 %v10431_v35, %v9742_v22  ;;  %v8092_v57 = vld [vmem:[%s12086_s3 + $0x880] ss:$16 sps:$4 sm:$0xff]  }
 0x2b5   : > { %6576 = vmatpush2.bf16.msra.mxu1 %v8071_v4  ;;  %v1543_v10 = vpop.f32.mrf.mxu0  ;;  %v1736_v61 = vpop.f32.mrf.mxu1  ;;  %6586 = vmatprep.subr.bf16.mxu0 %v8076_v1  ;;  %v8088_v4 = vld [vmem:[%s12086_s3 + $0x8a4] ss:$16 sps:$4 sm:$0xff]   ;;  %v2926_v1 = vadd.f32 %v2925_v37, %v2549_v28  ;;  %v2989_v28 = vadd.f32 %v2988_v51, %v2567_v23 }
 0x2b6   : > { %v1544_v7 = vadd.f32 %v1543_v10, %v9778_v15  ;;  %v1737_v31 = vadd.f32 %v1736_v61, %v9803_v34  ;;  %6627 = vmatprep.subr.bf16.mxu1 %v8079_v12  ;;  %v1532_v15 = vadd.f32 %v10375_v53, %v9742_v22  ;;  %v2961_v55 = vadd.f32 %v2960_v13, %v2614_v38  ;;  %v8083_v53 = vld [vmem:[%s12086_s3 + $0xac0] ss:$16 sps:$4 sm:$0xff]   ;;  %v8097_v22 = vld [vmem:[%s12086_s3 + $0xa84] ss:$16 sps:$4 sm:$0xff]  }
 0x2b7   : > { %6537 = vmatmul.mubr.bf16.vlgmr.msra.gmra.mxu0 %v10321_v33  ;;  %v10459_v0 = vpop.f32.mrf.mxu0  ;;  %v10461_v21 = vpop.f32.mrf.mxu1  ;;  %v3023_v48 = vadd.f32 %v3022_v8, %v2616_v19  ;;  %v1731_v12 = vadd.f32 %v10402_v44, %v9746_v3  ;;  %v2927_v37 = vadd.f32 %v2926_v1, %v2565_v2  ;;  %v1735_v44 = vadd.f32 %v10433_v42, %v9746_v3  ;;  %v8089_v38 = vld [vmem:[%s12086_s3 + $0xaa0] ss:$16 sps:$4 sm:$0xff]   ;;  %v8094_v19 = vld [vmem:[%s12086_s3 + $0x884] ss:$16 sps:$4 sm:$0xff]  }
 0x2b8   : > { %v2630_v34 = vmax.f32 %v1544_v7, 0.0  ;;  %v2632_v63 = vmax.f32 %v1737_v31, 0.0  ;;  %6578 = vmatmul.mubr.bf16.vlgmr.msra.gmra.mxu1 %v10323_v47  ;;  %6587 = vmatpush1.bf16.msra.mxu0 %v8074_v54  ;;  %v2597_v43 = vmax.f32 %v1532_v15, 0.0  ;;  %v2599_v54 = vmax.f32 %v1725_v36, 0.0  ;;  %v8095_v8 = vld [vmem:[%s12086_s3 + $0xa80] ss:$16 sps:$4 sm:$0xff]  }
 0x2b9   : > { %6628 = vmatpush1.bf16.msra.mxu1 %v8077_v25  ;;  %v10471_v16 = vpop.f32.mrf.mxu0  ;;  %v10473_v32 = vpop.f32.mrf.mxu1  ;;  %6588 = vmatprep.subr.bf16.mxu0 %v8082_v56  ;;  %v2928_v10 = vadd.f32 %v2927_v37, %v2581_v60  ;;  %v2990_v61 = vadd.f32 %v2989_v28, %v2583_v20  ;;  %v2613_v3 = vmax.f32 %v1538_v26, 0.0  ;;  %v2615_v35 = vmax.f32 %v1731_v12, 0.0  ;;  %v8100_v23 = vld [vmem:[%s12086_s3 + $0x864] ss:$16 sps:$4 sm:$0xff]   ;;  %v8101_v20 = vld [vmem:[%s12086_s3 + $0xa60] ss:$16 sps:$4 sm:$0xff]  }
 0x2ba   : > { %6629 = vmatprep.subr.bf16.mxu1 %v8085_v39  ;;  %v2962_v14 = vadd.f32 %v2961_v55, %v2630_v34  ;;  %v3024_v17 = vadd.f32 %v3023_v48, %v2632_v63  ;;  %v2629_v39 = vmax.f32 %v1542_v11, 0.0  ;;  %v2631_v62 = vmax.f32 %v1735_v44, 0.0  ;;  %v8103_v15 = vld [vmem:[%s12086_s3 + $0xa64] ss:$16 sps:$4 sm:$0xff]   ;;  %v8104_v28 = vld [vmem:[%s12086_s3 + $0x840] ss:$16 sps:$4 sm:$0xff]  }
 0x2bb   : > { %v10488_v24 = vpop.f32.mrf.mxu0  ;;  %v10490_v58 = vpop.f32.mrf.mxu1  ;;  %v2929_v7 = vadd.f32 %v2928_v10, %v2597_v43  ;;  %v2991_v31 = vadd.f32 %v2990_v61, %v2599_v54  ;;  %v8109_v26 = vld [vmem:[%s12086_s3 + $0xa44] ss:$16 sps:$4 sm:$0xff]   ;;  %v8107_v44 = vld [vmem:[%s12086_s3 + $0xa40] ss:$16 sps:$4 sm:$0xff]  }
 0x2bc   : > { %6589 = vmatpush1.bf16.msra.mxu0 %v8080_v49  ;;  %v3254_v42 = vrot.slane %v2962_v14, 4  ;;  %v3266_v25 = vrot.slane %v3024_v17, 4  ;;  %v8139_v33 = vld [vmem:[%s12086_s3 + $0xba4] ss:$16 sps:$4 sm:$0xff]  }
 0x2bd   : > { %6630 = vmatpush1.bf16.msra.mxu1 %v8083_v53  ;;  %v10499_v40 = vpop.f32.mrf.mxu0  ;;  %v10501_v18 = vpop.f32.mrf.mxu1  ;;  %6590 = vmatprep.subr.bf16.mxu0 %v8088_v4  ;;  %v2930_v34 = vadd.f32 %v2929_v7, %v2613_v3  ;;  %v2992_v63 = vadd.f32 %v2991_v31, %v2615_v35  ;;  %v8098_v53 = vld [vmem:[%s12086_s3 + $0x860] ss:$16 sps:$4 sm:$0xff]  }
 0x2be   : > { %6631 = vmatprep.subr.bf16.mxu1 %v8091_v29  ;;  %v3255_v49 = vadd.f32 %v3254_v42, %v2962_v14  ;;  %v3267_v36 = vadd.f32 %v3266_v25, %v3024_v17  ;;  %v8106_v29 = vld [vmem:[%s12086_s3 + $0x844] ss:$16 sps:$4 sm:$0xff]   ;;  %v8110_v35 = vld [vmem:[%s12086_s3 + $0x820] ss:$16 sps:$4 sm:$0xff]  }
 0x2bf   : > { %v10512_v56 = vpop.f32.mrf.mxu0  ;;  %v10514_v46 = vpop.f32.mrf.mxu1  ;;  %v2931_v4 = vadd.f32 %v2930_v34, %v2629_v39  ;;  %v2993_v1 = vadd.f32 %v2992_v63, %v2631_v62  ;;  %v8113_v31 = vld [vmem:[%s12086_s3 + $0xa20] ss:$16 sps:$4 sm:$0xff]   ;;  %v8118_v39 = vld [vmem:[%s12086_s3 + $0x804] ss:$16 sps:$4 sm:$0xff]   ;;  %v12112_v34 = vsub.s32 4, %v9010_v5 }
 0x2c0   : > { %6591 = vmatpush1.bf16.msra.mxu0 %v8086_v52  ;;  %v3256_v12 = vrot.slane %v3255_v49, 2  ;;  %v3268_v14 = vrot.slane %v3267_v36, 2 }
 0x2c1   : > { %6632 = vmatpush1.bf16.msra.mxu1 %v8089_v38  ;;  %v10519_v2 = vpop.f32.mrf.mxu0  ;;  %v10521_v13 = vpop.f32.mrf.mxu1  ;;  %6592 = vmatprep.subr.bf16.mxu0 %v8094_v19  ;;  %v3248_v52 = vrot.slane %v2931_v4, 4  ;;  %v3260_v43 = vrot.slane %v2993_v1, 4  ;;  %v8112_v38 = vld [vmem:[%s12086_s3 + $0x824] ss:$16 sps:$4 sm:$0xff]  }
 0x2c2   : > { %6633 = vmatprep.subr.bf16.mxu1 %v8097_v22  ;;  %v8115_v19 = vld [vmem:[%s12086_s3 + $0xa24] ss:$16 sps:$4 sm:$0xff]   ;;  %v3257_v22 = vadd.f32 %v3256_v12, %v3255_v49  ;;  %v3269_v3 = vadd.f32 %v3268_v14, %v3267_v36  ;;  %v12113_v49 = vsub.s32 6, %v9010_v5 }
 0x2c3   : > { %v10532_v55 = vpop.f32.mrf.mxu0  ;;  %v10534_v48 = vpop.f32.mrf.mxu1  ;;  %v3249_v42 = vadd.f32 %v3248_v52, %v2931_v4  ;;  %v3261_v25 = vadd.f32 %v3260_v43, %v2993_v1  ;;  %v12114_v1 = vsub.s32 5, %v9010_v5 }
 0x2c4   : > { %6593 = vmatpush1.bf16.msra.mxu0 %v8092_v57  ;;  %v3258_v62 = vrot.slane %v3257_v22, 1 }
 0x2c5   : > { %6634 = vmatpush1.bf16.msra.mxu1 %v8095_v8  ;;  %v10539_v51 = vpop.f32.mrf.mxu0  ;;  %v10541_v60 = vpop.f32.mrf.mxu1  ;;  %6594 = vmatprep.subr.bf16.mxu0 %v8100_v23  ;;  %v3270_v8 = vrot.slane %v3269_v3, 1  ;;  %v8121_v23 = vld [vmem:[%s12086_s3 + $0xa04] ss:$16 sps:$4 sm:$0xff]   ;;  %v3250_v52 = vrot.slane %v3249_v42, 2  ;;  %v3262_v43 = vrot.slane %v3261_v25, 2 }
 0x2c6   : > { %6635 = vmatprep.subr.bf16.mxu1 %v8103_v15  ;;  %v8651_v15 = vld [vmem:[%s12085_s2 + $0x8] sm:$0xff]  ;;  %v3259_v12 = vadd.f32 %v3258_v62, %v3257_v22 }
 0x2c7   : > { %v10552_v17 = vpop.f32.mrf.mxu0  ;;  %v10554_v37 = vpop.f32.mrf.mxu1  ;;  %v10597_v63 = vrot.slane %v8651_v15, %v12112_v34  ;;  %v10601_v36 = vrot.slane %v8651_v15, %v12113_v49  ;;  %v3271_v14 = vadd.f32 %v3270_v8, %v3269_v3  ;;  %v8119_v3 = vld [vmem:[%s12086_s3 + $0xa00] ss:$16 sps:$4 sm:$0xff]  }
 0x2c8   : > { %6595 = vmatpush1.bf16.msra.mxu0 %v8098_v53 }
 0x2c9   : > { %6636 = vmatpush1.bf16.msra.mxu1 %v8101_v20  ;;  %v10559_v54 = vpop.f32.mrf.mxu0  ;;  %v10561_v11 = vpop.f32.mrf.mxu1  ;;  %6596 = vmatprep.subr.bf16.mxu0 %v8106_v29  ;;  %v10609_v20 = vrot.slane %v8651_v15, %v12114_v1  ;;  %v12115_v29 = vsub.s32 7, %v9010_v5  ;;  %v3307_v62 = vmul.f32 0.00390625, %v3271_v14  ;;  %v1967_v8 = vadd.f32 %v10461_v21, %v10601_v36  ;;  %v8122_v21 = vld [vmem:[%s12086_s3 + $0x9e0] ss:$16 sps:$4 sm:$0xff]  }
 0x2ca   : > { %6637 = vmatprep.subr.bf16.mxu1 %v8109_v26  ;;  %v3251_v1 = vadd.f32 %v3250_v52, %v3249_v42  ;;  %v1981_v59 = vadd.f32 %v10534_v48, %v10601_v36  ;;  %v8134_v48 = vld [vmem:[%s12086_s3 + $0x9a0] ss:$16 sps:$4 sm:$0xff]  }
 0x2cb   : > { %v10572_v10 = vpop.f32.mrf.mxu0  ;;  %v10574_v61 = vpop.f32.mrf.mxu1  ;;  %v10613_v26 = vrot.slane %v8651_v15, %v12115_v29  ;;  %v3263_v29 = vadd.f32 %v3262_v43, %v3261_v25  ;;  %v8133_v43 = vld [vmem:[%s12086_s3 + $0xbc4] ss:$16 sps:$4 sm:$0xff]  }
 0x2cc   : > { %6597 = vmatpush1.bf16.msra.mxu0 %v8104_v28  ;;  %v8116_v28 = vld [vmem:[%s12086_s3 + $0x800] ss:$16 sps:$4 sm:$0xff]  }
 0x2cd   : > { %6638 = vmatpush1.bf16.msra.mxu1 %v8107_v44  ;;  %v10579_v57 = vpop.f32.mrf.mxu0  ;;  %v10581_v7 = vpop.f32.mrf.mxu1  ;;  %6598 = vmatprep.subr.bf16.mxu0 %v8112_v38  ;;  %v10620_v44 = vadd.f32 %v10488_v24, %v10597_v63  ;;  %v10624_v38 = vadd.f32 %v10490_v58, %v10601_v36  ;;  %v1780_v24 = vadd.f32 %v10499_v40, %v10609_v20  ;;  %v8127_v40 = vld [vmem:[%s12086_s3 + $0xbe4] ss:$16 sps:$4 sm:$0xff]  }
 0x2ce   : > { %6639 = vmatprep.subr.bf16.mxu1 %v8115_v19  ;;  %v1973_v58 = vadd.f32 %v10501_v18, %v10613_v26  ;;  %v1776_v18 = vadd.f32 %v10471_v16, %v10609_v20  ;;  %v1979_v5 = vadd.f32 %v10521_v13, %v10613_v26  ;;  %v8136_v13 = vld [vmem:[%s12086_s3 + $0x9a4] ss:$16 sps:$4 sm:$0xff]  }
 0x2cf   : > { %v10603_v53 = vpop.f32.mrf.mxu0  ;;  %v10605_v4 = vpop.f32.mrf.mxu1  ;;  %v2153_v42 = vmax.f32 %v10620_v44, 0.0  ;;  %v2155_v25 = vmax.f32 %v10624_v38, 0.0  ;;  %v2154_v52 = vmax.f32 %v1780_v24, 0.0  ;;  %v1786_v44 = vadd.f32 %v10519_v2, %v10609_v20  ;;  %v8131_v2 = vld [vmem:[%s12086_s3 + $0xbc0] ss:$16 sps:$4 sm:$0xff]  }
 0x2d0   : > { %6599 = vmatpush1.bf16.msra.mxu0 %v8110_v35  ;;  %v8124_v35 = vld [vmem:[%s12086_s3 + $0x9e4] ss:$16 sps:$4 sm:$0xff]  }
 0x2d1   : > { %6640 = vmatpush1.bf16.msra.mxu1 %v8113_v31  ;;  %v10626_v19 = vpop.f32.mrf.mxu0  ;;  %v10628_v22 = vpop.f32.mrf.mxu1  ;;  %6600 = vmatprep.subr.bf16.mxu0 %v8118_v39  ;;  %v3305_v31 = vmul.f32 0.00390625, %v3259_v12  ;;  %v1774_v39 = vadd.f32 %v10459_v0, %v10597_v63  ;;  %v10657_v0 = vpack.c.bf16 %v3307_v62, %v3307_v62  ;;  %v1784_v12 = vadd.f32 %v10512_v56, %v10597_v63 }
 0x2d2   : > { %6641 = vmatprep.subr.bf16.mxu1 %v8121_v23  ;;  %v1969_v23 = vadd.f32 %v10473_v32, %v10613_v26  ;;  %v8125_v32 = vld [vmem:[%s12086_s3 + $0xbe0] ss:$16 sps:$4 sm:$0xff]   ;;  %v2156_v56 = vmax.f32 %v1973_v58, 0.0  ;;  %v2138_v58 = vmax.f32 %v1776_v18, 0.0 }
 0x2d3   : > { %v10644_v15 = vpop.f32.mrf.mxu0  ;;  %v10646_v34 = vpop.f32.mrf.mxu1  ;;  %v10655_v49 = vpack.c.bf16 %v3305_v31, %v3305_v31  ;;  %12117 = vst [vmem:[#allocation12_spill] sm:$0xff] %v10657_v0  ;;  %6659 = vmatprep.mubr.bf16.mxu1 %v10657_v0  ;;  %v1977_v31 = vadd.f32 %v10514_v46, %v10601_v36  ;;  %v8128_v46 = vld [vmem:[%s12086_s3 + $0x9c0] ss:$16 sps:$4 sm:$0xff]   ;;  %v2169_v0 = vmax.f32 %v1784_v12, 0.0 }
 0x2d4   : > { %6601 = vmatpush1.bf16.msra.mxu0 %v8116_v28  ;;  %v8130_v28 = vld [vmem:[%s12086_s3 + $0x9c4] ss:$16 sps:$4 sm:$0xff]   ;;  %v2140_v62 = vmax.f32 %v1969_v23, 0.0 }
 0x2d5   : > { %12116 = vst [vmem:[#allocation11_spill] sm:$0xff] %v10655_v49  ;;  %6642 = vmatpush1.bf16.msra.mxu1 %v8119_v3  ;;  %v10664_v14 = vpop.f32.mrf.mxu0  ;;  %v10666_v16 = vpop.f32.mrf.mxu1  ;;  %6602 = vmatprep.subr.bf16.mxu0 %v8124_v35  ;;  %v2137_v3 = vmax.f32 %v1774_v39, 0.0  ;;  %v2139_v35 = vmax.f32 %v1967_v8, 0.0  ;;  %v1788_v39 = vadd.f32 %v10532_v55, %v10597_v63  ;;  %v3252_v8 = vrot.slane %v3251_v1, 1 }
 0x2d6   : > { %6618 = vmatprep.mubr.bf16.mxu0 %v10655_v49  ;;  %6643 = vmatprep.subr.bf16.mxu1 %v8127_v40  ;;  %v3264_v40 = vrot.slane %v3263_v29, 1  ;;  %v3056_v49 = vadd.f32 %v2154_v52, %v2138_v58  ;;  %v3118_v47 = vadd.f32 %v2156_v56, %v2140_v62  ;;  %v2171_v12 = vmax.f32 %v1977_v31, 0.0 }
 0x2d7   : > { %v10685_v38 = vpop.f32.mrf.mxu0  ;;  %v10687_v24 = vpop.f32.mrf.mxu1  ;;  %v3025_v55 = vadd.f32 %v2153_v42, %v2137_v3  ;;  %v2172_v42 = vmax.f32 %v1979_v5, 0.0  ;;  %v1983_v52 = vadd.f32 %v10541_v60, %v10613_v26  ;;  %v1794_v56 = vadd.f32 %v10552_v17, %v10597_v63  ;;  %v8137_v60 = vld [vmem:[%s12086_s3 + $0xba0] ss:$16 sps:$4 sm:$0xff]   ;;  %v8142_v17 = vld [vmem:[%s12086_s3 + $0x984] ss:$16 sps:$4 sm:$0xff]  }
 0x2d8   : > { %6603 = vmatpush2.bf16.msra.mxu0 %v8122_v21  ;;  %v3087_v21 = vadd.f32 %v2155_v25, %v2139_v35  ;;  %v2185_v25 = vmax.f32 %v1788_v39, 0.0  ;;  %v10724_v3 = vadd.f32 %v3264_v40, %v3263_v29  ;;  %v1989_v29 = vadd.f32 %v10561_v11, %v10613_v26 }
 0x2d9   : > { %6644 = vmatpush2.bf16.msra.mxu1 %v8125_v32  ;;  %v10699_v18 = vpop.f32.mrf.mxu0  ;;  %v10701_v23 = vpop.f32.mrf.mxu1  ;;  %6604 = vmatprep.subr.bf16.mxu0 %v8130_v28  ;;  %v2170_v32 = vmax.f32 %v1786_v44, 0.0  ;;  %v1790_v28 = vadd.f32 %v10539_v51, %v10609_v20  ;;  %v3026_v51 = vadd.f32 %v3025_v55, %v2169_v0  ;;  %v1796_v0 = vadd.f32 %v10559_v54, %v10609_v20  ;;  %v8145_v44 = vld [vmem:[%s12086_s3 + $0xb84] ss:$16 sps:$4 sm:$0xff]  }
 0x2da   : > { %6645 = vmatprep.subr.bf16.mxu1 %v8133_v43  ;;  %v3253_v43 = vadd.f32 %v3252_v8, %v3251_v1  ;;  %v1987_v1 = vadd.f32 %v10554_v37, %v10601_v36  ;;  %v1798_v31 = vadd.f32 %v10572_v10, %v10597_v63  ;;  %v3088_v58 = vadd.f32 %v3087_v21, %v2171_v12  ;;  %v8143_v21 = vld [vmem:[%s12086_s3 + $0xb80] ss:$16 sps:$4 sm:$0xff]  }
 0x2db   : > { %v10713_v50 = vpop.f32.mrf.mxu0  ;;  %v10715_v45 = vpop.f32.mrf.mxu1  ;;  %v3057_v62 = vadd.f32 %v3056_v49, %v2170_v32  ;;  %v2187_v39 = vmax.f32 %v1981_v59, 0.0  ;;  %v3119_v54 = vadd.f32 %v3118_v47, %v2172_v42  ;;  %v3027_v8 = vadd.f32 %v3026_v51, %v2185_v25 }
 0x2dc   : > { %6605 = vmatpush2.bf16.msra.mxu0 %v8128_v46  ;;  %v2186_v46 = vmax.f32 %v1790_v28, 0.0  ;;  %v2188_v40 = vmax.f32 %v1983_v52, 0.0  ;;  %v2201_v11 = vmax.f32 %v1794_v56, 0.0  ;;  %v3304_v10 = vmul.f32 0.00390625, %v3253_v43 }
 0x2dd   : > { %6646 = vmatpush2.bf16.msra.mxu1 %v8131_v2  ;;  %v10726_v35 = vpop.f32.mrf.mxu0  ;;  %v10728_v5 = vpop.f32.mrf.mxu1  ;;  %6606 = vmatprep.subr.bf16.mxu0 %v8136_v13  ;;  %v1991_v13 = vadd.f32 %v10574_v61, %v10601_v36  ;;  %v1800_v59 = vadd.f32 %v10579_v57, %v10609_v20  ;;  %v1993_v49 = vadd.f32 %v10581_v7, %v10613_v26  ;;  %v8148_v61 = vld [vmem:[%s12086_s3 + $0x964] ss:$16 sps:$4 sm:$0xff]   ;;  %v2203_v12 = vmax.f32 %v1987_v1, 0.0 }
 0x2de   : > { %6647 = vmatprep.subr.bf16.mxu1 %v8139_v33  ;;  %v8140_v33 = vld [vmem:[%s12086_s3 + $0x980] ss:$16 sps:$4 sm:$0xff]   ;;  %v2202_v32 = vmax.f32 %v1796_v0, 0.0  ;;  %v2204_v57 = vmax.f32 %v1989_v29, 0.0  ;;  %v2217_v28 = vmax.f32 %v1798_v31, 0.0  ;;  %v3089_v42 = vadd.f32 %v3088_v58, %v2187_v39 }
 0x2df   : > { %v10747_v2 = vpop.f32.mrf.mxu0  ;;  %v10749_v37 = vpop.f32.mrf.mxu1  ;;  %v8151_v7 = vld [vmem:[%s12086_s3 + $0xb64] ss:$16 sps:$4 sm:$0xff]   ;;  %v3058_v25 = vadd.f32 %v3057_v62, %v2186_v46  ;;  %v1804_v52 = vadd.f32 %v10603_v53, %v10597_v63  ;;  %v1997_v56 = vadd.f32 %v10605_v4, %v10601_v36  ;;  %v3120_v51 = vadd.f32 %v3119_v54, %v2188_v40  ;;  %v8146_v53 = vld [vmem:[%s12086_s3 + $0x960] ss:$16 sps:$4 sm:$0xff]  }
 0x2e0   : > { %6607 = vmatpush2.bf16.msra.mxu0 %v8134_v48  ;;  %v1999_v1 = vadd.f32 %v10628_v22, %v10613_v26  ;;  %v8149_v4 = vld [vmem:[%s12086_s3 + $0xb60] ss:$16 sps:$4 sm:$0xff]   ;;  %v10791_v0 = vpack.c.bf16 %v3304_v10, %v3304_v10  ;;  %v2219_v29 = vmax.f32 %v1991_v13, 0.0  ;;  %v2218_v31 = vmax.f32 %v1800_v59, 0.0  ;;  %v8154_v22 = vld [vmem:[%s12086_s3 + $0x944] ss:$16 sps:$4 sm:$0xff]  }
 0x2e1   : > { %6648 = vmatpush2.bf16.msra.mxu1 %v8137_v60  ;;  %v10760_v47 = vpop.f32.mrf.mxu0  ;;  %v10762_v55 = vpop.f32.mrf.mxu1  ;;  %6608 = vmatprep.subr.bf16.mxu0 %v8142_v17  ;;  %v3028_v60 = vadd.f32 %v3027_v8, %v2201_v11  ;;  %v1806_v17 = vadd.f32 %v10626_v19, %v10609_v20  ;;  %v3090_v62 = vadd.f32 %v3089_v42, %v2203_v12  ;;  %v8157_v8 = vld [vmem:[%s12086_s3 + $0xb44] ss:$16 sps:$4 sm:$0xff]   ;;  %v2233_v40 = vmax.f32 %v1804_v52, 0.0 }
 0x2e2   : > { %6649 = vmatprep.subr.bf16.mxu1 %v8145_v44  ;;  %v2220_v44 = vmax.f32 %v1993_v49, 0.0  ;;  %v3059_v39 = vadd.f32 %v3058_v25, %v2202_v32  ;;  %v3121_v46 = vadd.f32 %v3120_v51, %v2204_v57  ;;  %v2235_v11 = vmax.f32 %v1997_v56, 0.0  ;;  %v8163_v51 = vld [vmem:[%s12086_s3 + $0xb24] ss:$16 sps:$4 sm:$0xff]  }
 0x2e3   : > { %v10777_v48 = vpop.f32.mrf.mxu0  ;;  %v10779_v43 = vpop.f32.mrf.mxu1  ;;  %v3029_v54 = vadd.f32 %v3028_v60, %v2217_v28  ;;  %v2001_v10 = vadd.f32 %v10646_v34, %v10601_v36  ;;  %v2234_v49 = vmax.f32 %v1806_v17, 0.0  ;;  %v2003_v12 = vadd.f32 %v10666_v16, %v10613_v26  ;;  %v8160_v16 = vld [vmem:[%s12086_s3 + $0x924] ss:$16 sps:$4 sm:$0xff]  }
 0x2e4   : > { %6609 = vmatpush2.bf16.msra.mxu0 %v8140_v33  ;;  %v1808_v33 = vadd.f32 %v10644_v15, %v10597_v63  ;;  %v8152_v15 = vld [vmem:[%s12086_s3 + $0x940] ss:$16 sps:$4 sm:$0xff]   ;;  %v3091_v32 = vadd.f32 %v3090_v62, %v2219_v29  ;;  %v3060_v57 = vadd.f32 %v3059_v39, %v2218_v31  ;;  %v3122_v34 = vadd.f32 %v3121_v46, %v2220_v44 }
 0x2e5   : > { %6650 = vmatpush2.bf16.msra.mxu1 %v8143_v21  ;;  %v10793_v58 = vpop.f32.mrf.mxu0  ;;  %v10795_v19 = vpop.f32.mrf.mxu1  ;;  %6610 = vmatprep.subr.bf16.mxu0 %v8148_v61  ;;  %v2236_v21 = vmax.f32 %v1999_v1, 0.0  ;;  %v1810_v61 = vadd.f32 %v10664_v14, %v10609_v20  ;;  %v8155_v14 = vld [vmem:[%s12086_s3 + $0xb40] ss:$16 sps:$4 sm:$0xff]   ;;  %v1814_v42 = vadd.f32 %v10685_v38, %v10597_v63  ;;  %v2007_v25 = vadd.f32 %v10687_v24, %v10601_v36 }
 0x2e6   : > { %6651 = vmatprep.subr.bf16.mxu1 %v8151_v7  ;;  %v1816_v52 = vadd.f32 %v10699_v18, %v10609_v20  ;;  %v2009_v56 = vadd.f32 %v10701_v23, %v10613_v26  ;;  %v3030_v60 = vadd.f32 %v3029_v54, %v2233_v40  ;;  %v3092_v17 = vadd.f32 %v3091_v32, %v2235_v11  ;;  %v8158_v23 = vld [vmem:[%s12086_s3 + $0x920] ss:$16 sps:$4 sm:$0xff]  }
 0x2e7   : > { %v10807_v13 = vpop.f32.mrf.mxu0  ;;  %v10809_v59 = vpop.f32.mrf.mxu1  ;;  %v2249_v1 = vmax.f32 %v1808_v33, 0.0  ;;  %v3061_v24 = vadd.f32 %v3060_v57, %v2234_v49  ;;  %v3123_v29 = vadd.f32 %v3122_v34, %v2236_v21  ;;  %v2250_v31 = vmax.f32 %v1810_v61, 0.0 }
 0x2e8   : > { %6611 = vmatpush2.bf16.msra.mxu0 %v8146_v53  ;;  %v2251_v53 = vmax.f32 %v2001_v10, 0.0  ;;  %v2252_v18 = vmax.f32 %v2003_v12, 0.0  ;;  %v3306_v44 = vmul.f32 0.00390625, %v10724_v3  ;;  %v2011_v62 = vadd.f32 %v10715_v45, %v10601_v36 }
 0x2e9   : > { %6652 = vmatpush2.bf16.msra.mxu1 %v8149_v4  ;;  %v10818_v28 = vpop.f32.mrf.mxu0  ;;  %v10820_v7 = vpop.f32.mrf.mxu1  ;;  %6612 = vmatprep.subr.bf16.mxu0 %v8154_v22  ;;  %v1818_v22 = vadd.f32 %v10713_v50, %v10597_v63  ;;  %v1820_v39 = vadd.f32 %v10726_v35, %v10609_v20  ;;  %v8166_v50 = vld [vmem:[%s12086_s3 + $0x904] ss:$16 sps:$4 sm:$0xff]   ;;  %v2265_v3 = vmax.f32 %v1814_v42, 0.0  ;;  %v2267_v40 = vmax.f32 %v2007_v25, 0.0 }
 0x2ea   : > { %6653 = vmatprep.subr.bf16.mxu1 %v8157_v8  ;;  %v8161_v8 = vld [vmem:[%s12086_s3 + $0xb20] ss:$16 sps:$4 sm:$0xff]   ;;  %v2266_v45 = vmax.f32 %v1816_v52, 0.0  ;;  %v2268_v11 = vmax.f32 %v2009_v56, 0.0  ;;  %v8169_v35 = vld [vmem:[%s12086_s3 + $0xb04] ss:$16 sps:$4 sm:$0xff]   ;;  %v3031_v33 = vadd.f32 %v3030_v60, %v2249_v1  ;;  %v3093_v10 = vadd.f32 %v3092_v17, %v2251_v53 }
 0x2eb   : > { %v10839_v4 = vpop.f32.mrf.mxu0  ;;  %v10841_v38 = vpop.f32.mrf.mxu1  ;;  %v2013_v49 = vadd.f32 %v10728_v5, %v10613_v26  ;;  %v1824_v21 = vadd.f32 %v10747_v2, %v10597_v63  ;;  %v3124_v32 = vadd.f32 %v3123_v29, %v2252_v18  ;;  %v2017_v57 = vadd.f32 %v10749_v37, %v10601_v36  ;;  %v8164_v5 = vld [vmem:[%s12086_s3 + $0x900] ss:$16 sps:$4 sm:$0xff]   ;;  %v8175_v1 = vld [vmem:[%s12086_s3 + $0xee4] ss:$16 sps:$4 sm:$0xff]  }
 0x2ec   : > { %6613 = vmatpush2.bf16.msra.mxu0 %v8152_v15  ;;  %v3062_v15 = vadd.f32 %v3061_v24, %v2250_v31  ;;  %v1826_v34 = vadd.f32 %v10760_v47, %v10609_v20  ;;  %v8167_v2 = vld [vmem:[%s12086_s3 + $0xb00] ss:$16 sps:$4 sm:$0xff]   ;;  %v2283_v42 = vmax.f32 %v2011_v62, 0.0  ;;  %v2282_v25 = vmax.f32 %v1820_v39, 0.0  ;;  %v8172_v47 = vld [vmem:[%s12086_s3 + $0xce4] ss:$16 sps:$4 sm:$0xff]  }
 0x2ed   : > { %6654 = vmatpush2.bf16.msra.mxu1 %v8155_v14  ;;  %v10853_v46 = vpop.f32.mrf.mxu0  ;;  %v10855_v54 = vpop.f32.mrf.mxu1  ;;  %6614 = vmatprep.subr.bf16.mxu0 %v8160_v16  ;;  %v10884_v14 = vpack.c.bf16 %v3306_v44, %v3306_v44  ;;  %v2281_v16 = vmax.f32 %v1818_v22, 0.0  ;;  %v3032_v56 = vadd.f32 %v3031_v33, %v2265_v3  ;;  %v3125_v17 = vadd.f32 %v3124_v32, %v2268_v11 }
 0x2ee   : > { %6655 = vmatprep.subr.bf16.mxu1 %v8163_v51  ;;  %v3094_v51 = vadd.f32 %v3093_v10, %v2267_v40  ;;  %v3063_v60 = vadd.f32 %v3062_v15, %v2266_v45  ;;  %v2284_v53 = vmax.f32 %v2013_v49, 0.0  ;;  %v2297_v24 = vmax.f32 %v1824_v21, 0.0  ;;  %v8181_v10 = vld [vmem:[%s12086_s3 + $0xec4] ss:$16 sps:$4 sm:$0xff]  }
 0x2ef   : > { %v10870_v61 = vpop.f32.mrf.mxu0  ;;  %v10872_v12 = vpop.f32.mrf.mxu1  ;;  %v2019_v29 = vadd.f32 %v10762_v55, %v10613_v26  ;;  %v1828_v31 = vadd.f32 %v10777_v48, %v10597_v63  ;;  %v2299_v44 = vmax.f32 %v2017_v57, 0.0  ;;  %v2298_v22 = vmax.f32 %v1826_v34, 0.0  ;;  %v8170_v55 = vld [vmem:[%s12086_s3 + $0xce0] ss:$16 sps:$4 sm:$0xff]  }
 0x2f0   : > { %6615 = vmatpush2.bf16.msra.mxu0 %v8158_v23  ;;  %v2021_v62 = vadd.f32 %v10779_v43, %v10601_v36  ;;  %v1830_v39 = vadd.f32 %v10793_v58, %v10609_v20  ;;  %v3064_v48 = vadd.f32 %v3063_v60, %v2282_v25  ;;  %v8173_v43 = vld [vmem:[%s12086_s3 + $0xee0] ss:$16 sps:$4 sm:$0xff]   ;;  %v8178_v58 = vld [vmem:[%s12086_s3 + $0xcc4] ss:$16 sps:$4 sm:$0xff]   ;;  %v2023_v45 = vadd.f32 %v10795_v19, %v10613_v26 }
 0x2f1   : > { %6656 = vmatpush2.bf16.msra.mxu1 %v8161_v8  ;;  %v10886_v52 = vpop.f32.mrf.mxu0  ;;  %v10888_v37 = vpop.f32.mrf.mxu1  ;;  %6616 = vmatprep.subr.bf16.mxu0 %v8166_v50  ;;  %v3033_v8 = vadd.f32 %v3032_v56, %v2281_v16  ;;  %v3095_v50 = vadd.f32 %v3094_v51, %v2283_v42  ;;  %v1834_v11 = vadd.f32 %v10807_v13, %v10597_v63  ;;  %v2300_v15 = vmax.f32 %v2019_v29, 0.0  ;;  %v8179_v56 = vld [vmem:[%s12086_s3 + $0xec0] ss:$16 sps:$4 sm:$0xff]  }
 0x2f2   : > { %6657 = vmatprep.subr.bf16.mxu1 %v8169_v35  ;;  %v2027_v35 = vadd.f32 %v10809_v59, %v10601_v36  ;;  %v1836_v33 = vadd.f32 %v10818_v28, %v10609_v20  ;;  %v3126_v49 = vadd.f32 %v3125_v17, %v2284_v53  ;;  %v2313_v32 = vmax.f32 %v1828_v31, 0.0  ;;  %v8176_v28 = vld [vmem:[%s12086_s3 + $0xcc0] ss:$16 sps:$4 sm:$0xff]  }
 0x2f3   : > { %v10900_v18 = vpop.f32.mrf.mxu0  ;;  %v10902_v23 = vpop.f32.mrf.mxu1  ;;  %v3034_v21 = vadd.f32 %v3033_v8, %v2297_v24  ;;  %v3096_v57 = vadd.f32 %v3095_v50, %v2299_v44  ;;  %v3065_v59 = vadd.f32 %v3064_v48, %v2298_v22  ;;  %v2315_v34 = vmax.f32 %v2021_v62, 0.0 }
 0x2f4   : > { %6617 = vmatpush2.bf16.msra.mxu0 %v8164_v5  ;;  %v2314_v5 = vmax.f32 %v1830_v39, 0.0  ;;  %v1838_v16 = vadd.f32 %v10839_v4, %v10597_v63  ;;  %v2031_v42 = vadd.f32 %v10841_v38, %v10601_v36  ;;  %v2316_v51 = vmax.f32 %v2023_v45, 0.0  ;;  %v8187_v38 = vld [vmem:[%s12086_s3 + $0xea4] ss:$16 sps:$4 sm:$0xff]  }
 0x2f5   : > { %6658 = vmatpush2.bf16.msra.mxu1 %v8167_v2  ;;  %v10911_v3 = vpop.f32.mrf.mxu0  ;;  %v10913_v40 = vpop.f32.mrf.mxu1  ;;  %6668 = vmatprep.subr.bf16.mxu0 %v8172_v47  ;;  %v2029_v2 = vadd.f32 %v10820_v7, %v10613_v26  ;;  %v8184_v7 = vld [vmem:[%s12086_s3 + $0xca4] ss:$16 sps:$4 sm:$0xff]   ;;  %v2329_v60 = vmax.f32 %v1834_v11, 0.0  ;;  %v2331_v4 = vmax.f32 %v2027_v35, 0.0  ;;  %v2330_v17 = vmax.f32 %v1836_v33, 0.0 }
 0x2f6   : > { %6709 = vmatprep.subr.bf16.mxu1 %v8175_v1  ;;  %v3127_v1 = vadd.f32 %v3126_v49, %v2300_v15  ;;  %v3035_v53 = vadd.f32 %v3034_v21, %v2313_v32  ;;  %v1840_v24 = vadd.f32 %v10853_v46, %v10609_v20  ;;  %v2033_v29 = vadd.f32 %v10855_v54, %v10613_v26  ;;  %v8182_v46 = vld [vmem:[%s12086_s3 + $0xca0] ss:$16 sps:$4 sm:$0xff]   ;;  %v8193_v33 = vld [vmem:[%s12086_s3 + $0xe84] ss:$16 sps:$4 sm:$0xff]  }
 0x2f7   : > { %6619 = vmatmul.mubr.bf16.vlgmr.msra.gmra.mxu0 %v10791_v0  ;;  %v10933_v19 = vpop.f32.mrf.mxu0  ;;  %v10935_v13 = vpop.f32.mrf.mxu1  ;;  %v3097_v22 = vadd.f32 %v3096_v57, %v2315_v34  ;;  %v3066_v62 = vadd.f32 %v3065_v59, %v2314_v5  ;;  %v1844_v39 = vadd.f32 %v10870_v61, %v10597_v63  ;;  %v8185_v54 = vld [vmem:[%s12086_s3 + $0xea0] ss:$16 sps:$4 sm:$0xff]   ;;  %v2332_v8 = vmax.f32 %v2029_v2, 0.0  ;;  %v8190_v61 = vld [vmem:[%s12086_s3 + $0xc84] ss:$16 sps:$4 sm:$0xff]  }
 0x2f8   : > { %6660 = vmatmul.mubr.bf16.vlgmr.msra.gmra.mxu1 %v10884_v14  ;;  %6669 = vmatpush1.bf16.msra.mxu0 %v8170_v55  ;;  %v2037_v55 = vadd.f32 %v10872_v12, %v10601_v36  ;;  %v2345_v50 = vmax.f32 %v1838_v16, 0.0  ;;  %v2347_v48 = vmax.f32 %v2031_v42, 0.0  ;;  %v3128_v12 = vadd.f32 %v3127_v1, %v2316_v51  ;;  %v8188_v2 = vld [vmem:[%s12086_s3 + $0xc80] ss:$16 sps:$4 sm:$0xff]  }
 0x2f9   : > { %v10947_v25 = vpop.f32.mrf.mxu0  ;;  %v10949_v47 = vpop.f32.mrf.mxu1  ;;  %6710 = vmatpush1.bf16.msra.mxu1 %v8173_v43  ;;  %6670 = vmatprep.subr.bf16.mxu0 %v8178_v58  ;;  %v3036_v45 = vadd.f32 %v3035_v53, %v2329_v60  ;;  %v3098_v11 = vadd.f32 %v3097_v22, %v2331_v4  ;;  %v3067_v35 = vadd.f32 %v3066_v62, %v2330_v17  ;;  %v2348_v49 = vmax.f32 %v2033_v29, 0.0  ;;  %v8199_v17 = vld [vmem:[%s12086_s3 + $0xe64] ss:$16 sps:$4 sm:$0xff]  }
 0x2fa   : > { %6711 = vmatprep.subr.bf16.mxu1 %v8181_v10  ;;  %v2346_v10 = vmax.f32 %v1840_v24, 0.0  ;;  %v1846_v21 = vadd.f32 %v10886_v52, %v10609_v20  ;;  %v2039_v15 = vadd.f32 %v10888_v37, %v10613_v26  ;;  %v2361_v59 = vmax.f32 %v1844_v39, 0.0 }
 0x2fb   : > { %v10964_v31 = vpop.f32.mrf.mxu0  ;;  %v10966_v44 = vpop.f32.mrf.mxu1  ;;  %v2363_v34 = vmax.f32 %v2037_v55, 0.0  ;;  %v1848_v5 = vadd.f32 %v10900_v18, %v10597_v63  ;;  %v3129_v52 = vadd.f32 %v3128_v12, %v2332_v8  ;;  %v3037_v16 = vadd.f32 %v3036_v45, %v2345_v50  ;;  %v8191_v18 = vld [vmem:[%s12086_s3 + $0xe80] ss:$16 sps:$4 sm:$0xff]  }
 0x2fc   : > { %6671 = vmatpush1.bf16.msra.mxu0 %v8176_v28  ;;  %v2041_v28 = vadd.f32 %v10902_v23, %v10601_v36  ;;  %v3099_v42 = vadd.f32 %v3098_v11, %v2347_v48  ;;  %v8196_v23 = vld [vmem:[%s12086_s3 + $0xc64] ss:$16 sps:$4 sm:$0xff]   ;;  %v2043_v51 = vadd.f32 %v10913_v40, %v10613_v26  ;;  %v1854_v60 = vadd.f32 %v10933_v19, %v10597_v63  ;;  %v8194_v19 = vld [vmem:[%s12086_s3 + $0xc60] ss:$16 sps:$4 sm:$0xff]  }
 0x2fd   : > { %v10978_v43 = vpop.f32.mrf.mxu0  ;;  %v10980_v58 = vpop.f32.mrf.mxu1  ;;  %6712 = vmatpush1.bf16.msra.mxu1 %v8179_v56  ;;  %6672 = vmatprep.subr.bf16.mxu0 %v8184_v7  ;;  %v1850_v7 = vadd.f32 %v10911_v3, %v10609_v20  ;;  %v2047_v4 = vadd.f32 %v10935_v13, %v10601_v36  ;;  %v3130_v1 = vadd.f32 %v3129_v52, %v2348_v49  ;;  %v2362_v53 = vmax.f32 %v1846_v21, 0.0  ;;  %v8197_v50 = vld [vmem:[%s12086_s3 + $0xe60] ss:$16 sps:$4 sm:$0xff]   ;;  %v8202_v48 = vld [vmem:[%s12086_s3 + $0xc44] ss:$16 sps:$4 sm:$0xff]  }
 0x2fe   : > { %6713 = vmatprep.subr.bf16.mxu1 %v8187_v38  ;;  %v3068_v38 = vadd.f32 %v3067_v35, %v2346_v10  ;;  %v2364_v24 = vmax.f32 %v2039_v15, 0.0  ;;  %v3038_v22 = vadd.f32 %v3037_v16, %v2361_v59  ;;  %v3100_v40 = vadd.f32 %v3099_v42, %v2363_v34 }
 0x2ff   : > { %v1863_v32 = vpop.f32.mrf.mxu0  ;;  %v10992_v57 = vpop.f32.mrf.mxu1  ;;  %v2377_v62 = vmax.f32 %v1848_v5, 0.0  ;;  %v2379_v39 = vmax.f32 %v2041_v28, 0.0  ;;  %v1856_v13 = vadd.f32 %v10947_v25, %v10609_v20  ;;  %v2049_v55 = vadd.f32 %v10949_v47, %v10613_v26  ;;  %v8205_v47 = vld [vmem:[%s12086_s3 + $0xe44] ss:$16 sps:$4 sm:$0xff]   ;;  %v8200_v5 = vld [vmem:[%s12086_s3 + $0xc40] ss:$16 sps:$4 sm:$0xff]  }
 0x300   : > { %6673 = vmatpush1.bf16.msra.mxu0 %v8182_v46  ;;  %v1858_v46 = vadd.f32 %v10964_v31, %v10597_v63  ;;  %v2380_v25 = vmax.f32 %v2043_v51, 0.0  ;;  %v2393_v12 = vmax.f32 %v1854_v60, 0.0  ;;  %v2395_v45 = vmax.f32 %v2047_v4, 0.0 }
 0x301   : > { %v11001_v37 = vpop.f32.mrf.mxu0  ;;  %v11003_v56 = vpop.f32.mrf.mxu1  ;;  %6714 = vmatpush1.bf16.msra.mxu1 %v8185_v54  ;;  %6674 = vmatprep.subr.bf16.mxu0 %v8190_v61  ;;  %v2378_v61 = vmax.f32 %v1850_v7, 0.0  ;;  %v3069_v31 = vadd.f32 %v3068_v38, %v2362_v53  ;;  %v3131_v11 = vadd.f32 %v3130_v1, %v2364_v24  ;;  %v2051_v35 = vadd.f32 %v10966_v44, %v10601_v36  ;;  %v8203_v44 = vld [vmem:[%s12086_s3 + $0xe40] ss:$16 sps:$4 sm:$0xff]   ;;  %v8211_v7 = vld [vmem:[%s12086_s3 + $0xe24] ss:$16 sps:$4 sm:$0xff]  }
 0x302   : > { %6715 = vmatprep.subr.bf16.mxu1 %v8193_v33  ;;  %v1860_v33 = vadd.f32 %v10978_v43, %v10609_v20  ;;  %v3039_v21 = vadd.f32 %v3038_v22, %v2377_v62  ;;  %v3101_v15 = vadd.f32 %v3100_v40, %v2379_v39  ;;  %v2053_v59 = vadd.f32 %v10980_v58, %v10613_v26  ;;  %v8208_v58 = vld [vmem:[%s12086_s3 + $0xc24] ss:$16 sps:$4 sm:$0xff]   ;;  %v8206_v62 = vld [vmem:[%s12086_s3 + $0xc20] ss:$16 sps:$4 sm:$0xff]  }
 0x303   : > { %v1867_v29 = vpop.f32.mrf.mxu0  ;;  %v11022_v3 = vpop.f32.mrf.mxu1  ;;  %v1864_v34 = vadd.f32 %v1863_v32, %v10597_v63  ;;  %v2394_v28 = vmax.f32 %v1856_v13, 0.0  ;;  %v2396_v43 = vmax.f32 %v2049_v55, 0.0  ;;  %v3070_v32 = vadd.f32 %v3069_v31, %v2378_v61  ;;  %v8217_v61 = vld [vmem:[%s12086_s3 + $0xe04] ss:$16 sps:$4 sm:$0xff]  }
 0x304   : > { %6675 = vmatpush1.bf16.msra.mxu0 %v8188_v2  ;;  %v2409_v2 = vmax.f32 %v1858_v46, 0.0  ;;  %v3132_v42 = vadd.f32 %v3131_v11, %v2380_v25  ;;  %v2411_v51 = vmax.f32 %v2051_v35, 0.0  ;;  %v2410_v60 = vmax.f32 %v1860_v33, 0.0 }
 0x305   : > { %v1869_v54 = vpop.f32.mrf.mxu0  ;;  %v2062_v8 = vpop.f32.mrf.mxu1  ;;  %6716 = vmatpush1.bf16.msra.mxu1 %v8191_v18  ;;  %6676 = vmatprep.subr.bf16.mxu0 %v8196_v23  ;;  %v3040_v18 = vadd.f32 %v3039_v21, %v2393_v12  ;;  %v3102_v23 = vadd.f32 %v3101_v15, %v2395_v45  ;;  %v2057_v4 = vadd.f32 %v10992_v57, %v10601_v36  ;;  %v2412_v53 = vmax.f32 %v2053_v59, 0.0 }
 0x306   : > { %6717 = vmatprep.subr.bf16.mxu1 %v8199_v17  ;;  %v1866_v17 = vadd.f32 %v11001_v37, %v10609_v20  ;;  %v2425_v24 = vmax.f32 %v1864_v34, 0.0  ;;  %v2059_v22 = vadd.f32 %v11003_v56, %v10613_v26  ;;  %v1868_v40 = vadd.f32 %v1867_v29, %v10597_v63  ;;  %v8209_v37 = vld [vmem:[%s12086_s3 + $0xe20] ss:$16 sps:$4 sm:$0xff]   ;;  %v8214_v56 = vld [vmem:[%s12086_s3 + $0xc04] ss:$16 sps:$4 sm:$0xff]  }
 0x307   : > { %v1873_v10 = vpop.f32.mrf.mxu0  ;;  %v2066_v49 = vpop.f32.mrf.mxu1  ;;  %v3071_v39 = vadd.f32 %v3070_v32, %v2394_v28  ;;  %v3041_v57 = vadd.f32 %v3040_v18, %v2409_v2  ;;  %v2061_v29 = vadd.f32 %v11022_v3, %v10601_v36  ;;  %v1870_v46 = vadd.f32 %v1869_v54, %v10609_v20  ;;  %v8212_v54 = vld [vmem:[%s12086_s3 + $0xc00] ss:$16 sps:$4 sm:$0xff]  }
 0x308   : > { %6677 = vmatpush1.bf16.msra.mxu0 %v8194_v19  ;;  %v3133_v19 = vadd.f32 %v3132_v42, %v2396_v43  ;;  %v3103_v25 = vadd.f32 %v3102_v23, %v2411_v51  ;;  %v2427_v45 = vmax.f32 %v2057_v4, 0.0  ;;  %v2428_v3 = vmax.f32 %v2059_v22, 0.0 }
 0x309   : > { %v1875_v52 = vpop.f32.mrf.mxu0  ;;  %v2068_v16 = vpop.f32.mrf.mxu1  ;;  %6718 = vmatpush1.bf16.msra.mxu1 %v8197_v50  ;;  %6678 = vmatprep.subr.bf16.mxu0 %v8202_v48  ;;  %v2063_v50 = vadd.f32 %v2062_v8, %v10613_v26  ;;  %v1874_v48 = vadd.f32 %v1873_v10, %v10597_v63  ;;  %v3072_v12 = vadd.f32 %v3071_v39, %v2410_v60  ;;  %v2441_v21 = vmax.f32 %v1868_v40, 0.0 }
 0x30a   : > { %6719 = vmatprep.subr.bf16.mxu1 %v8205_v47  ;;  %v2426_v47 = vmax.f32 %v1866_v17, 0.0  ;;  %v3134_v35 = vadd.f32 %v3133_v19, %v2412_v53  ;;  %v3042_v33 = vadd.f32 %v3041_v57, %v2425_v24  ;;  %v2067_v8 = vadd.f32 %v2066_v49, %v10601_v36  ;;  %v8218_v17 = vld [vmem:[%s12086_s3 + $0xde0] ss:$16 sps:$4 sm:$0xff]  }
 0x30b   : > { %v1877_v38 = vpop.f32.mrf.mxu0  ;;  %v2070_v1 = vpop.f32.mrf.mxu1  ;;  %v1876_v10 = vadd.f32 %v1875_v52, %v10609_v20  ;;  %v2069_v15 = vadd.f32 %v2068_v16, %v10613_v26  ;;  %v2443_v28 = vmax.f32 %v2061_v29, 0.0  ;;  %v2442_v43 = vmax.f32 %v1870_v46, 0.0  ;;  %v8223_v52 = vld [vmem:[%s12086_s3 + $0xfe4] ss:$16 sps:$4 sm:$0xff]   ;;  %v8221_v53 = vld [vmem:[%s12086_s3 + $0xfe0] ss:$16 sps:$4 sm:$0xff]  }
 0x30c   : > { %6679 = vmatpush1.bf16.msra.mxu0 %v8200_v5  ;;  %v8215_v5 = vld [vmem:[%s12086_s3 + $0xe00] ss:$16 sps:$4 sm:$0xff]   ;;  %v2444_v2 = vmax.f32 %v2063_v50, 0.0  ;;  %v2457_v49 = vmax.f32 %v1874_v48, 0.0  ;;  %v3104_v16 = vadd.f32 %v3103_v25, %v2427_v45  ;;  %v1878_v32 = vadd.f32 %v1877_v38, %v10597_v63 }
 0x30d   : > { %v1879_v13 = vpop.f32.mrf.mxu0  ;;  %v2072_v55 = vpop.f32.mrf.mxu1  ;;  %6720 = vmatpush1.bf16.msra.mxu1 %v8203_v44  ;;  %6680 = vmatprep.subr.bf16.mxu0 %v8208_v58  ;;  %v8220_v44 = vld [vmem:[%s12086_s3 + $0xde4] ss:$16 sps:$4 sm:$0xff]   ;;  %v3073_v58 = vadd.f32 %v3072_v12, %v2426_v47  ;;  %v2071_v42 = vadd.f32 %v2070_v1, %v10601_v36  ;;  %v3043_v51 = vadd.f32 %v3042_v33, %v2441_v21  ;;  %v2459_v38 = vmax.f32 %v2067_v8, 0.0  ;;  %v8224_v47 = vld [vmem:[%s12086_s3 + $0xdc0] ss:$16 sps:$4 sm:$0xff]  }
 0x30e   : > { %6721 = vmatprep.subr.bf16.mxu1 %v8211_v7  ;;  %v3135_v7 = vadd.f32 %v3134_v35, %v2428_v3  ;;  %v1880_v60 = vadd.f32 %v1879_v13, %v10609_v20  ;;  %v2073_v4 = vadd.f32 %v2072_v55, %v10613_v26  ;;  %v2458_v24 = vmax.f32 %v1876_v10, 0.0  ;;  %v8229_v55 = vld [vmem:[%s12086_s3 + $0xfc4] ss:$16 sps:$4 sm:$0xff]  }
 0x30f   : > { %v1883_v31 = vpop.f32.mrf.mxu0  ;;  %v2076_v11 = vpop.f32.mrf.mxu1  ;;  %v2460_v1 = vmax.f32 %v2069_v15, 0.0  ;;  %v3105_v39 = vadd.f32 %v3104_v16, %v2443_v28  ;;  %v3074_v19 = vadd.f32 %v3073_v58, %v2442_v43  ;;  %v3044_v13 = vadd.f32 %v3043_v51, %v2457_v49 }
 0x310   : > { %6681 = vmatpush1.bf16.msra.mxu0 %v8206_v62  ;;  %v8226_v62 = vld [vmem:[%s12086_s3 + $0xdc4] ss:$16 sps:$4 sm:$0xff]   ;;  %v3136_v57 = vadd.f32 %v3135_v7, %v2444_v2  ;;  %v1884_v29 = vadd.f32 %v1883_v31, %v10597_v63  ;;  %v2077_v46 = vadd.f32 %v2076_v11, %v10601_v36  ;;  %v2476_v25 = vmax.f32 %v2073_v4, 0.0  ;;  %v8227_v11 = vld [vmem:[%s12086_s3 + $0xfc0] ss:$16 sps:$4 sm:$0xff]  }
 0x311   : > { %v1885_v59 = vpop.f32.mrf.mxu0  ;;  %v2078_v34 = vpop.f32.mrf.mxu1  ;;  %6722 = vmatpush1.bf16.msra.mxu1 %v8209_v37  ;;  %6682 = vmatprep.subr.bf16.mxu0 %v8214_v56  ;;  %v2473_v37 = vmax.f32 %v1878_v32, 0.0  ;;  %v2475_v56 = vmax.f32 %v2071_v42, 0.0  ;;  %v3106_v35 = vadd.f32 %v3105_v39, %v2459_v38  ;;  %v3075_v33 = vadd.f32 %v3074_v19, %v2458_v24  ;;  %v8230_v42 = vld [vmem:[%s12086_s3 + $0xda0] ss:$16 sps:$4 sm:$0xff]  }
 0x312   : > { %6723 = vmatprep.subr.bf16.mxu1 %v8217_v61  ;;  %v2474_v61 = vmax.f32 %v1880_v60, 0.0  ;;  %v1886_v12 = vadd.f32 %v1885_v59, %v10609_v20  ;;  %v2079_v45 = vadd.f32 %v2078_v34, %v10613_v26  ;;  %v3137_v3 = vadd.f32 %v3136_v57, %v2460_v1  ;;  %v8235_v34 = vld [vmem:[%s12086_s3 + $0xfa4] ss:$16 sps:$4 sm:$0xff]   ;;  %v8233_v4 = vld [vmem:[%s12086_s3 + $0xfa0] ss:$16 sps:$4 sm:$0xff]  }
 0x313   : > { %v1887_v18 = vpop.f32.mrf.mxu0  ;;  %v2080_v23 = vpop.f32.mrf.mxu1  ;;  %v2489_v28 = vmax.f32 %v1884_v29, 0.0  ;;  %v2491_v43 = vmax.f32 %v2077_v46, 0.0  ;;  %v8236_v46 = vld [vmem:[%s12086_s3 + $0xd80] ss:$16 sps:$4 sm:$0xff]  }
 0x314   : > { %6683 = vmatpush1.bf16.msra.mxu0 %v8212_v54  ;;  %v8232_v54 = vld [vmem:[%s12086_s3 + $0xda4] ss:$16 sps:$4 sm:$0xff]   ;;  %v1888_v8 = vadd.f32 %v1887_v18, %v10597_v63  ;;  %v2081_v10 = vadd.f32 %v2080_v23, %v10601_v36  ;;  %v3138_v16 = vadd.f32 %v3137_v3, %v2476_v25  ;;  %v2490_v58 = vmax.f32 %v1886_v12, 0.0 }
 0x315   : > { %v1889_v22 = vpop.f32.mrf.mxu0  ;;  %v2082_v40 = vpop.f32.mrf.mxu1  ;;  %6724 = vmatpush1.bf16.msra.mxu1 %v8215_v5  ;;  %6684 = vmatprep.subr.bf16.mxu0 %v8220_v44  ;;  %v3045_v5 = vadd.f32 %v3044_v13, %v2473_v37  ;;  %v3107_v44 = vadd.f32 %v3106_v35, %v2475_v56  ;;  %v2492_v32 = vmax.f32 %v2079_v45, 0.0 }
 0x316   : > { %6725 = vmatprep.subr.bf16.mxu1 %v8223_v52  ;;  %v1890_v15 = vadd.f32 %v1889_v22, %v10609_v20  ;;  %v2083_v59 = vadd.f32 %v2082_v40, %v10613_v26  ;;  %v3076_v52 = vadd.f32 %v3075_v33, %v2474_v61  ;;  %v2507_v38 = vmax.f32 %v2081_v10, 0.0  ;;  %v8241_v22 = vld [vmem:[%s12086_s3 + $0xf84] ss:$16 sps:$4 sm:$0xff]  }
 0x317   : > { %v1893_v50 = vpop.f32.mrf.mxu0  ;;  %v2086_v48 = vpop.f32.mrf.mxu1  ;;  %v3046_v40 = vadd.f32 %v3045_v5, %v2489_v28  ;;  %v3139_v37 = vadd.f32 %v3138_v16, %v2492_v32  ;;  %v8245_v32 = vld [vmem:[%s12086_s3 + $0xf60] ss:$16 sps:$4 sm:$0xff]  }
 0x318   : > { %6685 = vmatpush2.bf16.msra.mxu0 %v8218_v17  ;;  %v1894_v18 = vadd.f32 %v1893_v50, %v10597_v63  ;;  %v2087_v23 = vadd.f32 %v2086_v48, %v10601_v36  ;;  %v8238_v17 = vld [vmem:[%s12086_s3 + $0xd84] ss:$16 sps:$4 sm:$0xff]   ;;  %v2506_v24 = vmax.f32 %v1890_v15, 0.0  ;;  %v2508_v1 = vmax.f32 %v2083_v59, 0.0  ;;  %v8239_v50 = vld [vmem:[%s12086_s3 + $0xf80] ss:$16 sps:$4 sm:$0xff]  }
 0x319   : > { %v1895_v21 = vpop.f32.mrf.mxu0  ;;  %v2088_v31 = vpop.f32.mrf.mxu1  ;;  %6726 = vmatpush2.bf16.msra.mxu1 %v8221_v53  ;;  %6686 = vmatprep.subr.bf16.mxu0 %v8226_v62  ;;  %v2505_v53 = vmax.f32 %v1888_v8, 0.0  ;;  %v3108_v62 = vadd.f32 %v3107_v44, %v2491_v43  ;;  %v8242_v43 = vld [vmem:[%s12086_s3 + $0xd60] ss:$16 sps:$4 sm:$0xff]  }
 0x31a   : > { %6727 = vmatprep.subr.bf16.mxu1 %v8229_v55  ;;  %v1896_v7 = vadd.f32 %v1895_v21, %v10609_v20  ;;  %v2089_v39 = vadd.f32 %v2088_v31, %v10613_v26  ;;  %v3077_v55 = vadd.f32 %v3076_v52, %v2490_v58  ;;  %v2521_v48 = vmax.f32 %v1894_v18, 0.0  ;;  %v8247_v31 = vld [vmem:[%s12086_s3 + $0xf64] ss:$16 sps:$4 sm:$0xff]  }
 0x31b   : > { %v1897_v2 = vpop.f32.mrf.mxu0  ;;  %v2090_v49 = vpop.f32.mrf.mxu1  ;;  %v2523_v61 = vmax.f32 %v2087_v23, 0.0  ;;  %v3047_v35 = vadd.f32 %v3046_v40, %v2505_v53  ;;  %v3109_v33 = vadd.f32 %v3108_v62, %v2507_v38  ;;  %v3140_v21 = vadd.f32 %v3139_v37, %v2508_v1 }
 0x31c   : > { %6687 = vmatpush2.bf16.msra.mxu0 %v8224_v47  ;;  %v1898_v19 = vadd.f32 %v1897_v2, %v10597_v63  ;;  %v2091_v56 = vadd.f32 %v2090_v49, %v10601_v36  ;;  %v2522_v25 = vmax.f32 %v1896_v7, 0.0  ;;  %v8244_v47 = vld [vmem:[%s12086_s3 + $0xd64] ss:$16 sps:$4 sm:$0xff]   ;;  %v3078_v3 = vadd.f32 %v3077_v55, %v2506_v24 }
 0x31d   : > { %v1899_v51 = vpop.f32.mrf.mxu0  ;;  %v2092_v60 = vpop.f32.mrf.mxu1  ;;  %6728 = vmatpush2.bf16.msra.mxu1 %v8227_v11  ;;  %6688 = vmatprep.subr.bf16.mxu0 %v8232_v54  ;;  %v2524_v11 = vmax.f32 %v2089_v39, 0.0  ;;  %v3048_v2 = vadd.f32 %v3047_v35, %v2521_v48  ;;  %v3110_v49 = vadd.f32 %v3109_v33, %v2523_v61 }
 0x31e   : > { %6729 = vmatprep.subr.bf16.mxu1 %v8235_v34  ;;  %v1900_v29 = vadd.f32 %v1899_v51, %v10609_v20  ;;  %v2537_v54 = vmax.f32 %v1898_v19, 0.0  ;;  %v2093_v8 = vadd.f32 %v2092_v60, %v10613_v26  ;;  %v2539_v34 = vmax.f32 %v2091_v56, 0.0  ;;  %v8253_v60 = vld [vmem:[%s12086_s3 + $0xf44] ss:$16 sps:$4 sm:$0xff]   ;;  %v8248_v19 = vld [vmem:[%s12086_s3 + $0xd40] ss:$16 sps:$4 sm:$0xff]  }
 0x31f   : > { %v1903_v57 = vpop.f32.mrf.mxu0  ;;  %v2096_v13 = vpop.f32.mrf.mxu1  ;;  %v3079_v52 = vadd.f32 %v3078_v3, %v2522_v25 }
 0x320   : > { %6689 = vmatpush2.bf16.msra.mxu0 %v8230_v42  ;;  %v1904_v10 = vadd.f32 %v1903_v57, %v10597_v63  ;;  %v2538_v5 = vmax.f32 %v1900_v29, 0.0  ;;  %v2097_v44 = vadd.f32 %v2096_v13, %v10601_v36  ;;  %v8250_v42 = vld [vmem:[%s12086_s3 + $0xd44] ss:$16 sps:$4 sm:$0xff]   ;;  %v2540_v53 = vmax.f32 %v2093_v8, 0.0  ;;  %v11196_v29 = vld [vmem:[%s12087_s4] sm:$0xf] }
 0x321   : > { %v1905_v12 = vpop.f32.mrf.mxu0  ;;  %v2098_v45 = vpop.f32.mrf.mxu1  ;;  %6730 = vmatpush2.bf16.msra.mxu1 %v8233_v4  ;;  %6690 = vmatprep.subr.bf16.mxu0 %v8238_v17  ;;  %v3141_v4 = vadd.f32 %v3140_v21, %v2524_v11  ;;  %v3049_v17 = vadd.f32 %v3048_v2, %v2537_v54  ;;  %v6405_v2 = vrot.slane %v11196_v29, %v9019_v6 }
 0x322   : > { %6731 = vmatprep.subr.bf16.mxu1 %v8241_v22  ;;  %v1906_v28 = vadd.f32 %v1905_v12, %v10609_v20  ;;  %v2099_v18 = vadd.f32 %v2098_v45, %v10613_v26  ;;  %v2553_v38 = vmax.f32 %v1904_v10, 0.0  ;;  %v3111_v22 = vadd.f32 %v3110_v49, %v2539_v34  ;;  %v8259_v45 = vld [vmem:[%s12086_s3 + $0xf24] ss:$16 sps:$4 sm:$0xff]  }
 0x323   : > { %v1907_v15 = vpop.f32.mrf.mxu0  ;;  %v2100_v59 = vpop.f32.mrf.mxu1  ;;  %v3080_v40 = vadd.f32 %v3079_v52, %v2538_v5  ;;  %v2555_v62 = vmax.f32 %v2097_v44, 0.0  ;;  %v8262_v49 = vld [vmem:[%s12086_s3 + $0xd04] ss:$16 sps:$4 sm:$0xff]  }
 0x324   : > { %6691 = vmatpush2.bf16.msra.mxu0 %v8236_v46  ;;  %v1908_v23 = vadd.f32 %v1907_v15, %v10597_v63  ;;  %v2101_v7 = vadd.f32 %v2100_v59, %v10601_v36  ;;  %v2554_v39 = vmax.f32 %v1906_v28, 0.0  ;;  %v8251_v46 = vld [vmem:[%s12086_s3 + $0xf40] ss:$16 sps:$4 sm:$0xff]   ;;  %v2556_v48 = vmax.f32 %v2099_v18, 0.0 }
 0x325   : > { %v1909_v16 = vpop.f32.mrf.mxu0  ;;  %v2102_v58 = vpop.f32.mrf.mxu1  ;;  %6732 = vmatpush2.bf16.msra.mxu1 %v8239_v50  ;;  %6692 = vmatprep.subr.bf16.mxu0 %v8244_v47  ;;  %v8256_v50 = vld [vmem:[%s12086_s3 + $0xd24] ss:$16 sps:$4 sm:$0xff]   ;;  %v3142_v47 = vadd.f32 %v3141_v4, %v2540_v53  ;;  %v3050_v35 = vadd.f32 %v3049_v17, %v2553_v38  ;;  %v3112_v11 = vadd.f32 %v3111_v22, %v2555_v62  ;;  %v8254_v15 = vld [vmem:[%s12086_s3 + $0xd20] ss:$16 sps:$4 sm:$0xff]  }
 0x326   : > { %v1910_v51 = vadd.f32 %v1909_v16, %v10609_v20  ;;  %6733 = vmatprep.subr.bf16.mxu1 %v8247_v31  ;;  %v2103_v57 = vadd.f32 %v2102_v58, %v10613_v26  ;;  %v2569_v61 = vmax.f32 %v1908_v23, 0.0  ;;  %v2571_v25 = vmax.f32 %v2101_v7, 0.0  ;;  %v8257_v59 = vld [vmem:[%s12086_s3 + $0xf20] ss:$16 sps:$4 sm:$0xff]  }
 0x327   : > { %v1913_v24 = vpop.f32.mrf.mxu0  ;;  %v2106_v1 = vpop.f32.mrf.mxu1  ;;  %v3081_v54 = vadd.f32 %v3080_v40, %v2554_v39  ;;  %v3143_v52 = vadd.f32 %v3142_v47, %v2556_v48  ;;  %v8271_v48 = vld [vmem:[%s12086_s3 + $0x2ec] ss:$16 sps:$4 sm:$0xff]  }
 0x328   : > { %6693 = vmatpush2.bf16.msra.mxu0 %v8242_v43  ;;  %v1914_v13 = vadd.f32 %v1913_v24, %v10597_v63  ;;  %v2107_v55 = vadd.f32 %v2106_v1, %v10601_v36  ;;  %v2570_v12 = vmax.f32 %v1910_v51, 0.0  ;;  %v2572_v34 = vmax.f32 %v2103_v57, 0.0  ;;  %v8260_v1 = vld [vmem:[%s12086_s3 + $0xd00] ss:$16 sps:$4 sm:$0xff]  }
 0x329   : > { %v1915_v37 = vpop.f32.mrf.mxu0  ;;  %v2108_v56 = vpop.f32.mrf.mxu1  ;;  %6734 = vmatpush2.bf16.msra.mxu1 %v8245_v32  ;;  %6694 = vmatprep.subr.bf16.mxu0 %v8250_v42  ;;  %v3051_v16 = vadd.f32 %v3050_v35, %v2569_v61  ;;  %v3113_v58 = vadd.f32 %v3112_v11, %v2571_v25  ;;  %v8265_v42 = vld [vmem:[%s12086_s3 + $0xf04] ss:$16 sps:$4 sm:$0xff]   ;;  %v6409_v35 = vrot.slane %v11196_v29, %v9028_v9 }
 0x32a   : > { %6735 = vmatprep.subr.bf16.mxu1 %v8253_v60  ;;  %v1916_v33 = vadd.f32 %v1915_v37, %v10609_v20  ;;  %v2109_v3 = vadd.f32 %v2108_v56, %v10613_v26  ;;  %v2585_v5 = vmax.f32 %v1914_v13, 0.0  ;;  %v2587_v44 = vmax.f32 %v2107_v55, 0.0  ;;  %v8263_v13 = vld [vmem:[%s12086_s3 + $0xf00] ss:$16 sps:$4 sm:$0xff]   ;;  %v8268_v55 = vld [vmem:[%s12086_s3 + $0xec] ss:$16 sps:$4 sm:$0xff]  }
 0x32b   : > { %v1917_v21 = vpop.f32.mrf.mxu0  ;;  %v2110_v31 = vpop.f32.mrf.mxu1  ;;  %v3082_v32 = vadd.f32 %v3081_v54, %v2570_v12  ;;  %v3144_v22 = vadd.f32 %v3143_v52, %v2572_v34 }
 0x32c   : > { %v1918_v8 = vadd.f32 %v1917_v21, %v10597_v63  ;;  %v2111_v10 = vadd.f32 %v2110_v31, %v10601_v36  ;;  %6695 = vmatpush2.bf16.msra.mxu0 %v8248_v19  ;;  %v2586_v18 = vmax.f32 %v1916_v33, 0.0  ;;  %v2588_v23 = vmax.f32 %v2109_v3, 0.0 }
 0x32d   : > { %v1919_v28 = vpop.f32.mrf.mxu0  ;;  %v2112_v43 = vpop.f32.mrf.mxu1  ;;  %6736 = vmatpush2.bf16.msra.mxu1 %v8251_v46  ;;  %6696 = vmatprep.subr.bf16.mxu0 %v8256_v50  ;;  %v3052_v40 = vadd.f32 %v3051_v16, %v2585_v5  ;;  %v3114_v62 = vadd.f32 %v3113_v58, %v2587_v44 }
 0x32e   : > { %6737 = vmatprep.subr.bf16.mxu1 %v8259_v45  ;;  %v1920_v7 = vadd.f32 %v1919_v28, %v10609_v20  ;;  %v2113_v51 = vadd.f32 %v2112_v43, %v10613_v26  ;;  %v2601_v17 = vmax.f32 %v1918_v8, 0.0  ;;  %v2603_v53 = vmax.f32 %v2111_v10, 0.0 }
 0x32f   : > { %v1923_v60 = vpop.f32.mrf.mxu0  ;;  %v2116_v4 = vpop.f32.mrf.mxu1  ;;  %v3083_v61 = vadd.f32 %v3082_v32, %v2586_v18  ;;  %v3145_v25 = vadd.f32 %v3144_v22, %v2588_v23 }
 0x330   : > { %v1924_v38 = vadd.f32 %v1923_v60, %v10597_v63  ;;  %v2117_v24 = vadd.f32 %v2116_v4, %v10601_v36  ;;  %6697 = vmatpush2.bf16.msra.mxu0 %v8254_v15  ;;  %v2602_v39 = vmax.f32 %v1920_v7, 0.0  ;;  %v2604_v37 = vmax.f32 %v2113_v51, 0.0 }
 0x331   : > { %v1925_v19 = vpop.f32.mrf.mxu0  ;;  %v2118_v57 = vpop.f32.mrf.mxu1  ;;  %6738 = vmatpush2.bf16.msra.mxu1 %v8257_v59  ;;  %6698 = vmatprep.subr.bf16.mxu0 %v8262_v49  ;;  %v3053_v33 = vadd.f32 %v3052_v40, %v2601_v17  ;;  %v3115_v3 = vadd.f32 %v3114_v62, %v2603_v53 }
 0x332   : > { %v2617_v56 = vmax.f32 %v1924_v38, 0.0  ;;  %v1926_v46 = vadd.f32 %v1925_v19, %v10609_v20  ;;  %v2119_v50 = vadd.f32 %v2118_v57, %v10613_v26  ;;  %6739 = vmatprep.subr.bf16.mxu1 %v8265_v42  ;;  %v2619_v12 = vmax.f32 %v2117_v24, 0.0 }
 0x333   : > { %v1927_v45 = vpop.f32.mrf.mxu0  ;;  %v2120_v47 = vpop.f32.mrf.mxu1  ;;  %v3084_v11 = vadd.f32 %v3083_v61, %v2602_v39  ;;  %v3146_v59 = vadd.f32 %v3145_v25, %v2604_v37 }
 0x334   : > { %v2618_v21 = vmax.f32 %v1926_v46, 0.0  ;;  %v2620_v31 = vmax.f32 %v2119_v50, 0.0  ;;  %6699 = vmatpush2.bf16.msra.mxu0 %v8260_v1  ;;  %v1928_v54 = vadd.f32 %v1927_v45, %v10597_v63  ;;  %v2121_v8 = vadd.f32 %v2120_v47, %v10601_v36 }
 0x335   : > { %v1929_v10 = vpop.f32.mrf.mxu0  ;;  %v2122_v15 = vpop.f32.mrf.mxu1  ;;  %6740 = vmatpush2.bf16.msra.mxu1 %v8263_v13  ;;  %6750 = vmatprep.subr.bf16.mxu0 %v8268_v55  ;;  %v3054_v34 = vadd.f32 %v3053_v33, %v2617_v56  ;;  %v3116_v44 = vadd.f32 %v3115_v3, %v2619_v12 }
 0x336   : > { %v1930_v5 = vadd.f32 %v1929_v10, %v10609_v20  ;;  %v2123_v9 = vadd.f32 %v2122_v15, %v10613_v26  ;;  %6791 = vmatprep.subr.bf16.mxu1 %v8271_v48  ;;  %v3085_v28 = vadd.f32 %v3084_v11, %v2618_v21  ;;  %v2633_v43 = vmax.f32 %v1928_v54, 0.0  ;;  %v8266_v10 = vld [vmem:[%s12086_s3 + $0xe8] ss:$16 sps:$4 sm:$0xff]  }
 0x337   : > { %v2635_v49 = vmax.f32 %v2121_v8, 0.0  ;;  %v6456_v52 = vpop.f32.mrf.mxu0  ;;  %v6497_v16 = vpop.f32.mrf.mxu1  ;;  %v3147_v63 = vadd.f32 %v3146_v59, %v2620_v31  ;;  %v8269_v15 = vld [vmem:[%s12086_s3 + $0x2e8] ss:$16 sps:$4 sm:$0xff]  }
 0x338   : > { %v2634_v58 = vmax.f32 %v1930_v5, 0.0  ;;  %v2636_v36 = vmax.f32 %v2123_v9, 0.0  ;;  %v6457_v32 = vadd.f32 %v6456_v52, %v6405_v2  ;;  %v3055_v42 = vadd.f32 %v3054_v34, %v2633_v43  ;;  %v8274_v5 = vld [vmem:[%s12086_s3 + $0xcc] ss:$16 sps:$4 sm:$0xff]   ;;  %v8278_v52 = vld [vmem:[%s12086_s3 + $0xa8] ss:$16 sps:$4 sm:$0xff]  }
 0x339   : > { %v3117_v18 = vadd.f32 %v3116_v44, %v2635_v49  ;;  %v6458_v23 = vpop.f32.mrf.mxu0  ;;  %v6499_v20 = vpop.f32.mrf.mxu1  ;;  %v8277_v9 = vld [vmem:[%s12086_s3 + $0x2cc] ss:$16 sps:$4 sm:$0xff]   ;;  %v8272_v44 = vld [vmem:[%s12086_s3 + $0xc8] ss:$16 sps:$4 sm:$0xff]  }
 0x33a   : > { %v3086_v7 = vadd.f32 %v3085_v28, %v2634_v58  ;;  %v3148_v26 = vadd.f32 %v3147_v63, %v2636_v36  ;;  %v11252_v51 = vadd.f32 %v6497_v16, %v6457_v32  ;;  %v6459_v60 = vadd.f32 %v6458_v23, %v6409_v35  ;;  %v8275_v28 = vld [vmem:[%s12086_s3 + $0x2c8] ss:$16 sps:$4 sm:$0xff]   ;;  %v8280_v43 = vld [vmem:[%s12086_s3 + $0xac] ss:$16 sps:$4 sm:$0xff]  }
 0x33b   : > { %v3272_v4 = vrot.slane %v3055_v42, 4  ;;  %v3284_v17 = vrot.slane %v3117_v18, 4  ;;  %v6460_v53 = vpop.f32.mrf.mxu0  ;;  %v6501_v38 = vpop.f32.mrf.mxu1  ;;  %v8283_v49 = vld [vmem:[%s12086_s3 + $0x2ac] ss:$16 sps:$4 sm:$0xff]   ;;  %v8284_v63 = vld [vmem:[%s12086_s3 + $0x88] ss:$16 sps:$4 sm:$0xff]  }
 0x33c   : > { %v3278_v24 = vrot.slane %v3086_v7, 4  ;;  %v3290_v1 = vrot.slane %v3148_v26, 4  ;;  %v11254_v22 = vadd.f32 %v6499_v20, %v6459_v60  ;;  %v8289_v16 = vld [vmem:[%s12086_s3 + $0x28c] ss:$16 sps:$4 sm:$0xff]   ;;  %v8287_v58 = vld [vmem:[%s12086_s3 + $0x288] ss:$16 sps:$4 sm:$0xff]  }
 0x33d   : > { %v3273_v40 = vadd.f32 %v3272_v4, %v3055_v42  ;;  %v3285_v6 = vadd.f32 %v3284_v17, %v3117_v18  ;;  %v6461_v29 = vpop.f32.mrf.mxu0  ;;  %v6502_v2 = vpop.f32.mrf.mxu1  ;;  %v8292_v36 = vld [vmem:[%s12086_s3 + $0x6c] ss:$16 sps:$4 sm:$0xff]   ;;  %v8290_v42 = vld [vmem:[%s12086_s3 + $0x68] ss:$16 sps:$4 sm:$0xff]  }
 0x33e   : > { %v3279_v62 = vadd.f32 %v3278_v24, %v3086_v7  ;;  %v3291_v39 = vadd.f32 %v3290_v1, %v3148_v26  ;;  %v8295_v32 = vld [vmem:[%s12086_s3 + $0x26c] ss:$16 sps:$4 sm:$0xff]   ;;  %v8293_v18 = vld [vmem:[%s12086_s3 + $0x268] ss:$16 sps:$4 sm:$0xff]  }
 0x33f   : > { %v3274_v19 = vrot.slane %v3273_v40, 2  ;;  %v3286_v57 = vrot.slane %v3285_v6, 2  ;;  %v8298_v23 = vld [vmem:[%s12086_s3 + $0x4c] ss:$16 sps:$4 sm:$0xff]   ;;  %v8296_v7 = vld [vmem:[%s12086_s3 + $0x48] ss:$16 sps:$4 sm:$0xff]  }
 0x340   : > { %v3280_v13 = vrot.slane %v3279_v62, 2  ;;  %v3292_v55 = vrot.slane %v3291_v39, 2  ;;  %v8301_v20 = vld [vmem:[%s12086_s3 + $0x24c] ss:$16 sps:$4 sm:$0xff]   ;;  %v8299_v26 = vld [vmem:[%s12086_s3 + $0x248] ss:$16 sps:$4 sm:$0xff]  }
 0x341   : > { %v3275_v37 = vadd.f32 %v3274_v19, %v3273_v40  ;;  %v3287_v56 = vadd.f32 %v3286_v57, %v3285_v6  ;;  %v8304_v60 = vld [vmem:[%s12086_s3 + $0x2c] ss:$16 sps:$4 sm:$0xff]   ;;  %v8302_v17 = vld [vmem:[%s12086_s3 + $0x28] ss:$16 sps:$4 sm:$0xff]  }
 0x342   : > { %v3281_v46 = vadd.f32 %v3280_v13, %v3279_v62  ;;  %v3293_v50 = vadd.f32 %v3292_v55, %v3291_v39  ;;  %v8307_v4 = vld [vmem:[%s12086_s3 + $0x22c] ss:$16 sps:$4 sm:$0xff]   ;;  %v8305_v53 = vld [vmem:[%s12086_s3 + $0x228] ss:$16 sps:$4 sm:$0xff]  }
 0x343   : > { %v3276_v48 = vrot.slane %v3275_v37, 1  ;;  %v3288_v61 = vrot.slane %v3287_v56, 1  ;;  %v8310_v38 = vld [vmem:[%s12086_s3 + $0xc] ss:$16 sps:$4 sm:$0xff]   ;;  %v8308_v1 = vld [vmem:[%s12086_s3 + $0x8] ss:$16 sps:$4 sm:$0xff]  }
 0x344   : > { %v3282_v25 = vrot.slane %v3281_v46, 1  ;;  %v3294_v12 = vrot.slane %v3293_v50, 1  ;;  %v8313_v24 = vld [vmem:[%s12086_s3 + $0x20c] ss:$16 sps:$4 sm:$0xff]   ;;  %v8311_v40 = vld [vmem:[%s12086_s3 + $0x208] ss:$16 sps:$4 sm:$0xff]  }
 0x345   : > { %v3277_v45 = vadd.f32 %v3276_v48, %v3275_v37  ;;  %v3289_v47 = vadd.f32 %v3288_v61, %v3287_v56  ;;  %v8316_v6 = vld [vmem:[%s12086_s3 + $0x1ec] ss:$16 sps:$4 sm:$0xff]   ;;  %v8314_v2 = vld [vmem:[%s12086_s3 + $0x1e8] ss:$16 sps:$4 sm:$0xff]  }
 0x346   : > { %v3283_v35 = vadd.f32 %v3282_v25, %v3281_v46  ;;  %v3295_v33 = vadd.f32 %v3294_v12, %v3293_v50  ;;  %v8319_v29 = vld [vmem:[%s12086_s3 + $0x3ec] ss:$16 sps:$4 sm:$0xff]   ;;  %v8317_v62 = vld [vmem:[%s12086_s3 + $0x3e8] ss:$16 sps:$4 sm:$0xff]  }
 0x347   : > { %v3308_v3 = vmul.f32 0.00390625, %v3277_v45  ;;  %v3310_v21 = vmul.f32 0.00390625, %v3289_v47  ;;  %v8322_v39 = vld [vmem:[%s12086_s3 + $0x1cc] ss:$16 sps:$4 sm:$0xff]   ;;  %v8320_v57 = vld [vmem:[%s12086_s3 + $0x1c8] ss:$16 sps:$4 sm:$0xff]  }
 0x348   : > { %v3309_v31 = vmul.f32 0.00390625, %v3283_v35  ;;  %v3311_v11 = vmul.f32 0.00390625, %v3295_v33  ;;  %v8325_v19 = vld [vmem:[%s12086_s3 + $0x3cc] ss:$16 sps:$4 sm:$0xff]   ;;  %v8323_v13 = vld [vmem:[%s12086_s3 + $0x3c8] ss:$16 sps:$4 sm:$0xff]  }
 0x349   : > { %v11266_v59 = vpack.c.bf16 %v3308_v3, %v3308_v3  ;;  %v11268_v34 = vpack.c.bf16 %v3310_v21, %v3310_v21  ;;  %v8328_v55 = vld [vmem:[%s12086_s3 + $0x1ac] ss:$16 sps:$4 sm:$0xff]   ;;  %v8326_v56 = vld [vmem:[%s12086_s3 + $0x1a8] ss:$16 sps:$4 sm:$0xff]  }
 0x34a   : > { %v11256_v54 = vpack.c.bf16 %v3309_v31, %v3309_v31  ;;  %v11258_v8 = vpack.c.bf16 %v3311_v11, %v3311_v11  ;;  %v8331_v37 = vld [vmem:[%s12086_s3 + $0x3ac] ss:$16 sps:$4 sm:$0xff]   ;;  %v8329_v46 = vld [vmem:[%s12086_s3 + $0x3a8] ss:$16 sps:$4 sm:$0xff]  }
 0x34b   : > { %v8334_v50 = vld [vmem:[%s12086_s3 + $0x18c] ss:$16 sps:$4 sm:$0xff]   ;;  %v8332_v61 = vld [vmem:[%s12086_s3 + $0x188] ss:$16 sps:$4 sm:$0xff]  }
 0x34c   : > { %6700 = vmatprep.mubr.bf16.mxu0 %v11256_v54  ;;  %6741 = vmatprep.mubr.bf16.mxu1 %v11258_v8  ;;  %v8337_v48 = vld [vmem:[%s12086_s3 + $0x38c] ss:$16 sps:$4 sm:$0xff]   ;;  %v8335_v25 = vld [vmem:[%s12086_s3 + $0x388] ss:$16 sps:$4 sm:$0xff]  }
 0x34d   : > { %6701 = vmatmul.mubr.bf16.vlgmr.msra.gmra.mxu0 %v11266_v59  ;;  %6742 = vmatmul.mubr.bf16.vlgmr.msra.gmra.mxu1 %v11268_v34  ;;  %v8340_v45 = vld [vmem:[%s12086_s3 + $0x16c] ss:$16 sps:$4 sm:$0xff]  }
 0x34e   : > { %6751 = vmatpush1.bf16.msra.mxu0 %v8266_v10  ;;  %6792 = vmatpush1.bf16.msra.mxu1 %v8269_v15  ;;  %v8343_v47 = vld [vmem:[%s12086_s3 + $0x36c] ss:$16 sps:$4 sm:$0xff]   ;;  %v8338_v10 = vld [vmem:[%s12086_s3 + $0x168] ss:$16 sps:$4 sm:$0xff]  }
 0x34f   : > { %6782 = vmatprep.mubr.bf16.mxu0 %v9958_v27  ;;  %6823 = vmatprep.mubr.bf16.mxu1 %v9960_v30  ;;  %v8281_v27 = vld [vmem:[%s12086_s3 + $0x2a8] ss:$16 sps:$4 sm:$0xff]   ;;  %v8286_v30 = vld [vmem:[%s12086_s3 + $0x8c] ss:$16 sps:$4 sm:$0xff]  }
 0x350   : > { %6752 = vmatprep.subr.bf16.mxu0 %v8274_v5  ;;  %6793 = vmatprep.subr.bf16.mxu1 %v8277_v9  ;;  %v8341_v15 = vld [vmem:[%s12086_s3 + $0x368] ss:$16 sps:$4 sm:$0xff]  }
 0x352   : > { %6753 = vmatpush1.bf16.msra.mxu0 %v8272_v44  ;;  %6794 = vmatpush1.bf16.msra.mxu1 %v8275_v28 }
 0x353   : > { %6754 = vmatprep.subr.bf16.mxu0 %v8280_v43  ;;  %6795 = vmatprep.subr.bf16.mxu1 %v8283_v49  ;;  %v8344_v49 = vld [vmem:[%s12086_s3 + $0x148] ss:$16 sps:$4 sm:$0xff]  }
 0x356   : > { %6755 = vmatpush1.bf16.msra.mxu0 %v8278_v52  ;;  %6796 = vmatpush1.bf16.msra.mxu1 %v8281_v27  ;;  %v8347_v52 = vld [vmem:[%s12086_s3 + $0x348] ss:$16 sps:$4 sm:$0xff]   ;;  %v8352_v27 = vld [vmem:[%s12086_s3 + $0x12c] ss:$16 sps:$4 sm:$0xff]  }
 0x357   : > { %6756 = vmatprep.subr.bf16.mxu0 %v8286_v30  ;;  %6797 = vmatprep.subr.bf16.mxu1 %v8289_v16  ;;  %v8355_v30 = vld [vmem:[%s12086_s3 + $0x32c] ss:$16 sps:$4 sm:$0xff]   ;;  %v8350_v16 = vld [vmem:[%s12086_s3 + $0x128] ss:$16 sps:$4 sm:$0xff]  }
 0x35a   : > { %6757 = vmatpush1.bf16.msra.mxu0 %v8284_v63  ;;  %6798 = vmatpush1.bf16.msra.mxu1 %v8287_v58  ;;  %v8353_v63 = vld [vmem:[%s12086_s3 + $0x328] ss:$16 sps:$4 sm:$0xff]   ;;  %v8358_v58 = vld [vmem:[%s12086_s3 + $0x10c] ss:$16 sps:$4 sm:$0xff]  }
 0x35b   : > { %6758 = vmatprep.subr.bf16.mxu0 %v8292_v36  ;;  %6799 = vmatprep.subr.bf16.mxu1 %v8295_v32  ;;  %v8361_v36 = vld [vmem:[%s12086_s3 + $0x30c] ss:$16 sps:$4 sm:$0xff]   ;;  %v8356_v32 = vld [vmem:[%s12086_s3 + $0x108] ss:$16 sps:$4 sm:$0xff]  }
 0x35e   : > { %6759 = vmatpush1.bf16.msra.mxu0 %v8290_v42  ;;  %6800 = vmatpush1.bf16.msra.mxu1 %v8293_v18  ;;  %v8359_v42 = vld [vmem:[%s12086_s3 + $0x308] ss:$16 sps:$4 sm:$0xff]   ;;  %v8364_v18 = vld [vmem:[%s12086_s3 + $0x4ec] ss:$16 sps:$4 sm:$0xff]  }
 0x35f   : > { %6760 = vmatprep.subr.bf16.mxu0 %v8298_v23  ;;  %6801 = vmatprep.subr.bf16.mxu1 %v8301_v20  ;;  %v8367_v23 = vld [vmem:[%s12086_s3 + $0x6ec] ss:$16 sps:$4 sm:$0xff]   ;;  %v8362_v20 = vld [vmem:[%s12086_s3 + $0x4e8] ss:$16 sps:$4 sm:$0xff]  }
 0x362   : > { %6761 = vmatpush1.bf16.msra.mxu0 %v8296_v7  ;;  %6802 = vmatpush1.bf16.msra.mxu1 %v8299_v26  ;;  %v8365_v7 = vld [vmem:[%s12086_s3 + $0x6e8] ss:$16 sps:$4 sm:$0xff]   ;;  %v8370_v26 = vld [vmem:[%s12086_s3 + $0x4cc] ss:$16 sps:$4 sm:$0xff]  }
 0x363   : > { %6762 = vmatprep.subr.bf16.mxu0 %v8304_v60  ;;  %6803 = vmatprep.subr.bf16.mxu1 %v8307_v4  ;;  %v8373_v60 = vld [vmem:[%s12086_s3 + $0x6cc] ss:$16 sps:$4 sm:$0xff]  }
 0x364   : > { %v12118_v4 = vld [vmem:[#allocation6_spill] sm:$0xff] }
 0x366   : > { %6763 = vmatpush1.bf16.msra.mxu0 %v8302_v17  ;;  %6804 = vmatpush1.bf16.msra.mxu1 %v8305_v53  ;;  %v12119_v17 = vld [vmem:[#allocation7_spill] sm:$0xff]  ;;  %v8368_v53 = vld [vmem:[%s12086_s3 + $0x4c8] ss:$16 sps:$4 sm:$0xff]  }
 0x367   : > { %6764 = vmatprep.subr.bf16.mxu0 %v8310_v38  ;;  %6805 = vmatprep.subr.bf16.mxu1 %v8313_v24  ;;  %v12120_v38 = vld [vmem:[#allocation8_spill] sm:$0xff] }
 0x368   : > { %v8371_v24 = vld [vmem:[%s12086_s3 + $0x6c8] ss:$16 sps:$4 sm:$0xff]  }
 0x36a   : > { %6765 = vmatpush1.bf16.msra.mxu0 %v8308_v1  ;;  %6806 = vmatpush1.bf16.msra.mxu1 %v8311_v40  ;;  %v8379_v1 = vld [vmem:[%s12086_s3 + $0x6ac] ss:$16 sps:$4 sm:$0xff]   ;;  %v8374_v40 = vld [vmem:[%s12086_s3 + $0x4a8] ss:$16 sps:$4 sm:$0xff]  }
 0x36b   : > { %6766 = vmatprep.subr.bf16.mxu0 %v8316_v6  ;;  %6807 = vmatprep.subr.bf16.mxu1 %v8319_v29  ;;  %v8377_v6 = vld [vmem:[%s12086_s3 + $0x6a8] ss:$16 sps:$4 sm:$0xff]   ;;  %v8382_v29 = vld [vmem:[%s12086_s3 + $0x48c] ss:$16 sps:$4 sm:$0xff]  }
 0x36e   : > { %6767 = vmatpush2.bf16.msra.mxu0 %v8314_v2  ;;  %6808 = vmatpush2.bf16.msra.mxu1 %v8317_v62  ;;  %v8385_v2 = vld [vmem:[%s12086_s3 + $0x68c] ss:$16 sps:$4 sm:$0xff]   ;;  %v8380_v62 = vld [vmem:[%s12086_s3 + $0x488] ss:$16 sps:$4 sm:$0xff]  }
 0x36f   : > { %6768 = vmatprep.subr.bf16.mxu0 %v8322_v39  ;;  %6809 = vmatprep.subr.bf16.mxu1 %v8325_v19  ;;  %v8383_v39 = vld [vmem:[%s12086_s3 + $0x688] ss:$16 sps:$4 sm:$0xff]   ;;  %v8388_v19 = vld [vmem:[%s12086_s3 + $0x46c] ss:$16 sps:$4 sm:$0xff]  }
 0x372   : > { %6769 = vmatpush2.bf16.msra.mxu0 %v8320_v57  ;;  %6810 = vmatpush2.bf16.msra.mxu1 %v8323_v13  ;;  %v8391_v57 = vld [vmem:[%s12086_s3 + $0x66c] ss:$16 sps:$4 sm:$0xff]   ;;  %v8386_v13 = vld [vmem:[%s12086_s3 + $0x468] ss:$16 sps:$4 sm:$0xff]  }
 0x373   : > { %6770 = vmatprep.subr.bf16.mxu0 %v8328_v55  ;;  %6811 = vmatprep.subr.bf16.mxu1 %v8331_v37  ;;  %v8389_v55 = vld [vmem:[%s12086_s3 + $0x668] ss:$16 sps:$4 sm:$0xff]   ;;  %v8394_v37 = vld [vmem:[%s12086_s3 + $0x44c] ss:$16 sps:$4 sm:$0xff]  }
 0x376   : > { %6771 = vmatpush2.bf16.msra.mxu0 %v8326_v56  ;;  %6812 = vmatpush2.bf16.msra.mxu1 %v8329_v46  ;;  %v8397_v56 = vld [vmem:[%s12086_s3 + $0x64c] ss:$16 sps:$4 sm:$0xff]   ;;  %v8392_v46 = vld [vmem:[%s12086_s3 + $0x448] ss:$16 sps:$4 sm:$0xff]  }
 0x377   : > { %v6538_v12 = vpop.f32.mrf.mxu0  ;;  %6772 = vmatprep.subr.bf16.mxu0 %v8334_v50  ;;  %6813 = vmatprep.subr.bf16.mxu1 %v8337_v48  ;;  %v8395_v50 = vld [vmem:[%s12086_s3 + $0x648] ss:$16 sps:$4 sm:$0xff]   ;;  %v8400_v48 = vld [vmem:[%s12086_s3 + $0x42c] ss:$16 sps:$4 sm:$0xff]  }
 0x378   : > { %v6539_v35 = vadd.f32 %v6538_v12, %v11252_v51  ;;  %v6579_v33 = vpop.f32.mrf.mxu1  ;;  %v8346_v51 = vld [vmem:[%s12086_s3 + $0x14c] ss:$16 sps:$4 sm:$0xff]   ;;  %v8401_v12 = vld [vmem:[%s12086_s3 + $0x628] ss:$16 sps:$4 sm:$0xff]  }
 0x379   : > { %v6540_v3 = vpop.f32.mrf.mxu0 }
 0x37a   : > { %v11415_v21 = vadd.f32 %v6579_v33, %v6539_v35  ;;  %v6541_v31 = vadd.f32 %v6540_v3, %v11254_v22  ;;  %v6581_v11 = vpop.f32.mrf.mxu1  ;;  %6773 = vmatpush2.bf16.msra.mxu0 %v8332_v61  ;;  %6814 = vmatpush2.bf16.msra.mxu1 %v8335_v25  ;;  %v8349_v22 = vld [vmem:[%s12086_s3 + $0x34c] ss:$16 sps:$4 sm:$0xff]   ;;  %v8398_v25 = vld [vmem:[%s12086_s3 + $0x428] ss:$16 sps:$4 sm:$0xff]  }
 0x37b   : > { %v6542_v5 = vpop.f32.mrf.mxu0  ;;  %6774 = vmatprep.subr.bf16.mxu0 %v8340_v45  ;;  %6815 = vmatprep.subr.bf16.mxu1 %v8343_v47  ;;  %v8403_v61 = vld [vmem:[%s12086_s3 + $0x62c] ss:$16 sps:$4 sm:$0xff]   ;;  %v8404_v35 = vld [vmem:[%s12086_s3 + $0x408] ss:$16 sps:$4 sm:$0xff]  }
 0x37c   : > { %v11430_v9 = vadd.f32 %v6581_v11, %v6541_v31  ;;  %v6583_v44 = vpop.f32.mrf.mxu1  ;;  %v8406_v45 = vld [vmem:[%s12086_s3 + $0x40c] ss:$16 sps:$4 sm:$0xff]   ;;  %v8407_v33 = vld [vmem:[%s12086_s3 + $0x608] ss:$16 sps:$4 sm:$0xff]  }
 0x37d   : > { %v6543_v28 = vpop.f32.mrf.mxu0  ;;  %v8409_v47 = vld [vmem:[%s12086_s3 + $0x60c] ss:$16 sps:$4 sm:$0xff]   ;;  %v8410_v11 = vld [vmem:[%s12086_s3 + $0x5e8] ss:$16 sps:$4 sm:$0xff]  }
 0x37e   : > { %v6584_v43 = vpop.f32.mrf.mxu1  ;;  %6775 = vmatpush2.bf16.msra.mxu0 %v8338_v10  ;;  %6816 = vmatpush2.bf16.msra.mxu1 %v8341_v15  ;;  %v8412_v3 = vld [vmem:[%s12086_s3 + $0x5ec] ss:$16 sps:$4 sm:$0xff]   ;;  %v8413_v10 = vld [vmem:[%s12086_s3 + $0x7e8] ss:$16 sps:$4 sm:$0xff]  }
 0x37f   : > { %6776 = vmatprep.subr.bf16.mxu0 %v8346_v51  ;;  %6817 = vmatprep.subr.bf16.mxu1 %v8349_v22  ;;  %v8415_v31 = vld [vmem:[%s12086_s3 + $0x7ec] ss:$16 sps:$4 sm:$0xff]   ;;  %v8416_v51 = vld [vmem:[%s12086_s3 + $0x5c8] ss:$16 sps:$4 sm:$0xff]  }
 0x380   : > { %v8418_v15 = vld [vmem:[%s12086_s3 + $0x5cc] ss:$16 sps:$4 sm:$0xff]   ;;  %v8419_v22 = vld [vmem:[%s12086_s3 + $0x7c8] ss:$16 sps:$4 sm:$0xff]  }
 0x381   : > { %v8421_v5 = vld [vmem:[%s12086_s3 + $0x7cc] ss:$16 sps:$4 sm:$0xff]   ;;  %v8422_v43 = vld [vmem:[%s12086_s3 + $0x5a8] ss:$16 sps:$4 sm:$0xff]  }
 0x382   : > { %6777 = vmatpush2.bf16.msra.mxu0 %v8344_v49  ;;  %6818 = vmatpush2.bf16.msra.mxu1 %v8347_v52  ;;  %v8424_v44 = vld [vmem:[%s12086_s3 + $0x5ac] ss:$16 sps:$4 sm:$0xff]   ;;  %v8425_v49 = vld [vmem:[%s12086_s3 + $0x7a8] ss:$16 sps:$4 sm:$0xff]  }
 0x383   : > { %6778 = vmatprep.subr.bf16.mxu0 %v8352_v27  ;;  %6819 = vmatprep.subr.bf16.mxu1 %v8355_v30  ;;  %v8427_v28 = vld [vmem:[%s12086_s3 + $0x7ac] ss:$16 sps:$4 sm:$0xff]   ;;  %v8428_v30 = vld [vmem:[%s12086_s3 + $0x588] ss:$16 sps:$4 sm:$0xff]  }
 0x384   : > { %v8430_v52 = vld [vmem:[%s12086_s3 + $0x58c] ss:$16 sps:$4 sm:$0xff]  }
 0x385   : > { %v8433_v27 = vld [vmem:[%s12086_s3 + $0x78c] ss:$16 sps:$4 sm:$0xff]  }
 0x386   : > { %6779 = vmatpush2.bf16.msra.mxu0 %v8350_v16  ;;  %6820 = vmatpush2.bf16.msra.mxu1 %v8353_v63  ;;  %v8431_v63 = vld [vmem:[%s12086_s3 + $0x788] ss:$16 sps:$4 sm:$0xff]  }
 0x387   : > { %6780 = vmatprep.subr.bf16.mxu0 %v8358_v58  ;;  %6821 = vmatprep.subr.bf16.mxu1 %v8361_v36  ;;  %v8436_v58 = vld [vmem:[%s12086_s3 + $0x56c] ss:$16 sps:$4 sm:$0xff]  }
 0x38a   : > { %6781 = vmatpush2.bf16.msra.mxu0 %v8356_v32  ;;  %6822 = vmatpush2.bf16.msra.mxu1 %v8359_v42  ;;  %v8439_v42 = vld [vmem:[%s12086_s3 + $0x76c] ss:$16 sps:$4 sm:$0xff]  }
 0x38b   : > { %6832 = vmatprep.subr.bf16.mxu0 %v8364_v18  ;;  %6873 = vmatprep.subr.bf16.mxu1 %v8367_v23 }
 0x38d   : > { %6783 = vmatmul.mubr.bf16.vlgmr.msra.gmra.mxu0 %v9978_v41  ;;  %6824 = vmatmul.mubr.bf16.vlgmr.msra.gmra.mxu1 %v12118_v4  ;;  %v8376_v41 = vld [vmem:[%s12086_s3 + $0x4ac] ss:$16 sps:$4 sm:$0xff]  }
 0x38e   : > { %6833 = vmatpush1.bf16.msra.mxu0 %v8362_v20  ;;  %6864 = vmatprep.mubr.bf16.mxu0 %v12119_v17  ;;  %v8442_v4 = vld [vmem:[%s12086_s3 + $0x54c] ss:$16 sps:$4 sm:$0xff]  }
 0x38f   : > { %6874 = vmatpush1.bf16.msra.mxu1 %v8365_v7  ;;  %6905 = vmatprep.mubr.bf16.mxu1 %v12120_v38 }
 0x390   : > { %6834 = vmatprep.subr.bf16.mxu0 %v8370_v26  ;;  %6875 = vmatprep.subr.bf16.mxu1 %v8373_v60  ;;  %v8434_v26 = vld [vmem:[%s12086_s3 + $0x568] ss:$16 sps:$4 sm:$0xff]  }
 0x392   : > { %6835 = vmatpush1.bf16.msra.mxu0 %v8368_v53  ;;  %v8445_v53 = vld [vmem:[%s12086_s3 + $0x74c] ss:$16 sps:$4 sm:$0xff]  }
 0x393   : > { %6876 = vmatpush1.bf16.msra.mxu1 %v8371_v24  ;;  %6836 = vmatprep.subr.bf16.mxu0 %v8376_v41  ;;  %v8440_v41 = vld [vmem:[%s12086_s3 + $0x548] ss:$16 sps:$4 sm:$0xff]  }
 0x394   : > { %6877 = vmatprep.subr.bf16.mxu1 %v8379_v1  ;;  %v8443_v1 = vld [vmem:[%s12086_s3 + $0x748] ss:$16 sps:$4 sm:$0xff]  }
 0x396   : > { %6837 = vmatpush1.bf16.msra.mxu0 %v8374_v40  ;;  %v8448_v40 = vld [vmem:[%s12086_s3 + $0x52c] ss:$16 sps:$4 sm:$0xff]  }
 0x397   : > { %6878 = vmatpush1.bf16.msra.mxu1 %v8377_v6  ;;  %6838 = vmatprep.subr.bf16.mxu0 %v8382_v29  ;;  %v8451_v6 = vld [vmem:[%s12086_s3 + $0x72c] ss:$16 sps:$4 sm:$0xff]   ;;  %v8446_v29 = vld [vmem:[%s12086_s3 + $0x528] ss:$16 sps:$4 sm:$0xff]  }
 0x398   : > { %6879 = vmatprep.subr.bf16.mxu1 %v8385_v2  ;;  %v8449_v2 = vld [vmem:[%s12086_s3 + $0x728] ss:$16 sps:$4 sm:$0xff]  }
 0x39a   : > { %6839 = vmatpush1.bf16.msra.mxu0 %v8380_v62  ;;  %v8454_v62 = vld [vmem:[%s12086_s3 + $0x50c] ss:$16 sps:$4 sm:$0xff]  }
 0x39b   : > { %6880 = vmatpush1.bf16.msra.mxu1 %v8383_v39  ;;  %6840 = vmatprep.subr.bf16.mxu0 %v8388_v19  ;;  %v8457_v39 = vld [vmem:[%s12086_s3 + $0x70c] ss:$16 sps:$4 sm:$0xff]   ;;  %v8452_v19 = vld [vmem:[%s12086_s3 + $0x508] ss:$16 sps:$4 sm:$0xff]  }
 0x39c   : > { %6881 = vmatprep.subr.bf16.mxu1 %v8391_v57  ;;  %v8455_v57 = vld [vmem:[%s12086_s3 + $0x708] ss:$16 sps:$4 sm:$0xff]  }
 0x39e   : > { %6841 = vmatpush1.bf16.msra.mxu0 %v8386_v13  ;;  %v8460_v13 = vld [vmem:[%s12086_s3 + $0x8ec] ss:$16 sps:$4 sm:$0xff]  }
 0x39f   : > { %6882 = vmatpush1.bf16.msra.mxu1 %v8389_v55  ;;  %6842 = vmatprep.subr.bf16.mxu0 %v8394_v37  ;;  %v8463_v55 = vld [vmem:[%s12086_s3 + $0xaec] ss:$16 sps:$4 sm:$0xff]   ;;  %v8458_v37 = vld [vmem:[%s12086_s3 + $0x8e8] ss:$16 sps:$4 sm:$0xff]  }
 0x3a0   : > { %6883 = vmatprep.subr.bf16.mxu1 %v8397_v56  ;;  %v8461_v56 = vld [vmem:[%s12086_s3 + $0xae8] ss:$16 sps:$4 sm:$0xff]  }
 0x3a2   : > { %6843 = vmatpush1.bf16.msra.mxu0 %v8392_v46  ;;  %v8466_v46 = vld [vmem:[%s12086_s3 + $0x8cc] ss:$16 sps:$4 sm:$0xff]  }
 0x3a3   : > { %6884 = vmatpush1.bf16.msra.mxu1 %v8395_v50  ;;  %6844 = vmatprep.subr.bf16.mxu0 %v8400_v48  ;;  %v12121_v50 = vld [vmem:[#allocation9_spill] sm:$0xff]  ;;  %v8469_v48 = vld [vmem:[%s12086_s3 + $0xacc] ss:$16 sps:$4 sm:$0xff]  }
 0x3a4   : > { %6885 = vmatprep.subr.bf16.mxu1 %v8403_v61  ;;  %v12122_v61 = vld [vmem:[#allocation10_spill] sm:$0xff] }
 0x3a6   : > { %6845 = vmatpush1.bf16.msra.mxu0 %v8398_v25  ;;  %v8464_v25 = vld [vmem:[%s12086_s3 + $0x8c8] ss:$16 sps:$4 sm:$0xff]  }
 0x3a7   : > { %6886 = vmatpush1.bf16.msra.mxu1 %v8401_v12  ;;  %6846 = vmatprep.subr.bf16.mxu0 %v8406_v45  ;;  %v12123_v12 = vld [vmem:[#allocation11_spill] sm:$0xff]  ;;  %v8467_v45 = vld [vmem:[%s12086_s3 + $0xac8] ss:$16 sps:$4 sm:$0xff]  }
 0x3a8   : > { %6887 = vmatprep.subr.bf16.mxu1 %v8409_v47  ;;  %v8472_v47 = vld [vmem:[%s12086_s3 + $0x8ac] ss:$16 sps:$4 sm:$0xff]  }
 0x3aa   : > { %6847 = vmatpush1.bf16.msra.mxu0 %v8404_v35  ;;  %v12124_v35 = vld [vmem:[#allocation12_spill] sm:$0xff] }
 0x3ab   : > { %6888 = vmatpush1.bf16.msra.mxu1 %v8407_v33  ;;  %6848 = vmatprep.subr.bf16.mxu0 %v8412_v3  ;;  %v8475_v33 = vld [vmem:[%s12086_s3 + $0xaac] ss:$16 sps:$4 sm:$0xff]   ;;  %v8470_v3 = vld [vmem:[%s12086_s3 + $0x8a8] ss:$16 sps:$4 sm:$0xff]  }
 0x3ac   : > { %6889 = vmatprep.subr.bf16.mxu1 %v8415_v31  ;;  %v8473_v31 = vld [vmem:[%s12086_s3 + $0xaa8] ss:$16 sps:$4 sm:$0xff]  }
 0x3ae   : > { %6849 = vmatpush2.bf16.msra.mxu0 %v8410_v11  ;;  %v8478_v11 = vld [vmem:[%s12086_s3 + $0x88c] ss:$16 sps:$4 sm:$0xff]  }
 0x3af   : > { %6890 = vmatpush2.bf16.msra.mxu1 %v8413_v10  ;;  %6850 = vmatprep.subr.bf16.mxu0 %v8418_v15  ;;  %v8481_v10 = vld [vmem:[%s12086_s3 + $0xa8c] ss:$16 sps:$4 sm:$0xff]   ;;  %v8476_v15 = vld [vmem:[%s12086_s3 + $0x888] ss:$16 sps:$4 sm:$0xff]  }
 0x3b0   : > { %6891 = vmatprep.subr.bf16.mxu1 %v8421_v5  ;;  %v8479_v5 = vld [vmem:[%s12086_s3 + $0xa88] ss:$16 sps:$4 sm:$0xff]  }
 0x3b2   : > { %6851 = vmatpush2.bf16.msra.mxu0 %v8416_v51  ;;  %v8484_v51 = vld [vmem:[%s12086_s3 + $0x86c] ss:$16 sps:$4 sm:$0xff]  }
 0x3b3   : > { %6892 = vmatpush2.bf16.msra.mxu1 %v8419_v22  ;;  %6852 = vmatprep.subr.bf16.mxu0 %v8424_v44  ;;  %v8487_v22 = vld [vmem:[%s12086_s3 + $0xa6c] ss:$16 sps:$4 sm:$0xff]   ;;  %v8482_v44 = vld [vmem:[%s12086_s3 + $0x868] ss:$16 sps:$4 sm:$0xff]  }
 0x3b4   : > { %6893 = vmatprep.subr.bf16.mxu1 %v8427_v28  ;;  %v8485_v28 = vld [vmem:[%s12086_s3 + $0xa68] ss:$16 sps:$4 sm:$0xff]  }
 0x3b6   : > { %6853 = vmatpush2.bf16.msra.mxu0 %v8422_v43  ;;  %v8490_v43 = vld [vmem:[%s12086_s3 + $0x84c] ss:$16 sps:$4 sm:$0xff]  }
 0x3b7   : > { %6894 = vmatpush2.bf16.msra.mxu1 %v8425_v49  ;;  %v6620_v16 = vpop.f32.mrf.mxu0  ;;  %6854 = vmatprep.subr.bf16.mxu0 %v8430_v52  ;;  %v8493_v49 = vld [vmem:[%s12086_s3 + $0xa4c] ss:$16 sps:$4 sm:$0xff]   ;;  %v8488_v52 = vld [vmem:[%s12086_s3 + $0x848] ss:$16 sps:$4 sm:$0xff]  }
 0x3b8   : > { %v6621_v36 = vadd.f32 %v6620_v16, %v11415_v21  ;;  %v6661_v32 = vpop.f32.mrf.mxu1  ;;  %6895 = vmatprep.subr.bf16.mxu1 %v8433_v27  ;;  %v8437_v21 = vld [vmem:[%s12086_s3 + $0x768] ss:$16 sps:$4 sm:$0xff]   ;;  %v8499_v16 = vld [vmem:[%s12086_s3 + $0xa2c] ss:$16 sps:$4 sm:$0xff]  }
 0x3b9   : > { %v6622_v18 = vpop.f32.mrf.mxu0  ;;  %v8491_v27 = vld [vmem:[%s12086_s3 + $0xa48] ss:$16 sps:$4 sm:$0xff]  }
 0x3ba   : > { %v11617_v23 = vadd.f32 %v6661_v32, %v6621_v36  ;;  %v6623_v20 = vadd.f32 %v6622_v18, %v11430_v9  ;;  %v6663_v7 = vpop.f32.mrf.mxu1  ;;  %6855 = vmatpush2.bf16.msra.mxu0 %v8428_v30  ;;  %v8496_v30 = vld [vmem:[%s12086_s3 + $0x82c] ss:$16 sps:$4 sm:$0xff]   ;;  %v8503_v18 = vld [vmem:[%s12086_s3 + $0xa08] ss:$16 sps:$4 sm:$0xff]  }
 0x3bb   : > { %6896 = vmatpush2.bf16.msra.mxu1 %v8431_v63  ;;  %v6624_v60 = vpop.f32.mrf.mxu0  ;;  %6856 = vmatprep.subr.bf16.mxu0 %v8436_v58  ;;  %v8494_v63 = vld [vmem:[%s12086_s3 + $0x828] ss:$16 sps:$4 sm:$0xff]   ;;  %v8502_v36 = vld [vmem:[%s12086_s3 + $0x80c] ss:$16 sps:$4 sm:$0xff]  }
 0x3bc   : > { %v11629_v17 = vadd.f32 %v6663_v7, %v6623_v20  ;;  %v6665_v9 = vpop.f32.mrf.mxu1  ;;  %6897 = vmatprep.subr.bf16.mxu1 %v8439_v42  ;;  %v8497_v58 = vld [vmem:[%s12086_s3 + $0xa28] ss:$16 sps:$4 sm:$0xff]   ;;  %v8505_v32 = vld [vmem:[%s12086_s3 + $0xa0c] ss:$16 sps:$4 sm:$0xff]  }
 0x3bd   : > { %v6625_v38 = vpop.f32.mrf.mxu0  ;;  %v8500_v42 = vld [vmem:[%s12086_s3 + $0x808] ss:$16 sps:$4 sm:$0xff]   ;;  %v8508_v20 = vld [vmem:[%s12086_s3 + $0x9ec] ss:$16 sps:$4 sm:$0xff]  }
 0x3be   : > { %v6666_v24 = vpop.f32.mrf.mxu1  ;;  %6857 = vmatpush2.bf16.msra.mxu0 %v8434_v26  ;;  %v8511_v7 = vld [vmem:[%s12086_s3 + $0xbec] ss:$16 sps:$4 sm:$0xff]   ;;  %v8506_v26 = vld [vmem:[%s12086_s3 + $0x9e8] ss:$16 sps:$4 sm:$0xff]  }
 0x3bf   : > { %6898 = vmatpush2.bf16.msra.mxu1 %v8437_v21  ;;  %6858 = vmatprep.subr.bf16.mxu0 %v8442_v4  ;;  %v8509_v60 = vld [vmem:[%s12086_s3 + $0xbe8] ss:$16 sps:$4 sm:$0xff]   ;;  %v8514_v21 = vld [vmem:[%s12086_s3 + $0x9cc] ss:$16 sps:$4 sm:$0xff]  }
 0x3c0   : > { %6899 = vmatprep.subr.bf16.mxu1 %v8445_v53  ;;  %v8517_v4 = vld [vmem:[%s12086_s3 + $0xbcc] ss:$16 sps:$4 sm:$0xff]   ;;  %v8512_v9 = vld [vmem:[%s12086_s3 + $0x9c8] ss:$16 sps:$4 sm:$0xff]  }
 0x3c1   : > { %v8515_v53 = vld [vmem:[%s12086_s3 + $0xbc8] ss:$16 sps:$4 sm:$0xff]   ;;  %v8520_v38 = vld [vmem:[%s12086_s3 + $0x9ac] ss:$16 sps:$4 sm:$0xff]  }
 0x3c2   : > { %6859 = vmatpush2.bf16.msra.mxu0 %v8440_v41  ;;  %v8523_v24 = vld [vmem:[%s12086_s3 + $0xbac] ss:$16 sps:$4 sm:$0xff]   ;;  %v8518_v41 = vld [vmem:[%s12086_s3 + $0x9a8] ss:$16 sps:$4 sm:$0xff]  }
 0x3c3   : > { %6900 = vmatpush2.bf16.msra.mxu1 %v8443_v1  ;;  %6860 = vmatprep.subr.bf16.mxu0 %v8448_v40  ;;  %v8521_v1 = vld [vmem:[%s12086_s3 + $0xba8] ss:$16 sps:$4 sm:$0xff]   ;;  %v8526_v40 = vld [vmem:[%s12086_s3 + $0x98c] ss:$16 sps:$4 sm:$0xff]  }
 0x3c4   : > { %6901 = vmatprep.subr.bf16.mxu1 %v8451_v6  ;;  %v8529_v6 = vld [vmem:[%s12086_s3 + $0xb8c] ss:$16 sps:$4 sm:$0xff]  }
 0x3c6   : > { %6861 = vmatpush2.bf16.msra.mxu0 %v8446_v29  ;;  %v8524_v29 = vld [vmem:[%s12086_s3 + $0x988] ss:$16 sps:$4 sm:$0xff]  }
 0x3c7   : > { %6902 = vmatpush2.bf16.msra.mxu1 %v8449_v2  ;;  %6862 = vmatprep.subr.bf16.mxu0 %v8454_v62  ;;  %v8527_v2 = vld [vmem:[%s12086_s3 + $0xb88] ss:$16 sps:$4 sm:$0xff]   ;;  %v8532_v62 = vld [vmem:[%s12086_s3 + $0x96c] ss:$16 sps:$4 sm:$0xff]  }
 0x3c8   : > { %6903 = vmatprep.subr.bf16.mxu1 %v8457_v39  ;;  %v8535_v39 = vld [vmem:[%s12086_s3 + $0xb6c] ss:$16 sps:$4 sm:$0xff]  }
 0x3ca   : > { %6863 = vmatpush2.bf16.msra.mxu0 %v8452_v19  ;;  %v8530_v19 = vld [vmem:[%s12086_s3 + $0x968] ss:$16 sps:$4 sm:$0xff]  }
 0x3cb   : > { %6904 = vmatpush2.bf16.msra.mxu1 %v8455_v57  ;;  %6914 = vmatprep.subr.bf16.mxu0 %v8460_v13  ;;  %v8533_v57 = vld [vmem:[%s12086_s3 + $0xb68] ss:$16 sps:$4 sm:$0xff]   ;;  %v8538_v13 = vld [vmem:[%s12086_s3 + $0x94c] ss:$16 sps:$4 sm:$0xff]  }
 0x3cc   : > { %6955 = vmatprep.subr.bf16.mxu1 %v8463_v55  ;;  %v8541_v55 = vld [vmem:[%s12086_s3 + $0xb4c] ss:$16 sps:$4 sm:$0xff]  }
 0x3cd   : > { %6865 = vmatmul.mubr.bf16.vlgmr.msra.gmra.mxu0 %v12121_v50  ;;  %v8547_v50 = vld [vmem:[%s12086_s3 + $0xb2c] ss:$16 sps:$4 sm:$0xff]  }
 0x3ce   : > { %6906 = vmatmul.mubr.bf16.vlgmr.msra.gmra.mxu1 %v12122_v61  ;;  %6915 = vmatpush1.bf16.msra.mxu0 %v8458_v37  ;;  %v8536_v37 = vld [vmem:[%s12086_s3 + $0x948] ss:$16 sps:$4 sm:$0xff]  }
 0x3cf   : > { %6946 = vmatprep.mubr.bf16.mxu0 %v12123_v12  ;;  %6956 = vmatpush1.bf16.msra.mxu1 %v8461_v56  ;;  %v8539_v56 = vld [vmem:[%s12086_s3 + $0xb48] ss:$16 sps:$4 sm:$0xff]   ;;  %v8553_v12 = vld [vmem:[%s12086_s3 + $0xb0c] ss:$16 sps:$4 sm:$0xff]  }
 0x3d0   : > { %6987 = vmatprep.mubr.bf16.mxu1 %v12124_v35  ;;  %6916 = vmatprep.subr.bf16.mxu0 %v8466_v46  ;;  %v8544_v46 = vld [vmem:[%s12086_s3 + $0x92c] ss:$16 sps:$4 sm:$0xff]   ;;  %v8545_v61 = vld [vmem:[%s12086_s3 + $0xb28] ss:$16 sps:$4 sm:$0xff]  }
 0x3d1   : > { %6957 = vmatprep.subr.bf16.mxu1 %v8469_v48  ;;  %v8542_v48 = vld [vmem:[%s12086_s3 + $0x928] ss:$16 sps:$4 sm:$0xff]   ;;  %v8556_v35 = vld [vmem:[%s12086_s3 + $0xcec] ss:$16 sps:$4 sm:$0xff]  }
 0x3d2   : > { %6917 = vmatpush1.bf16.msra.mxu0 %v8464_v25  ;;  %v8550_v25 = vld [vmem:[%s12086_s3 + $0x90c] ss:$16 sps:$4 sm:$0xff]  }
 0x3d3   : > { %6958 = vmatpush1.bf16.msra.mxu1 %v8467_v45  ;;  %6918 = vmatprep.subr.bf16.mxu0 %v8472_v47  ;;  %v8548_v45 = vld [vmem:[%s12086_s3 + $0x908] ss:$16 sps:$4 sm:$0xff]  }
 0x3d4   : > { %6959 = vmatprep.subr.bf16.mxu1 %v8475_v33  ;;  %v8551_v47 = vld [vmem:[%s12086_s3 + $0xb08] ss:$16 sps:$4 sm:$0xff]   ;;  %v8559_v33 = vld [vmem:[%s12086_s3 + $0xeec] ss:$16 sps:$4 sm:$0xff]  }
 0x3d6   : > { %6919 = vmatpush1.bf16.msra.mxu0 %v8470_v3  ;;  %v8554_v3 = vld [vmem:[%s12086_s3 + $0xce8] ss:$16 sps:$4 sm:$0xff]  }
 0x3d7   : > { %6960 = vmatpush1.bf16.msra.mxu1 %v8473_v31  ;;  %6920 = vmatprep.subr.bf16.mxu0 %v8478_v11  ;;  %v8557_v31 = vld [vmem:[%s12086_s3 + $0xee8] ss:$16 sps:$4 sm:$0xff]   ;;  %v8562_v11 = vld [vmem:[%s12086_s3 + $0xccc] ss:$16 sps:$4 sm:$0xff]  }
 0x3d8   : > { %6961 = vmatprep.subr.bf16.mxu1 %v8481_v10 }
 0x3da   : > { %6921 = vmatpush1.bf16.msra.mxu0 %v8476_v15 }
 0x3db   : > { %6962 = vmatpush1.bf16.msra.mxu1 %v8479_v5  ;;  %6922 = vmatprep.subr.bf16.mxu0 %v8484_v51  ;;  %v8565_v5 = vld [vmem:[%s12086_s3 + $0xecc] ss:$16 sps:$4 sm:$0xff]  }
 0x3dc   : > { %6963 = vmatprep.subr.bf16.mxu1 %v8487_v22  ;;  %v8560_v22 = vld [vmem:[%s12086_s3 + $0xcc8] ss:$16 sps:$4 sm:$0xff]  }
 0x3de   : > { %6923 = vmatpush1.bf16.msra.mxu0 %v8482_v44 }
 0x3df   : > { %6964 = vmatpush1.bf16.msra.mxu1 %v8485_v28  ;;  %6924 = vmatprep.subr.bf16.mxu0 %v8490_v43  ;;  %v8563_v28 = vld [vmem:[%s12086_s3 + $0xec8] ss:$16 sps:$4 sm:$0xff]  }
 0x3e0   : > { %6965 = vmatprep.subr.bf16.mxu1 %v8493_v49 }
 0x3e2   : > { %6925 = vmatpush1.bf16.msra.mxu0 %v8488_v52 }
 0x3e3   : > { %6966 = vmatpush1.bf16.msra.mxu1 %v8491_v27  ;;  %6926 = vmatprep.subr.bf16.mxu0 %v8496_v30  ;;  %v8566_v30 = vld [vmem:[%s12086_s3 + $0xca8] ss:$16 sps:$4 sm:$0xff]  }
 0x3e4   : > { %6967 = vmatprep.subr.bf16.mxu1 %v8499_v16 }
 0x3e6   : > { %6927 = vmatpush1.bf16.msra.mxu0 %v8494_v63 }
 0x3e7   : > { %6968 = vmatpush1.bf16.msra.mxu1 %v8497_v58  ;;  %6928 = vmatprep.subr.bf16.mxu0 %v8502_v36 }
 0x3e8   : > { %6969 = vmatprep.subr.bf16.mxu1 %v8505_v32  ;;  %v8577_v32 = vld [vmem:[%s12086_s3 + $0xe8c] ss:$16 sps:$4 sm:$0xff]  }
 0x3ea   : > { %6929 = vmatpush1.bf16.msra.mxu0 %v8500_v42 }
 0x3eb   : > { %6970 = vmatpush1.bf16.msra.mxu1 %v8503_v18  ;;  %6930 = vmatprep.subr.bf16.mxu0 %v8508_v20  ;;  %v8572_v18 = vld [vmem:[%s12086_s3 + $0xc88] ss:$16 sps:$4 sm:$0xff]  }
 0x3ec   : > { %6971 = vmatprep.subr.bf16.mxu1 %v8511_v7  ;;  %v8575_v20 = vld [vmem:[%s12086_s3 + $0xe88] ss:$16 sps:$4 sm:$0xff]   ;;  %v8580_v7 = vld [vmem:[%s12086_s3 + $0xc6c] ss:$16 sps:$4 sm:$0xff]  }
 0x3ee   : > { %6931 = vmatpush2.bf16.msra.mxu0 %v8506_v26  ;;  %v8583_v26 = vld [vmem:[%s12086_s3 + $0xe6c] ss:$16 sps:$4 sm:$0xff]  }
 0x3ef   : > { %6972 = vmatpush2.bf16.msra.mxu1 %v8509_v60  ;;  %6932 = vmatprep.subr.bf16.mxu0 %v8514_v21  ;;  %v8578_v60 = vld [vmem:[%s12086_s3 + $0xc68] ss:$16 sps:$4 sm:$0xff]  }
 0x3f0   : > { %6973 = vmatprep.subr.bf16.mxu1 %v8517_v4  ;;  %v8581_v21 = vld [vmem:[%s12086_s3 + $0xe68] ss:$16 sps:$4 sm:$0xff]   ;;  %v8586_v4 = vld [vmem:[%s12086_s3 + $0xc4c] ss:$16 sps:$4 sm:$0xff]  }
 0x3f2   : > { %6933 = vmatpush2.bf16.msra.mxu0 %v8512_v9  ;;  %v8589_v9 = vld [vmem:[%s12086_s3 + $0xe4c] ss:$16 sps:$4 sm:$0xff]  }
 0x3f3   : > { %6974 = vmatpush2.bf16.msra.mxu1 %v8515_v53  ;;  %6934 = vmatprep.subr.bf16.mxu0 %v8520_v38  ;;  %v8584_v53 = vld [vmem:[%s12086_s3 + $0xc48] ss:$16 sps:$4 sm:$0xff]  }
 0x3f4   : > { %6975 = vmatprep.subr.bf16.mxu1 %v8523_v24  ;;  %v8587_v38 = vld [vmem:[%s12086_s3 + $0xe48] ss:$16 sps:$4 sm:$0xff]   ;;  %v8592_v24 = vld [vmem:[%s12086_s3 + $0xc2c] ss:$16 sps:$4 sm:$0xff]  }
 0x3f6   : > { %6935 = vmatpush2.bf16.msra.mxu0 %v8518_v41  ;;  %v8595_v41 = vld [vmem:[%s12086_s3 + $0xe2c] ss:$16 sps:$4 sm:$0xff]  }
 0x3f7   : > { %6976 = vmatpush2.bf16.msra.mxu1 %v8521_v1  ;;  %6936 = vmatprep.subr.bf16.mxu0 %v8526_v40  ;;  %v8590_v1 = vld [vmem:[%s12086_s3 + $0xc28] ss:$16 sps:$4 sm:$0xff]  }
 0x3f8   : > { %6977 = vmatprep.subr.bf16.mxu1 %v8529_v6  ;;  %v8593_v40 = vld [vmem:[%s12086_s3 + $0xe28] ss:$16 sps:$4 sm:$0xff]   ;;  %v8598_v6 = vld [vmem:[%s12086_s3 + $0xc0c] ss:$16 sps:$4 sm:$0xff]  }
 0x3fa   : > { %6937 = vmatpush2.bf16.msra.mxu0 %v8524_v29  ;;  %v8601_v29 = vld [vmem:[%s12086_s3 + $0xe0c] ss:$16 sps:$4 sm:$0xff]  }
 0x3fb   : > { %6978 = vmatpush2.bf16.msra.mxu1 %v8527_v2  ;;  %6938 = vmatprep.subr.bf16.mxu0 %v8532_v62  ;;  %v8596_v2 = vld [vmem:[%s12086_s3 + $0xc08] ss:$16 sps:$4 sm:$0xff]  }
 0x3fc   : > { %6979 = vmatprep.subr.bf16.mxu1 %v8535_v39  ;;  %v8599_v62 = vld [vmem:[%s12086_s3 + $0xe08] ss:$16 sps:$4 sm:$0xff]   ;;  %v8604_v39 = vld [vmem:[%s12086_s3 + $0xdec] ss:$16 sps:$4 sm:$0xff]  }
 0x3fe   : > { %6939 = vmatpush2.bf16.msra.mxu0 %v8530_v19  ;;  %v8607_v19 = vld [vmem:[%s12086_s3 + $0xfec] ss:$16 sps:$4 sm:$0xff]  }
 0x3ff   : > { %6980 = vmatpush2.bf16.msra.mxu1 %v8533_v57  ;;  %6940 = vmatprep.subr.bf16.mxu0 %v8538_v13  ;;  %v8602_v57 = vld [vmem:[%s12086_s3 + $0xde8] ss:$16 sps:$4 sm:$0xff]  }
 0x400   : > { %6981 = vmatprep.subr.bf16.mxu1 %v8541_v55  ;;  %v8605_v13 = vld [vmem:[%s12086_s3 + $0xfe8] ss:$16 sps:$4 sm:$0xff]   ;;  %v8610_v55 = vld [vmem:[%s12086_s3 + $0xdcc] ss:$16 sps:$4 sm:$0xff]  }
 0x402   : > { %6941 = vmatpush2.bf16.msra.mxu0 %v8536_v37  ;;  %v8613_v37 = vld [vmem:[%s12086_s3 + $0xfcc] ss:$16 sps:$4 sm:$0xff]  }
 0x403   : > { %6982 = vmatpush2.bf16.msra.mxu1 %v8539_v56  ;;  %6942 = vmatprep.subr.bf16.mxu0 %v8544_v46  ;;  %v8608_v56 = vld [vmem:[%s12086_s3 + $0xdc8] ss:$16 sps:$4 sm:$0xff]  }
 0x404   : > { %6983 = vmatprep.subr.bf16.mxu1 %v8547_v50  ;;  %v8611_v46 = vld [vmem:[%s12086_s3 + $0xfc8] ss:$16 sps:$4 sm:$0xff]   ;;  %v8616_v50 = vld [vmem:[%s12086_s3 + $0xdac] ss:$16 sps:$4 sm:$0xff]  }
 0x406   : > { %6943 = vmatpush2.bf16.msra.mxu0 %v8542_v48  ;;  %v8619_v48 = vld [vmem:[%s12086_s3 + $0xfac] ss:$16 sps:$4 sm:$0xff]  }
 0x407   : > { %6984 = vmatpush2.bf16.msra.mxu1 %v8545_v61  ;;  %6944 = vmatprep.subr.bf16.mxu0 %v8550_v25  ;;  %v8614_v61 = vld [vmem:[%s12086_s3 + $0xda8] ss:$16 sps:$4 sm:$0xff]  }
 0x408   : > { %6985 = vmatprep.subr.bf16.mxu1 %v8553_v12  ;;  %v8617_v25 = vld [vmem:[%s12086_s3 + $0xfa8] ss:$16 sps:$4 sm:$0xff]   ;;  %v8622_v12 = vld [vmem:[%s12086_s3 + $0xd8c] ss:$16 sps:$4 sm:$0xff]  }
 0x40a   : > { %6945 = vmatpush2.bf16.msra.mxu0 %v8548_v45  ;;  %v8625_v45 = vld [vmem:[%s12086_s3 + $0xf8c] ss:$16 sps:$4 sm:$0xff]  }
 0x40b   : > { %6986 = vmatpush2.bf16.msra.mxu1 %v8551_v47  ;;  %6996 = vmatprep.subr.bf16.mxu0 %v8556_v35  ;;  %v8620_v47 = vld [vmem:[%s12086_s3 + $0xd88] ss:$16 sps:$4 sm:$0xff]  }
 0x40c   : > { %7037 = vmatprep.subr.bf16.mxu1 %v8559_v33  ;;  %v8623_v35 = vld [vmem:[%s12086_s3 + $0xf88] ss:$16 sps:$4 sm:$0xff]   ;;  %v8628_v33 = vld [vmem:[%s12086_s3 + $0xd6c] ss:$16 sps:$4 sm:$0xff]  }
 0x40d   : > { %6947 = vmatmul.mubr.bf16.vlgmr.msra.gmra.mxu0 %v10791_v0  ;;  %v6702_v10 = vpop.f32.mrf.mxu0  ;;  %v6743_v15 = vpop.f32.mrf.mxu1 }
 0x40e   : > { %6988 = vmatmul.mubr.bf16.vlgmr.msra.gmra.mxu1 %v10884_v14  ;;  %v6703_v51 = vadd.f32 %v6702_v10, %v11617_v23  ;;  %6997 = vmatpush1.bf16.msra.mxu0 %v8554_v3  ;;  %v8568_v14 = vld [vmem:[%s12086_s3 + $0xcac] ss:$16 sps:$4 sm:$0xff]  }
 0x40f   : > { %7028 = vmatprep.mubr.bf16.mxu0 %v11256_v54  ;;  %7038 = vmatpush1.bf16.msra.mxu1 %v8557_v31  ;;  %v6704_v44 = vpop.f32.mrf.mxu0  ;;  %v6745_v0 = vpop.f32.mrf.mxu1  ;;  %v8571_v54 = vld [vmem:[%s12086_s3 + $0xeac] ss:$16 sps:$4 sm:$0xff]   ;;  %v8626_v31 = vld [vmem:[%s12086_s3 + $0xd68] ss:$16 sps:$4 sm:$0xff]  }
 0x410   : > { %v6744_v43 = vadd.f32 %v6743_v15, %v6703_v51  ;;  %7069 = vmatprep.mubr.bf16.mxu1 %v11258_v8  ;;  %v6705_v23 = vadd.f32 %v6704_v44, %v11629_v17  ;;  %6998 = vmatprep.subr.bf16.mxu0 %v8562_v11  ;;  %v8569_v8 = vld [vmem:[%s12086_s3 + $0xea8] ss:$16 sps:$4 sm:$0xff]   ;;  %v8574_v17 = vld [vmem:[%s12086_s3 + $0xc8c] ss:$16 sps:$4 sm:$0xff]  }
 0x411   : > { %7039 = vmatprep.subr.bf16.mxu1 %v8565_v5  ;;  %v6706_v49 = vpop.f32.mrf.mxu0  ;;  %v6747_v52 = vpop.f32.mrf.mxu1  ;;  %v8631_v3 = vld [vmem:[%s12086_s3 + $0xf6c] ss:$16 sps:$4 sm:$0xff]   ;;  %v8629_v11 = vld [vmem:[%s12086_s3 + $0xf68] ss:$16 sps:$4 sm:$0xff]  }
 0x412   : > { %v6746_v27 = vadd.f32 %v6745_v0, %v6705_v23  ;;  %6999 = vmatpush1.bf16.msra.mxu0 %v8560_v22  ;;  %v7078_v58 = vmax.f32 %v6744_v43, 0.0  ;;  %v8634_v10 = vld [vmem:[%s12086_s3 + $0xd4c] ss:$16 sps:$4 sm:$0xff]   ;;  %v8632_v5 = vld [vmem:[%s12086_s3 + $0xd48] ss:$16 sps:$4 sm:$0xff]  }
 0x413   : > { %7040 = vmatpush1.bf16.msra.mxu1 %v8563_v28  ;;  %v6707_v16 = vpop.f32.mrf.mxu0  ;;  %v6748_v63 = vpop.f32.mrf.mxu1  ;;  %7000 = vmatprep.subr.bf16.mxu0 %v8568_v14  ;;  %v8637_v15 = vld [vmem:[%s12086_s3 + $0xf4c] ss:$16 sps:$4 sm:$0xff]   ;;  %v8635_v51 = vld [vmem:[%s12086_s3 + $0xf48] ss:$16 sps:$4 sm:$0xff]   ;;  %v8652_v49 = vld [vmem:[%s12087_s4] sm:$0xf] }
 0x414   : > { %v7079_v36 = vmax.f32 %v6746_v27, 0.0  ;;  %7041 = vmatprep.subr.bf16.mxu1 %v8571_v54  ;;  %v8640_v22 = vld [vmem:[%s12086_s3 + $0xd2c] ss:$16 sps:$4 sm:$0xff]   ;;  %v8638_v0 = vld [vmem:[%s12086_s3 + $0xd28] ss:$16 sps:$4 sm:$0xff]  }
 0x415   : > { %v8643_v44 = vld [vmem:[%s12086_s3 + $0xf2c] ss:$16 sps:$4 sm:$0xff]   ;;  %v8641_v28 = vld [vmem:[%s12086_s3 + $0xf28] ss:$16 sps:$4 sm:$0xff]  }
 0x416   : > { %v11908_v42 = vcombine.low %v7078_v58, %v7079_v36  ;;  %7001 = vmatpush1.bf16.msra.mxu0 %v8566_v30  ;;  %v8646_v14 = vld [vmem:[%s12086_s3 + $0xd0c] ss:$16 sps:$4 sm:$0xff]   ;;  %v8644_v23 = vld [vmem:[%s12086_s3 + $0xd08] ss:$16 sps:$4 sm:$0xff]   ;;  %v12126_v30 = vld [vmem:[#allocation5_spill] sm:$0xff] }
 0x417   : > { %7042 = vmatpush1.bf16.msra.mxu1 %v8569_v8  ;;  %7002 = vmatprep.subr.bf16.mxu0 %v8574_v17  ;;  %v8649_v43 = vld [vmem:[%s12086_s3 + $0xf0c] ss:$16 sps:$4 sm:$0xff]   ;;  %v8647_v54 = vld [vmem:[%s12086_s3 + $0xf08] ss:$16 sps:$4 sm:$0xff]   ;;  %v6417_v16 = vrot.slane %v8652_v49, %v12126_v30 }
 0x418   : > { %7043 = vmatprep.subr.bf16.mxu1 %v8577_v32  ;;  %v12125_v52 = vld [vmem:[#allocation4_spill] sm:$0xff] }
 0x419   : > { %v6413_v27 = vrot.slane %v8652_v49, %v12125_v52  ;;  %v12128_v52 = vlaneseq }
 0x41a   : > { %7003 = vmatpush1.bf16.msra.mxu0 %v8572_v18 }
 0x41b   : > { %7044 = vmatpush1.bf16.msra.mxu1 %v8575_v20  ;;  %7004 = vmatprep.subr.bf16.mxu0 %v8580_v7  ;;  %vm7113_vm3 = vcmp.lt.s32.totalorder %v12128_v52, 512 }
 0x41c   : > { %7045 = vmatprep.subr.bf16.mxu1 %v8583_v26 }
 0x41e   : > { %7005 = vmatpush1.bf16.msra.mxu0 %v8578_v60 }
 0x41f   : > { %7046 = vmatpush1.bf16.msra.mxu1 %v8581_v21  ;;  %7006 = vmatprep.subr.bf16.mxu0 %v8586_v4 }
 0x420   : > { %7047 = vmatprep.subr.bf16.mxu1 %v8589_v9 }
 0x422   : > { %7007 = vmatpush1.bf16.msra.mxu0 %v8584_v53 }
 0x423   : > { %7048 = vmatpush1.bf16.msra.mxu1 %v8587_v38  ;;  %7008 = vmatprep.subr.bf16.mxu0 %v8592_v24 }
 0x424   : > { %7049 = vmatprep.subr.bf16.mxu1 %v8595_v41 }
 0x426   : > { %7009 = vmatpush1.bf16.msra.mxu0 %v8590_v1 }
 0x427   : > { %7050 = vmatpush1.bf16.msra.mxu1 %v8593_v40  ;;  %7010 = vmatprep.subr.bf16.mxu0 %v8598_v6 }
 0x428   : > { %7051 = vmatprep.subr.bf16.mxu1 %v8601_v29 }
 0x42a   : > { %7011 = vmatpush1.bf16.msra.mxu0 %v8596_v2 }
 0x42b   : > { %7052 = vmatpush1.bf16.msra.mxu1 %v8599_v62  ;;  %7012 = vmatprep.subr.bf16.mxu0 %v8604_v39 }
 0x42c   : > { %7053 = vmatprep.subr.bf16.mxu1 %v8607_v19 }
 0x42e   : > { %7013 = vmatpush2.bf16.msra.mxu0 %v8602_v57 }
 0x42f   : > { %7054 = vmatpush2.bf16.msra.mxu1 %v8605_v13  ;;  %7014 = vmatprep.subr.bf16.mxu0 %v8610_v55 }
 0x430   : > { %7055 = vmatprep.subr.bf16.mxu1 %v8613_v37 }
 0x432   : > { %7015 = vmatpush2.bf16.msra.mxu0 %v8608_v56 }
 0x433   : > { %7056 = vmatpush2.bf16.msra.mxu1 %v8611_v46  ;;  %7016 = vmatprep.subr.bf16.mxu0 %v8616_v50  ;;  %v8679_v50 = vmov 1966171168  }
 0x434   : > { %7057 = vmatprep.subr.bf16.mxu1 %v8619_v48  ;;  %v7089_v48 = vunpack.c.l.s4 %v8679_v50 }
 0x436   : > { %7017 = vmatpush2.bf16.msra.mxu0 %v8614_v61 }
 0x437   : > { %7058 = vmatpush2.bf16.msra.mxu1 %v8617_v25  ;;  %7018 = vmatprep.subr.bf16.mxu0 %v8622_v12 }
 0x438   : > { %7059 = vmatprep.subr.bf16.mxu1 %v8625_v45 }
 0x43a   : > { %7019 = vmatpush2.bf16.msra.mxu0 %v8620_v47 }
 0x43b   : > { %7060 = vmatpush2.bf16.msra.mxu1 %v8623_v35  ;;  %7020 = vmatprep.subr.bf16.mxu0 %v8628_v33  ;;  %v7090_v33 = vunpack.c.0.s8 %v7089_v48 }
 0x43c   : > { %7061 = vmatprep.subr.bf16.mxu1 %v8631_v3 }
 0x43e   : > { %7021 = vmatpush2.bf16.msra.mxu0 %v8626_v31 }
 0x43f   : > { %7062 = vmatpush2.bf16.msra.mxu1 %v8629_v11  ;;  %7022 = vmatprep.subr.bf16.mxu0 %v8634_v10 }
 0x440   : > { %7063 = vmatprep.subr.bf16.mxu1 %v8637_v15 }
 0x442   : > { %7023 = vmatpush2.bf16.msra.mxu0 %v8632_v5 }
 0x443   : > { %7064 = vmatpush2.bf16.msra.mxu1 %v8635_v51  ;;  %7024 = vmatprep.subr.bf16.mxu0 %v8640_v22  ;;  %v12127_v22 = vld [vmem:[#allocation3_spill] sm:$0xff] }
 0x444   : > { %7065 = vmatprep.subr.bf16.mxu1 %v8643_v44  ;;  %v7093_v44 = vsub.s32 %v7090_v33, %v12127_v22 }
 0x446   : > { %7025 = vmatpush2.bf16.msra.mxu0 %v8638_v0 }
 0x447   : > { %7066 = vmatpush2.bf16.msra.mxu1 %v8641_v28  ;;  %7026 = vmatprep.subr.bf16.mxu0 %v8646_v14 }
 0x448   : > { %7067 = vmatprep.subr.bf16.mxu1 %v8649_v43 }
 0x44a   : > { %7027 = vmatpush2.bf16.msra.mxu0 %v8644_v23  ;;  %v7094_v23 = vrot.slane %v11908_v42, %v7093_v44 }
 0x44b   : > { %7068 = vmatpush2.bf16.msra.mxu1 %v8647_v54 }
 0x44d   : > { %v6784_v63 = vpop.f32.mrf.mxu0  ;;  %v6825_v8 = vpop.f32.mrf.mxu1  ;;  %7029 = vmatmul.mubr.bf16.vlgmr.msra.gmra.mxu0 %v11266_v59 }
 0x44e   : > { %v6785_v17 = vadd.f32 %v6784_v63, %v6413_v27  ;;  %7070 = vmatmul.mubr.bf16.vlgmr.msra.gmra.mxu1 %v11268_v34 }
 0x44f   : > { %v6786_v58 = vpop.f32.mrf.mxu0  ;;  %v6827_v36 = vpop.f32.mrf.mxu1 }
 0x450   : > { %v6826_v32 = vadd.f32 %v6825_v8, %v6785_v17  ;;  %v6787_v18 = vadd.f32 %v6786_v58, %v6417_v16 }
 0x451   : > { %v6788_v20 = vpop.f32.mrf.mxu0  ;;  %v6829_v7 = vpop.f32.mrf.mxu1 }
 0x452   : > { %v6828_v26 = vadd.f32 %v6827_v36, %v6787_v18 }
 0x453   : > { %v6789_v60 = vpop.f32.mrf.mxu0  ;;  %v6830_v21 = vpop.f32.mrf.mxu1 }
 0x48d   : > { %v6866_v4 = vpop.f32.mrf.mxu0 }
 0x48e   : > { %v6867_v9 = vadd.f32 %v6866_v4, %v6826_v32  ;;  %v6907_v53 = vpop.f32.mrf.mxu1 }
 0x48f   : > { %v6868_v38 = vpop.f32.mrf.mxu0 }
 0x490   : > { %v6908_v24 = vadd.f32 %v6907_v53, %v6867_v9  ;;  %v6869_v41 = vadd.f32 %v6868_v38, %v6828_v26  ;;  %v6909_v1 = vpop.f32.mrf.mxu1 }
 0x491   : > { %v6870_v59 = vpop.f32.mrf.mxu0 }
 0x492   : > { %v6910_v40 = vadd.f32 %v6909_v1, %v6869_v41  ;;  %v6911_v6 = vpop.f32.mrf.mxu1 }
 0x493   : > { %v6871_v34 = vpop.f32.mrf.mxu0 }
 0x494   : > { %v6912_v29 = vpop.f32.mrf.mxu1 }
 0x4cd   : > { %v6948_v2 = vpop.f32.mrf.mxu0 }
 0x4ce   : > { %v6989_v62 = vpop.f32.mrf.mxu1  ;;  %v6949_v56 = vadd.f32 %v6948_v2, %v6908_v24 }
 0x4cf   : > { %v6950_v39 = vpop.f32.mrf.mxu0 }
 0x4d0   : > { %v6991_v19 = vpop.f32.mrf.mxu1  ;;  %v6951_v46 = vadd.f32 %v6950_v39, %v6910_v40  ;;  %v6990_v61 = vadd.f32 %v6989_v62, %v6949_v56 }
 0x4d1   : > { %v6952_v57 = vpop.f32.mrf.mxu0 }
 0x4d2   : > { %v6993_v13 = vpop.f32.mrf.mxu1  ;;  %v6992_v12 = vadd.f32 %v6991_v19, %v6951_v46 }
 0x4d3   : > { %v6953_v55 = vpop.f32.mrf.mxu0 }
 0x4d4   : > { %v6994_v37 = vpop.f32.mrf.mxu1 }
 0x50d   : > { %v7030_v25 = vpop.f32.mrf.mxu0 }
 0x50e   : > { %v7031_v45 = vadd.f32 %v7030_v25, %v6990_v61  ;;  %v7071_v47 = vpop.f32.mrf.mxu1 }
 0x50f   : > { %v7032_v35 = vpop.f32.mrf.mxu0 }
 0x510   : > { %v7072_v3 = vadd.f32 %v7071_v47, %v7031_v45  ;;  %v7033_v31 = vadd.f32 %v7032_v35, %v6992_v12  ;;  %v7073_v11 = vpop.f32.mrf.mxu1 }
 0x511   : > { %v7034_v10 = vpop.f32.mrf.mxu0 }
 0x512   : > { %v7074_v15 = vadd.f32 %v7073_v11, %v7033_v31  ;;  %v7075_v5 = vpop.f32.mrf.mxu1  ;;  %v7080_v0 = vmax.f32 %v7072_v3, 0.0 }
 0x513   : > { %v7035_v51 = vpop.f32.mrf.mxu0 }
 0x514   : > { %v7081_v28 = vmax.f32 %v7074_v15, 0.0  ;;  %v7076_v14 = vpop.f32.mrf.mxu1 }
 0x516   : > { %v7087_v43 = vcombine.low %v7080_v0, %v7081_v28 }
 0x518   : > { %v7101_v54 = vrot.slane %v7087_v43, %v7093_v44 }
 0x51a   : > { %v7102_v49 = vcombine.low %v7094_v23, %v7101_v54 }
 0x51c   : > { %v7109_v27 = vrot.slane %v7102_v49, %v7093_v44 }
 0x51e   : > { %7115 = vst.msk [vmem:[%s250_s26] sm:$0xf] %vm7113_vm3, %v7109_v27 }
 0x51f PF: > { %s15_s20 = sadd.s32 1, %s8675_s20   ;;  %s12129_s18 = smov %s8671_s19 }
 0x520   : > { %p12_p5 = scmp.ge.s32.totalorder %s15_s20, 4   ;;  %s12130_s19 = smov %s12132_s21 }
 0x522   :  { %14 = sbr.rel (!%p12_p5) target bundleno = 2 (0x2), region = 78 }

</bundles_post_ra>
